<compile_context>
chip_gen: v7x
topology: tpu7x:2x2x1
jax: 0.10.0
libtpu: 0.0.40
codegen_flags: <defaults>
</compile_context>

<pallas_src>
import math
from functools import partial

import jax
import jax.numpy as jnp
from jax.experimental import pallas as pl
from jax.experimental.pallas import tpu as pltpu


# --------------------------------------------------------------------------
# In-kernel helpers (f32 math)
# --------------------------------------------------------------------------
def _layer_norm(x, w, b, eps=1e-5):
    # PyTorch nn.LayerNorm semantics: biased variance over the last dim.
    mean = jnp.mean(x, axis=-1, keepdims=True)
    var = jnp.mean((x - mean) ** 2, axis=-1, keepdims=True)
    return (x - mean) * jax.lax.rsqrt(var + eps) * w + b


def _gelu(x, approximate):
    if approximate:
        # tanh approximation rides the EUP slot (perf option for v6e/v7x)
        return jax.nn.gelu(x, approximate=True)
    # PyTorch nn.GELU default: 0.5*x*(1+erf(x/sqrt(2)))
    return 0.5 * x * (1.0 + jax.lax.erf(x * (1.0 / math.sqrt(2.0))))


# --------------------------------------------------------------------------
# Pallas kernel: one transformer Block for bB batch elements per grid step
# --------------------------------------------------------------------------
def block_kernel(num_heads, bB, approx_gelu,
                 x_ref,
                 ln1w_ref, ln1b_ref,
                 wqkv_ref,
                 wproj_ref, bproj_ref,
                 ln2w_ref, ln2b_ref,
                 w1_ref, b1_ref,
                 w2_ref, b2_ref,
                 o_ref):
    f32 = jnp.float32
    bf16 = jnp.bfloat16

    x3 = x_ref[...].astype(f32)                        # (bB, N, C)
    _, N, C = x3.shape
    H = num_heads
    Dh = C // H
    scale = Dh ** (-0.5)
    M = bB * N

    x = x3.reshape(M, C)                               # flatten rows for dense matmuls

    # ---------------- Attention branch ----------------
    xn = _layer_norm(x, ln1w_ref[0], ln1b_ref[0])                       # (M, C)  f32
    qkv = jnp.dot(xn.astype(bf16), wqkv_ref[...],
                  preferred_element_type=f32)                           # (M, 3C) f32

    def heads(base, scl=None):
        # (M, 3C) -> (bB*H, N, Dh): static sublane/lane slices stacked on a
        # new leading axis (no sublane transpose).  Scale (if any) is applied
        # in f32 before the bf16 cast.
        parts = []
        for b in range(bB):
            blk = qkv[b * N:(b + 1) * N]
            for h in range(H):
                sl = blk[:, base + h * Dh: base + (h + 1) * Dh]
                if scl is not None:
                    sl = sl * scl
                parts.append(sl.astype(bf16))
        return jnp.stack(parts, axis=0)

    q = heads(0, scale)          # (G, N, Dh) bf16, scale folded into q
    k = heads(C)
    v = heads(2 * C)

    # Batched QK^T over all (batch, head) groups at once.
    s = jnp.einsum('gqd,gkd->gqk', q, k,
                   preferred_element_type=f32)                          # (G, N, N) f32
    # Stable softmax; exp overwrites the score storage, probs cast to bf16
    # immediately so only one (G,N,N) f32 tensor is ever live.
    s = s - jnp.max(s, axis=-1, keepdims=True)
    s = jnp.exp(s)
    p = (s * pl.reciprocal(jnp.sum(s, axis=-1, keepdims=True),
                           approx=True)).astype(bf16)                   # (G, N, N) bf16

    # Batched PV over all groups.
    oh = jnp.einsum('gqk,gkd->gqd', p, v,
                    preferred_element_type=f32).astype(bf16)            # (G, N, Dh) bf16

    # Re-pack heads along lanes -> (M, C), then ONE K=C projection matmul.
    rows = [jnp.concatenate([oh[b * H + h] for h in range(H)], axis=-1)  # (N, C)
            for b in range(bB)]
    attn_cat = rows[0] if bB == 1 else jnp.concatenate(rows, axis=0)     # (M, C) bf16

    attn_out = jnp.dot(attn_cat, wproj_ref[...],
                       preferred_element_type=f32) + bproj_ref[0]        # (M, C) f32
    x1 = x + attn_out                                                    # residual 1

    # ---------------- MLP branch ----------------
    xn2 = _layer_norm(x1, ln2w_ref[0], ln2b_ref[0])
    h1 = jnp.dot(xn2.astype(bf16), w1_ref[...],
                 preferred_element_type=f32) + b1_ref[0]                 # (M, Hm) f32
    h1 = _gelu(h1, approx_gelu)
    h2 = jnp.dot(h1.astype(bf16), w2_ref[...],
                 preferred_element_type=f32) + b2_ref[0]                 # (M, C) f32
    x2 = x1 + h2                                                         # residual 2

    o_ref[...] = x2.reshape(bB, N, C).astype(o_ref.dtype)


# --------------------------------------------------------------------------
# Wrapper
# --------------------------------------------------------------------------
def _vmem_limit_bytes():
    # 3/4 of physical per-core VMEM, capped at 96 MiB:
    #   v7x (64 MiB)  -> 48 MiB (headroom for compiler scratch)
    #   v5e/v6e (128) -> 96 MiB
    try:
        cap = int(pltpu.get_tpu_info().vmem_capacity_bytes)
    except Exception:
        cap = 128 << 20
    return int(min(96 << 20, cap * 3 // 4))


def _const_spec(shape, single_buffer):
    rank = len(shape)
    idx = lambda b: (0,) * rank
    if single_buffer and hasattr(pl, "Buffered"):
        try:
            # Constant index map => fetched once; single buffer halves the
            # resident weight VMEM vs the default double-buffering.
            return pl.BlockSpec(shape, idx, pipeline_mode=pl.Buffered(1))
        except TypeError:
            pass
    return pl.BlockSpec(shape, idx)


def vit_block(x, kparams, num_heads, block_batch=None, approx_gelu=False):
    B, N, C = x.shape
    Hm = kparams["w1_t"].shape[1]            # mlp hidden dim
    H = num_heads

    # Rows per grid step: bB=2 fills the 256-wide MXU M dim on v6e/v7x for
    # ViT-sized N (~196); keep 1 if B is odd (or tune to 1 on v5e).
    if block_batch is None:
        block_batch = 2 if (B % 2 == 0 and B >= 2) else 1
    bB = block_batch
    assert B % bB == 0, "block_batch must divide B"

    # Advisory cost estimate for XLA's scheduler.
    Dh = C // H
    flops = 2 * B * (N * C * 3 * C                     # qkv proj
                     + 2 * H * N * N * Dh              # QK^T + PV
                     + N * C * C                       # output proj
                     + 2 * N * C * Hm)                 # mlp fc1 + fc2
    transcendentals = B * (H * N * N + N * Hm + H * N)
    bytes_accessed = (2 * B * N * C * 4                                  # x + out (f32)
                      + (C * 3 * C + C * C + 2 * C * Hm) * 2             # bf16 weights
                      + (6 * C + Hm) * 4)                                # biases / LN

    def build(single_buffer_weights):
        in_specs = [
            pl.BlockSpec((bB, N, C), lambda b: (b, 0, 0)),               # x
            _const_spec((1, C), single_buffer_weights),                  # ln1 w
            _const_spec((1, C), single_buffer_weights),                  # ln1 b
            _const_spec((C, 3 * C), single_buffer_weights),              # qkv W^T (bf16)
            _const_spec((C, C), single_buffer_weights),                  # proj W^T (bf16)
            _const_spec((1, C), single_buffer_weights),                  # proj bias
            _const_spec((1, C), single_buffer_weights),                  # ln2 w
            _const_spec((1, C), single_buffer_weights),                  # ln2 b
            _const_spec((C, Hm), single_buffer_weights),                 # fc1 W^T (bf16)
            _const_spec((1, Hm), single_buffer_weights),                 # fc1 bias
            _const_spec((Hm, C), single_buffer_weights),                 # fc2 W^T (bf16)
            _const_spec((1, C), single_buffer_weights),                  # fc2 bias
        ]
        return pl.pallas_call(
            partial(block_kernel, num_heads, bB, approx_gelu),
            out_shape=jax.ShapeDtypeStruct((B, N, C), x.dtype),
            grid=(B // bB,),
            in_specs=in_specs,
            out_specs=pl.BlockSpec((bB, N, C), lambda b: (b, 0, 0)),
            compiler_params=pltpu.CompilerParams(
                dimension_semantics=("parallel",),
                vmem_limit_bytes=_vmem_limit_bytes()),
            cost_estimate=pl.CostEstimate(flops=flops,
                                          transcendentals=transcendentals,
                                          bytes_accessed=bytes_accessed),
        )

    args = (x,
            kparams["ln1_w"], kparams["ln1_b"],
            kparams["wqkv_t"],
            kparams["wproj_t"], kparams["bproj"],
            kparams["ln2_w"], kparams["ln2_b"],
            kparams["w1_t"], kparams["b1"],
            kparams["w2_t"], kparams["b2"])

    try:
        return build(True)(*args)
    except Exception:
        # Fallback: jax version without pipeline_mode=Buffered(1) support.
        return build(False)(*args)


# --------------------------------------------------------------------------
# Pure-JAX f32 reference (mirrors the PyTorch forward exactly)
# --------------------------------------------------------------------------
def ref_block(x, params, num_heads):
    B, N, C = x.shape
    head_dim = C // num_heads
    scale = head_dim ** (-0.5)

    def ln(z, w, b):
        m = jnp.mean(z, axis=-1, keepdims=True)
        v = jnp.mean((z - m) ** 2, axis=-1, keepdims=True)
        return (z - m) / jnp.sqrt(v + 1e-5) * w[0] + b[0]

    xn = ln(x, params["ln1_w"], params["ln1_b"])
    qkv = xn @ params["wqkv_t"]                       # (B, N, 3C)
    qkv = qkv.reshape(B, N, 3, num_heads, head_dim).transpose(2, 0, 3, 1, 4)
    q, k, v = qkv[0], qkv[1], qkv[2]                  # (B, H, N, Dh)
    attn = (q @ jnp.swapaxes(k, -2, -1)) * scale
    attn = jax.nn.softmax(attn, axis=-1)
    o = (attn @ v).transpose(0, 2, 1, 3).reshape(B, N, C)
    o = o @ params["wproj_t"] + params["bproj"][0]
    x = x + o

    xn2 = ln(x, params["ln2_w"], params["ln2_b"])
    h = xn2 @ params["w1_t"] + params["b1"][0]
    h = 0.5 * h * (1.0 + jax.lax.erf(h / math.sqrt(2.0)))
    h = h @ params["w2_t"] + params["b2"][0]
    return x + h


# --------------------------------------------------------------------------
def make_params(key, dim, num_heads, mlp_ratio=4.0):
    Hm = int(dim * mlp_ratio)
    ks = jax.random.split(key, 8)
    s = 0.02

    def w(k, shape):
        # round-trip through bf16 so the f32 reference and bf16 kernel see
        # numerically identical weight values
        return (s * jax.random.normal(k, shape, jnp.float32)
                ).astype(jnp.bfloat16).astype(jnp.float32)

    return {
        # LayerNorms init like PyTorch: weight=1, bias=0
        "ln1_w": jnp.ones((1, dim), jnp.float32),
        "ln1_b": jnp.zeros((1, dim), jnp.float32),
        "ln2_w": jnp.ones((1, dim), jnp.float32),
        "ln2_b": jnp.zeros((1, dim), jnp.float32),
        # Linear weights (pre-transposed so kernel does x @ W^T), qkv_bias=False
        "wqkv_t": w(ks[0], (dim, 3 * dim)),
        "wproj_t": w(ks[1], (dim, dim)),
        "bproj": s * jax.random.normal(ks[2], (1, dim), jnp.float32),
        "w1_t": w(ks[3], (dim, Hm)),
        "b1": s * jax.random.normal(ks[4], (1, Hm), jnp.float32),
        "w2_t": w(ks[5], (Hm, dim)),
        "b2": s * jax.random.normal(ks[6], (1, dim), jnp.float32),
    }


def to_kernel_params(params):
    """bf16-cast all matmul weights (biases / LN params stay f32)."""
    kp = dict(params)
    kp["wqkv_t"] = params["wqkv_t"].astype(jnp.bfloat16)
    kp["wproj_t"] = params["wproj_t"].astype(jnp.bfloat16)
    kp["w1_t"] = params["w1_t"].astype(jnp.bfloat16)
    kp["w2_t"] = params["w2_t"].astype(jnp.bfloat16)
    return kp


if __name__ == "__main__":
    # NOTE: perf tuning should be done at production ViT shapes
    # (N>=196, C>=768, H>=12); these shapes are for a fast correctness check.
    B, N, C = 2, 8, 32
    num_heads = 4

    key = jax.random.PRNGKey(0)
    kx, kp = jax.random.split(key)
    x = jax.random.normal(kx, (B, N, C), jnp.float32)
    params = make_params(kp, C, num_heads)
    kparams = to_kernel_params(params)

    out = vit_block(x, kparams, num_heads)
    out = jax.block_until_ready(out)

    ref = ref_block(x, params, num_heads)
    assert out.shape == (B, N, C)
    max_err = float(jnp.max(jnp.abs(out - ref)))
    assert jnp.allclose(out, ref, atol=2e-2, rtol=2e-2), \
        f"mismatch vs reference (max abs err {max_err})"

    print("KERNEL_OK")
</pallas_src>

<mosaic_0001>
module attributes {stable_mosaic.version = 11 : i64} {
  func.func @block_kernel(%arg0: i32, %arg1: memref<2x8x32xf32, #tpu.memory_space<vmem>>, %arg2: memref<1x32xf32, #tpu.memory_space<vmem>>, %arg3: memref<1x32xf32, #tpu.memory_space<vmem>>, %arg4: memref<32x96xbf16, #tpu.memory_space<vmem>>, %arg5: memref<32x32xbf16, #tpu.memory_space<vmem>>, %arg6: memref<1x32xf32, #tpu.memory_space<vmem>>, %arg7: memref<1x32xf32, #tpu.memory_space<vmem>>, %arg8: memref<1x32xf32, #tpu.memory_space<vmem>>, %arg9: memref<32x128xbf16, #tpu.memory_space<vmem>>, %arg10: memref<1x128xf32, #tpu.memory_space<vmem>>, %arg11: memref<128x32xbf16, #tpu.memory_space<vmem>>, %arg12: memref<1x32xf32, #tpu.memory_space<vmem>>, %arg13: memref<2x8x32xf32, #tpu.memory_space<vmem>>) attributes {dimension_semantics = [#tpu.dimension_semantics<parallel>], iteration_bounds = array<i64: 1>, scalar_prefetch = 0 : i64, scratch_operands = 0 : i64, tpu.core_type = #tpu.core_type<tc>, window_params = [{transform_indices = @transform_0, window_bounds = array<i64: 2, 8, 32>}, {pipeline_mode = #tpu.pipeline_mode<synchronous>, transform_indices = @transform_1, window_bounds = array<i64: 1, 32>}, {pipeline_mode = #tpu.pipeline_mode<synchronous>, transform_indices = @transform_2, window_bounds = array<i64: 1, 32>}, {pipeline_mode = #tpu.pipeline_mode<synchronous>, transform_indices = @transform_3, window_bounds = array<i64: 32, 96>}, {pipeline_mode = #tpu.pipeline_mode<synchronous>, transform_indices = @transform_4, window_bounds = array<i64: 32, 32>}, {pipeline_mode = #tpu.pipeline_mode<synchronous>, transform_indices = @transform_5, window_bounds = array<i64: 1, 32>}, {pipeline_mode = #tpu.pipeline_mode<synchronous>, transform_indices = @transform_6, window_bounds = array<i64: 1, 32>}, {pipeline_mode = #tpu.pipeline_mode<synchronous>, transform_indices = @transform_7, window_bounds = array<i64: 1, 32>}, {pipeline_mode = #tpu.pipeline_mode<synchronous>, transform_indices = @transform_8, window_bounds = array<i64: 32, 128>}, {pipeline_mode = #tpu.pipeline_mode<synchronous>, transform_indices = @transform_9, window_bounds = array<i64: 1, 128>}, {pipeline_mode = #tpu.pipeline_mode<synchronous>, transform_indices = @transform_10, window_bounds = array<i64: 128, 32>}, {pipeline_mode = #tpu.pipeline_mode<synchronous>, transform_indices = @transform_11, window_bounds = array<i64: 1, 32>}, {transform_indices = @transform_12, window_bounds = array<i64: 2, 8, 32>}]} {
    %c0 = arith.constant 0 : index
    %c0_0 = arith.constant 0 : index
    %c0_1 = arith.constant 0 : index
    %0 = vector.load %arg1[%c0, %c0_0, %c0_1] : memref<2x8x32xf32, #tpu.memory_space<vmem>>, vector<2x8x32xf32>
    %1 = vector.shape_cast %0 : vector<2x8x32xf32> to vector<16x32xf32>
    %c0_2 = arith.constant 0 : index
    %c0_3 = arith.constant 0 : index
    %2 = vector.load %arg2[%c0_2, %c0_3] : memref<1x32xf32, #tpu.memory_space<vmem>>, vector<1x32xf32>
    %3 = vector.shape_cast %2 : vector<1x32xf32> to vector<32xf32>
    %c0_4 = arith.constant 0 : index
    %c0_5 = arith.constant 0 : index
    %4 = vector.load %arg3[%c0_4, %c0_5] : memref<1x32xf32, #tpu.memory_space<vmem>>, vector<1x32xf32>
    %5 = vector.shape_cast %4 : vector<1x32xf32> to vector<32xf32>
    %cst = arith.constant dense<0.000000e+00> : vector<16xf32>
    %6 = vector.multi_reduction <add>, %1, %cst [1] : vector<16x32xf32> to vector<16xf32>
    %7 = vector.shape_cast %6 : vector<16xf32> to vector<16x1xf32>
    %cst_6 = arith.constant 3.200000e+01 : f32
    %8 = vector.broadcast %cst_6 : f32 to vector<16x1xf32>
    %9 = arith.divf %7, %8 : vector<16x1xf32>
    %10 = vector.broadcast %9 : vector<16x1xf32> to vector<16x32xf32>
    %11 = arith.subf %1, %10 : vector<16x32xf32>
    %12 = arith.mulf %11, %11 : vector<16x32xf32>
    %cst_7 = arith.constant dense<0.000000e+00> : vector<16xf32>
    %13 = vector.multi_reduction <add>, %12, %cst_7 [1] : vector<16x32xf32> to vector<16xf32>
    %14 = vector.shape_cast %13 : vector<16xf32> to vector<16x1xf32>
    %cst_8 = arith.constant 3.200000e+01 : f32
    %15 = vector.broadcast %cst_8 : f32 to vector<16x1xf32>
    %16 = arith.divf %14, %15 : vector<16x1xf32>
    %17 = vector.broadcast %9 : vector<16x1xf32> to vector<16x32xf32>
    %18 = arith.subf %1, %17 : vector<16x32xf32>
    %cst_9 = arith.constant 9.99999974E-6 : f32
    %19 = vector.broadcast %cst_9 : f32 to vector<16x1xf32>
    %20 = arith.addf %16, %19 : vector<16x1xf32>
    %21 = math.rsqrt %20 : vector<16x1xf32>
    %22 = vector.broadcast %21 : vector<16x1xf32> to vector<16x32xf32>
    %23 = arith.mulf %18, %22 : vector<16x32xf32>
    %24 = vector.shape_cast %3 : vector<32xf32> to vector<1x32xf32>
    %25 = vector.broadcast %24 : vector<1x32xf32> to vector<16x32xf32>
    %26 = arith.mulf %23, %25 : vector<16x32xf32>
    %27 = vector.shape_cast %5 : vector<32xf32> to vector<1x32xf32>
    %28 = vector.broadcast %27 : vector<1x32xf32> to vector<16x32xf32>
    %29 = arith.addf %26, %28 : vector<16x32xf32>
    %30 = arith.truncf %29 : vector<16x32xf32> to vector<16x32xbf16>
    %c0_10 = arith.constant 0 : index
    %c0_11 = arith.constant 0 : index
    %31 = vector.load %arg4[%c0_10, %c0_11] : memref<32x96xbf16, #tpu.memory_space<vmem>>, vector<32x96xbf16>
    %cst_12 = arith.constant dense<0.000000e+00> : vector<16x96xf32>
    %32 = tpu.matmul %30, %31, %cst_12 {dimension_numbers = #tpu.dot_dimension_numbers<[1], [0], [0], [1], [0, 0, 1, 1], [], []>} : vector<16x32xbf16>, vector<32x96xbf16>, vector<16x96xf32> -> vector<16x96xf32>
    %33 = vector.extract_strided_slice %32 {offsets = [0, 0], sizes = [8, 96], strides = [1, 1]} : vector<16x96xf32> to vector<8x96xf32>
    %34 = vector.extract_strided_slice %33 {offsets = [0, 0], sizes = [8, 8], strides = [1, 1]} : vector<8x96xf32> to vector<8x8xf32>
    %cst_13 = arith.constant 0.353553385 : f32
    %35 = vector.broadcast %cst_13 : f32 to vector<8x8xf32>
    %36 = arith.mulf %34, %35 : vector<8x8xf32>
    %37 = arith.truncf %36 : vector<8x8xf32> to vector<8x8xbf16>
    %38 = vector.extract_strided_slice %33 {offsets = [0, 8], sizes = [8, 8], strides = [1, 1]} : vector<8x96xf32> to vector<8x8xf32>
    %cst_14 = arith.constant 0.353553385 : f32
    %39 = vector.broadcast %cst_14 : f32 to vector<8x8xf32>
    %40 = arith.mulf %38, %39 : vector<8x8xf32>
    %41 = arith.truncf %40 : vector<8x8xf32> to vector<8x8xbf16>
    %42 = vector.extract_strided_slice %33 {offsets = [0, 16], sizes = [8, 8], strides = [1, 1]} : vector<8x96xf32> to vector<8x8xf32>
    %cst_15 = arith.constant 0.353553385 : f32
    %43 = vector.broadcast %cst_15 : f32 to vector<8x8xf32>
    %44 = arith.mulf %42, %43 : vector<8x8xf32>
    %45 = arith.truncf %44 : vector<8x8xf32> to vector<8x8xbf16>
    %46 = vector.extract_strided_slice %33 {offsets = [0, 24], sizes = [8, 8], strides = [1, 1]} : vector<8x96xf32> to vector<8x8xf32>
    %cst_16 = arith.constant 0.353553385 : f32
    %47 = vector.broadcast %cst_16 : f32 to vector<8x8xf32>
    %48 = arith.mulf %46, %47 : vector<8x8xf32>
    %49 = arith.truncf %48 : vector<8x8xf32> to vector<8x8xbf16>
    %50 = vector.extract_strided_slice %32 {offsets = [8, 0], sizes = [8, 96], strides = [1, 1]} : vector<16x96xf32> to vector<8x96xf32>
    %51 = vector.extract_strided_slice %50 {offsets = [0, 0], sizes = [8, 8], strides = [1, 1]} : vector<8x96xf32> to vector<8x8xf32>
    %cst_17 = arith.constant 0.353553385 : f32
    %52 = vector.broadcast %cst_17 : f32 to vector<8x8xf32>
    %53 = arith.mulf %51, %52 : vector<8x8xf32>
    %54 = arith.truncf %53 : vector<8x8xf32> to vector<8x8xbf16>
    %55 = vector.extract_strided_slice %50 {offsets = [0, 8], sizes = [8, 8], strides = [1, 1]} : vector<8x96xf32> to vector<8x8xf32>
    %cst_18 = arith.constant 0.353553385 : f32
    %56 = vector.broadcast %cst_18 : f32 to vector<8x8xf32>
    %57 = arith.mulf %55, %56 : vector<8x8xf32>
    %58 = arith.truncf %57 : vector<8x8xf32> to vector<8x8xbf16>
    %59 = vector.extract_strided_slice %50 {offsets = [0, 16], sizes = [8, 8], strides = [1, 1]} : vector<8x96xf32> to vector<8x8xf32>
    %cst_19 = arith.constant 0.353553385 : f32
    %60 = vector.broadcast %cst_19 : f32 to vector<8x8xf32>
    %61 = arith.mulf %59, %60 : vector<8x8xf32>
    %62 = arith.truncf %61 : vector<8x8xf32> to vector<8x8xbf16>
    %63 = vector.extract_strided_slice %50 {offsets = [0, 24], sizes = [8, 8], strides = [1, 1]} : vector<8x96xf32> to vector<8x8xf32>
    %cst_20 = arith.constant 0.353553385 : f32
    %64 = vector.broadcast %cst_20 : f32 to vector<8x8xf32>
    %65 = arith.mulf %63, %64 : vector<8x8xf32>
    %66 = arith.truncf %65 : vector<8x8xf32> to vector<8x8xbf16>
    %67 = vector.shape_cast %37 : vector<8x8xbf16> to vector<1x8x8xbf16>
    %68 = vector.shape_cast %41 : vector<8x8xbf16> to vector<1x8x8xbf16>
    %69 = vector.shape_cast %45 : vector<8x8xbf16> to vector<1x8x8xbf16>
    %70 = vector.shape_cast %49 : vector<8x8xbf16> to vector<1x8x8xbf16>
    %71 = vector.shape_cast %54 : vector<8x8xbf16> to vector<1x8x8xbf16>
    %72 = vector.shape_cast %58 : vector<8x8xbf16> to vector<1x8x8xbf16>
    %73 = vector.shape_cast %62 : vector<8x8xbf16> to vector<1x8x8xbf16>
    %74 = vector.shape_cast %66 : vector<8x8xbf16> to vector<1x8x8xbf16>
    %75 = tpu.concatenate %67, %68, %69, %70, %71, %72, %73, %74 in 0 : vector<1x8x8xbf16>, vector<1x8x8xbf16>, vector<1x8x8xbf16>, vector<1x8x8xbf16>, vector<1x8x8xbf16>, vector<1x8x8xbf16>, vector<1x8x8xbf16>, vector<1x8x8xbf16> -> vector<8x8x8xbf16>
    %76 = vector.extract_strided_slice %32 {offsets = [0, 0], sizes = [8, 96], strides = [1, 1]} : vector<16x96xf32> to vector<8x96xf32>
    %77 = vector.extract_strided_slice %76 {offsets = [0, 32], sizes = [8, 8], strides = [1, 1]} : vector<8x96xf32> to vector<8x8xf32>
    %78 = arith.truncf %77 : vector<8x8xf32> to vector<8x8xbf16>
    %79 = vector.extract_strided_slice %76 {offsets = [0, 40], sizes = [8, 8], strides = [1, 1]} : vector<8x96xf32> to vector<8x8xf32>
    %80 = arith.truncf %79 : vector<8x8xf32> to vector<8x8xbf16>
    %81 = vector.extract_strided_slice %76 {offsets = [0, 48], sizes = [8, 8], strides = [1, 1]} : vector<8x96xf32> to vector<8x8xf32>
    %82 = arith.truncf %81 : vector<8x8xf32> to vector<8x8xbf16>
    %83 = vector.extract_strided_slice %76 {offsets = [0, 56], sizes = [8, 8], strides = [1, 1]} : vector<8x96xf32> to vector<8x8xf32>
    %84 = arith.truncf %83 : vector<8x8xf32> to vector<8x8xbf16>
    %85 = vector.extract_strided_slice %32 {offsets = [8, 0], sizes = [8, 96], strides = [1, 1]} : vector<16x96xf32> to vector<8x96xf32>
    %86 = vector.extract_strided_slice %85 {offsets = [0, 32], sizes = [8, 8], strides = [1, 1]} : vector<8x96xf32> to vector<8x8xf32>
    %87 = arith.truncf %86 : vector<8x8xf32> to vector<8x8xbf16>
    %88 = vector.extract_strided_slice %85 {offsets = [0, 40], sizes = [8, 8], strides = [1, 1]} : vector<8x96xf32> to vector<8x8xf32>
    %89 = arith.truncf %88 : vector<8x8xf32> to vector<8x8xbf16>
    %90 = vector.extract_strided_slice %85 {offsets = [0, 48], sizes = [8, 8], strides = [1, 1]} : vector<8x96xf32> to vector<8x8xf32>
    %91 = arith.truncf %90 : vector<8x8xf32> to vector<8x8xbf16>
    %92 = vector.extract_strided_slice %85 {offsets = [0, 56], sizes = [8, 8], strides = [1, 1]} : vector<8x96xf32> to vector<8x8xf32>
    %93 = arith.truncf %92 : vector<8x8xf32> to vector<8x8xbf16>
    %94 = vector.shape_cast %78 : vector<8x8xbf16> to vector<1x8x8xbf16>
    %95 = vector.shape_cast %80 : vector<8x8xbf16> to vector<1x8x8xbf16>
    %96 = vector.shape_cast %82 : vector<8x8xbf16> to vector<1x8x8xbf16>
    %97 = vector.shape_cast %84 : vector<8x8xbf16> to vector<1x8x8xbf16>
    %98 = vector.shape_cast %87 : vector<8x8xbf16> to vector<1x8x8xbf16>
    %99 = vector.shape_cast %89 : vector<8x8xbf16> to vector<1x8x8xbf16>
    %100 = vector.shape_cast %91 : vector<8x8xbf16> to vector<1x8x8xbf16>
    %101 = vector.shape_cast %93 : vector<8x8xbf16> to vector<1x8x8xbf16>
    %102 = tpu.concatenate %94, %95, %96, %97, %98, %99, %100, %101 in 0 : vector<1x8x8xbf16>, vector<1x8x8xbf16>, vector<1x8x8xbf16>, vector<1x8x8xbf16>, vector<1x8x8xbf16>, vector<1x8x8xbf16>, vector<1x8x8xbf16>, vector<1x8x8xbf16> -> vector<8x8x8xbf16>
    %103 = vector.extract_strided_slice %32 {offsets = [0, 0], sizes = [8, 96], strides = [1, 1]} : vector<16x96xf32> to vector<8x96xf32>
    %104 = vector.extract_strided_slice %103 {offsets = [0, 64], sizes = [8, 8], strides = [1, 1]} : vector<8x96xf32> to vector<8x8xf32>
    %105 = arith.truncf %104 : vector<8x8xf32> to vector<8x8xbf16>
    %106 = vector.extract_strided_slice %103 {offsets = [0, 72], sizes = [8, 8], strides = [1, 1]} : vector<8x96xf32> to vector<8x8xf32>
    %107 = arith.truncf %106 : vector<8x8xf32> to vector<8x8xbf16>
    %108 = vector.extract_strided_slice %103 {offsets = [0, 80], sizes = [8, 8], strides = [1, 1]} : vector<8x96xf32> to vector<8x8xf32>
    %109 = arith.truncf %108 : vector<8x8xf32> to vector<8x8xbf16>
    %110 = vector.extract_strided_slice %103 {offsets = [0, 88], sizes = [8, 8], strides = [1, 1]} : vector<8x96xf32> to vector<8x8xf32>
    %111 = arith.truncf %110 : vector<8x8xf32> to vector<8x8xbf16>
    %112 = vector.extract_strided_slice %32 {offsets = [8, 0], sizes = [8, 96], strides = [1, 1]} : vector<16x96xf32> to vector<8x96xf32>
    %113 = vector.extract_strided_slice %112 {offsets = [0, 64], sizes = [8, 8], strides = [1, 1]} : vector<8x96xf32> to vector<8x8xf32>
    %114 = arith.truncf %113 : vector<8x8xf32> to vector<8x8xbf16>
    %115 = vector.extract_strided_slice %112 {offsets = [0, 72], sizes = [8, 8], strides = [1, 1]} : vector<8x96xf32> to vector<8x8xf32>
    %116 = arith.truncf %115 : vector<8x8xf32> to vector<8x8xbf16>
    %117 = vector.extract_strided_slice %112 {offsets = [0, 80], sizes = [8, 8], strides = [1, 1]} : vector<8x96xf32> to vector<8x8xf32>
    %118 = arith.truncf %117 : vector<8x8xf32> to vector<8x8xbf16>
    %119 = vector.extract_strided_slice %112 {offsets = [0, 88], sizes = [8, 8], strides = [1, 1]} : vector<8x96xf32> to vector<8x8xf32>
    %120 = arith.truncf %119 : vector<8x8xf32> to vector<8x8xbf16>
    %121 = vector.shape_cast %105 : vector<8x8xbf16> to vector<1x8x8xbf16>
    %122 = vector.shape_cast %107 : vector<8x8xbf16> to vector<1x8x8xbf16>
    %123 = vector.shape_cast %109 : vector<8x8xbf16> to vector<1x8x8xbf16>
    %124 = vector.shape_cast %111 : vector<8x8xbf16> to vector<1x8x8xbf16>
    %125 = vector.shape_cast %114 : vector<8x8xbf16> to vector<1x8x8xbf16>
    %126 = vector.shape_cast %116 : vector<8x8xbf16> to vector<1x8x8xbf16>
    %127 = vector.shape_cast %118 : vector<8x8xbf16> to vector<1x8x8xbf16>
    %128 = vector.shape_cast %120 : vector<8x8xbf16> to vector<1x8x8xbf16>
    %129 = tpu.concatenate %121, %122, %123, %124, %125, %126, %127, %128 in 0 : vector<1x8x8xbf16>, vector<1x8x8xbf16>, vector<1x8x8xbf16>, vector<1x8x8xbf16>, vector<1x8x8xbf16>, vector<1x8x8xbf16>, vector<1x8x8xbf16>, vector<1x8x8xbf16> -> vector<8x8x8xbf16>
    "tpu.trace_start"() <{level = 10 : i32, message = "gqd,gkd->gqk"}> : () -> ()
    %cst_21 = arith.constant dense<0.000000e+00> : vector<8x8x8xf32>
    %130 = tpu.matmul %75, %102, %cst_21 {dimension_numbers = #tpu.dot_dimension_numbers<[2], [2], [1], [1], [0, 0, 0, 1, 1, 1], [0], [0]>} : vector<8x8x8xbf16>, vector<8x8x8xbf16>, vector<8x8x8xf32> -> vector<8x8x8xf32>
    "tpu.trace_stop"() : () -> ()
    %cst_22 = arith.constant dense<0xFF800000> : vector<8x8xf32>
    %131 = vector.multi_reduction <maximumf>, %130, %cst_22 [2] : vector<8x8x8xf32> to vector<8x8xf32>
    %132 = vector.shape_cast %131 : vector<8x8xf32> to vector<8x8x1xf32>
    %133 = vector.broadcast %132 : vector<8x8x1xf32> to vector<8x8x8xf32>
    %134 = arith.subf %130, %133 : vector<8x8x8xf32>
    %135 = math.exp %134 : vector<8x8x8xf32>
    %cst_23 = arith.constant dense<0.000000e+00> : vector<8x8xf32>
    %136 = vector.multi_reduction <add>, %135, %cst_23 [2] : vector<8x8x8xf32> to vector<8x8xf32>
    %137 = vector.shape_cast %136 : vector<8x8xf32> to vector<8x8x1xf32>
    %138 = tpu.reciprocal %137 {approx = true} : vector<8x8x1xf32> -> vector<8x8x1xf32>
    %139 = vector.broadcast %138 : vector<8x8x1xf32> to vector<8x8x8xf32>
    %140 = arith.mulf %135, %139 : vector<8x8x8xf32>
    %141 = arith.truncf %140 : vector<8x8x8xf32> to vector<8x8x8xbf16>
    "tpu.trace_start"() <{level = 10 : i32, message = "gqk,gkd->gqd"}> : () -> ()
    %cst_24 = arith.constant dense<0.000000e+00> : vector<8x8x8xf32>
    %142 = tpu.matmul %141, %129, %cst_24 {dimension_numbers = #tpu.dot_dimension_numbers<[2], [1], [1], [2], [0, 0, 0, 1, 1, 2], [0], [0]>} : vector<8x8x8xbf16>, vector<8x8x8xbf16>, vector<8x8x8xf32> -> vector<8x8x8xf32>
    "tpu.trace_stop"() : () -> ()
    %143 = arith.truncf %142 : vector<8x8x8xf32> to vector<8x8x8xbf16>
    %144 = vector.extract_strided_slice %143 {offsets = [0, 0, 0], sizes = [1, 8, 8], strides = [1, 1, 1]} : vector<8x8x8xbf16> to vector<1x8x8xbf16>
    %145 = vector.shape_cast %144 : vector<1x8x8xbf16> to vector<8x8xbf16>
    %146 = vector.extract_strided_slice %143 {offsets = [1, 0, 0], sizes = [1, 8, 8], strides = [1, 1, 1]} : vector<8x8x8xbf16> to vector<1x8x8xbf16>
    %147 = vector.shape_cast %146 : vector<1x8x8xbf16> to vector<8x8xbf16>
    %148 = vector.extract_strided_slice %143 {offsets = [2, 0, 0], sizes = [1, 8, 8], strides = [1, 1, 1]} : vector<8x8x8xbf16> to vector<1x8x8xbf16>
    %149 = vector.shape_cast %148 : vector<1x8x8xbf16> to vector<8x8xbf16>
    %150 = vector.extract_strided_slice %143 {offsets = [3, 0, 0], sizes = [1, 8, 8], strides = [1, 1, 1]} : vector<8x8x8xbf16> to vector<1x8x8xbf16>
    %151 = vector.shape_cast %150 : vector<1x8x8xbf16> to vector<8x8xbf16>
    %152 = tpu.concatenate %145, %147, %149, %151 in 1 : vector<8x8xbf16>, vector<8x8xbf16>, vector<8x8xbf16>, vector<8x8xbf16> -> vector<8x32xbf16>
    %153 = vector.extract_strided_slice %143 {offsets = [4, 0, 0], sizes = [1, 8, 8], strides = [1, 1, 1]} : vector<8x8x8xbf16> to vector<1x8x8xbf16>
    %154 = vector.shape_cast %153 : vector<1x8x8xbf16> to vector<8x8xbf16>
    %155 = vector.extract_strided_slice %143 {offsets = [5, 0, 0], sizes = [1, 8, 8], strides = [1, 1, 1]} : vector<8x8x8xbf16> to vector<1x8x8xbf16>
    %156 = vector.shape_cast %155 : vector<1x8x8xbf16> to vector<8x8xbf16>
    %157 = vector.extract_strided_slice %143 {offsets = [6, 0, 0], sizes = [1, 8, 8], strides = [1, 1, 1]} : vector<8x8x8xbf16> to vector<1x8x8xbf16>
    %158 = vector.shape_cast %157 : vector<1x8x8xbf16> to vector<8x8xbf16>
    %159 = vector.extract_strided_slice %143 {offsets = [7, 0, 0], sizes = [1, 8, 8], strides = [1, 1, 1]} : vector<8x8x8xbf16> to vector<1x8x8xbf16>
    %160 = vector.shape_cast %159 : vector<1x8x8xbf16> to vector<8x8xbf16>
    %161 = tpu.concatenate %154, %156, %158, %160 in 1 : vector<8x8xbf16>, vector<8x8xbf16>, vector<8x8xbf16>, vector<8x8xbf16> -> vector<8x32xbf16>
    %162 = tpu.concatenate %152, %161 in 0 : vector<8x32xbf16>, vector<8x32xbf16> -> vector<16x32xbf16>
    %c0_25 = arith.constant 0 : index
    %c0_26 = arith.constant 0 : index
    %163 = vector.load %arg5[%c0_25, %c0_26] : memref<32x32xbf16, #tpu.memory_space<vmem>>, vector<32x32xbf16>
    %cst_27 = arith.constant dense<0.000000e+00> : vector<16x32xf32>
    %164 = tpu.matmul %162, %163, %cst_27 {dimension_numbers = #tpu.dot_dimension_numbers<[1], [0], [0], [1], [0, 0, 1, 1], [], []>} : vector<16x32xbf16>, vector<32x32xbf16>, vector<16x32xf32> -> vector<16x32xf32>
    %c0_28 = arith.constant 0 : index
    %c0_29 = arith.constant 0 : index
    %165 = vector.load %arg6[%c0_28, %c0_29] : memref<1x32xf32, #tpu.memory_space<vmem>>, vector<1x32xf32>
    %166 = vector.shape_cast %165 : vector<1x32xf32> to vector<32xf32>
    %167 = vector.shape_cast %166 : vector<32xf32> to vector<1x32xf32>
    %168 = vector.broadcast %167 : vector<1x32xf32> to vector<16x32xf32>
    %169 = arith.addf %164, %168 : vector<16x32xf32>
    %170 = arith.addf %1, %169 : vector<16x32xf32>
    %c0_30 = arith.constant 0 : index
    %c0_31 = arith.constant 0 : index
    %171 = vector.load %arg7[%c0_30, %c0_31] : memref<1x32xf32, #tpu.memory_space<vmem>>, vector<1x32xf32>
    %172 = vector.shape_cast %171 : vector<1x32xf32> to vector<32xf32>
    %c0_32 = arith.constant 0 : index
    %c0_33 = arith.constant 0 : index
    %173 = vector.load %arg8[%c0_32, %c0_33] : memref<1x32xf32, #tpu.memory_space<vmem>>, vector<1x32xf32>
    %174 = vector.shape_cast %173 : vector<1x32xf32> to vector<32xf32>
    %cst_34 = arith.constant dense<0.000000e+00> : vector<16xf32>
    %175 = vector.multi_reduction <add>, %170, %cst_34 [1] : vector<16x32xf32> to vector<16xf32>
    %176 = vector.shape_cast %175 : vector<16xf32> to vector<16x1xf32>
    %cst_35 = arith.constant 3.200000e+01 : f32
    %177 = vector.broadcast %cst_35 : f32 to vector<16x1xf32>
    %178 = arith.divf %176, %177 : vector<16x1xf32>
    %179 = vector.broadcast %178 : vector<16x1xf32> to vector<16x32xf32>
    %180 = arith.subf %170, %179 : vector<16x32xf32>
    %181 = arith.mulf %180, %180 : vector<16x32xf32>
    %cst_36 = arith.constant dense<0.000000e+00> : vector<16xf32>
    %182 = vector.multi_reduction <add>, %181, %cst_36 [1] : vector<16x32xf32> to vector<16xf32>
    %183 = vector.shape_cast %182 : vector<16xf32> to vector<16x1xf32>
    %cst_37 = arith.constant 3.200000e+01 : f32
    %184 = vector.broadcast %cst_37 : f32 to vector<16x1xf32>
    %185 = arith.divf %183, %184 : vector<16x1xf32>
    %186 = vector.broadcast %178 : vector<16x1xf32> to vector<16x32xf32>
    %187 = arith.subf %170, %186 : vector<16x32xf32>
    %cst_38 = arith.constant 9.99999974E-6 : f32
    %188 = vector.broadcast %cst_38 : f32 to vector<16x1xf32>
    %189 = arith.addf %185, %188 : vector<16x1xf32>
    %190 = math.rsqrt %189 : vector<16x1xf32>
    %191 = vector.broadcast %190 : vector<16x1xf32> to vector<16x32xf32>
    %192 = arith.mulf %187, %191 : vector<16x32xf32>
    %193 = vector.shape_cast %172 : vector<32xf32> to vector<1x32xf32>
    %194 = vector.broadcast %193 : vector<1x32xf32> to vector<16x32xf32>
    %195 = arith.mulf %192, %194 : vector<16x32xf32>
    %196 = vector.shape_cast %174 : vector<32xf32> to vector<1x32xf32>
    %197 = vector.broadcast %196 : vector<1x32xf32> to vector<16x32xf32>
    %198 = arith.addf %195, %197 : vector<16x32xf32>
    %199 = arith.truncf %198 : vector<16x32xf32> to vector<16x32xbf16>
    %c0_39 = arith.constant 0 : index
    %c0_40 = arith.constant 0 : index
    %200 = vector.load %arg9[%c0_39, %c0_40] : memref<32x128xbf16, #tpu.memory_space<vmem>>, vector<32x128xbf16>
    %cst_41 = arith.constant dense<0.000000e+00> : vector<16x128xf32>
    %201 = tpu.matmul %199, %200, %cst_41 {dimension_numbers = #tpu.dot_dimension_numbers<[1], [0], [0], [1], [0, 0, 1, 1], [], []>} : vector<16x32xbf16>, vector<32x128xbf16>, vector<16x128xf32> -> vector<16x128xf32>
    %c0_42 = arith.constant 0 : index
    %c0_43 = arith.constant 0 : index
    %202 = vector.load %arg10[%c0_42, %c0_43] : memref<1x128xf32, #tpu.memory_space<vmem>>, vector<1x128xf32>
    %203 = vector.shape_cast %202 : vector<1x128xf32> to vector<128xf32>
    %204 = vector.shape_cast %203 : vector<128xf32> to vector<1x128xf32>
    %205 = vector.broadcast %204 : vector<1x128xf32> to vector<16x128xf32>
    %206 = arith.addf %201, %205 : vector<16x128xf32>
    %cst_44 = arith.constant 5.000000e-01 : f32
    %207 = vector.broadcast %cst_44 : f32 to vector<16x128xf32>
    %208 = arith.mulf %207, %206 : vector<16x128xf32>
    %cst_45 = arith.constant 0.707106769 : f32
    %209 = vector.broadcast %cst_45 : f32 to vector<16x128xf32>
    %210 = arith.mulf %206, %209 : vector<16x128xf32>
    %211 = math.erf %210 : vector<16x128xf32>
    %cst_46 = arith.constant 1.000000e+00 : f32
    %212 = vector.broadcast %cst_46 : f32 to vector<16x128xf32>
    %213 = arith.addf %212, %211 : vector<16x128xf32>
    %214 = arith.mulf %208, %213 : vector<16x128xf32>
    %215 = arith.truncf %214 : vector<16x128xf32> to vector<16x128xbf16>
    %c0_47 = arith.constant 0 : index
    %c0_48 = arith.constant 0 : index
    %216 = vector.load %arg11[%c0_47, %c0_48] : memref<128x32xbf16, #tpu.memory_space<vmem>>, vector<128x32xbf16>
    %cst_49 = arith.constant dense<0.000000e+00> : vector<16x32xf32>
    %217 = tpu.matmul %215, %216, %cst_49 {dimension_numbers = #tpu.dot_dimension_numbers<[1], [0], [0], [1], [0, 0, 1, 1], [], []>} : vector<16x128xbf16>, vector<128x32xbf16>, vector<16x32xf32> -> vector<16x32xf32>
    %c0_50 = arith.constant 0 : index
    %c0_51 = arith.constant 0 : index
    %218 = vector.load %arg12[%c0_50, %c0_51] : memref<1x32xf32, #tpu.memory_space<vmem>>, vector<1x32xf32>
    %219 = vector.shape_cast %218 : vector<1x32xf32> to vector<32xf32>
    %220 = vector.shape_cast %219 : vector<32xf32> to vector<1x32xf32>
    %221 = vector.broadcast %220 : vector<1x32xf32> to vector<16x32xf32>
    %222 = arith.addf %217, %221 : vector<16x32xf32>
    %223 = arith.addf %170, %222 : vector<16x32xf32>
    %224 = vector.shape_cast %223 : vector<16x32xf32> to vector<2x8x32xf32>
    %c0_52 = arith.constant 0 : index
    %c0_53 = arith.constant 0 : index
    %c0_54 = arith.constant 0 : index
    %225 = vector.load %arg13[%c0_52, %c0_53, %c0_54] : memref<2x8x32xf32, #tpu.memory_space<vmem>>, vector<2x8x32xf32>
    tpu.vector_store %arg13[%c0_52, %c0_53, %c0_54], %224 {strides = array<i32>} : memref<2x8x32xf32, #tpu.memory_space<vmem>>, vector<2x8x32xf32>,
    return
  }
  func.func @transform_0(%arg0: i32) -> (i32, i32, i32) {
    %c0_i32 = arith.constant 0 : i32
    %c0_i32_0 = arith.constant 0 : i32
    %c0_i32_1 = arith.constant 0 : i32
    return %arg0, %c0_i32, %c0_i32_0 : i32, i32, i32
  }
  func.func @transform_1(%arg0: i32) -> (i32, i32) {
    %c0_i32 = arith.constant 0 : i32
    %c0_i32_0 = arith.constant 0 : i32
    %c0_i32_1 = arith.constant 0 : i32
    return %c0_i32, %c0_i32_0 : i32, i32
  }
  func.func @transform_2(%arg0: i32) -> (i32, i32) {
    %c0_i32 = arith.constant 0 : i32
    %c0_i32_0 = arith.constant 0 : i32
    %c0_i32_1 = arith.constant 0 : i32
    return %c0_i32, %c0_i32_0 : i32, i32
  }
  func.func @transform_3(%arg0: i32) -> (i32, i32) {
    %c0_i32 = arith.constant 0 : i32
    %c0_i32_0 = arith.constant 0 : i32
    %c0_i32_1 = arith.constant 0 : i32
    return %c0_i32, %c0_i32_0 : i32, i32
  }
  func.func @transform_4(%arg0: i32) -> (i32, i32) {
    %c0_i32 = arith.constant 0 : i32
    %c0_i32_0 = arith.constant 0 : i32
    %c0_i32_1 = arith.constant 0 : i32
    return %c0_i32, %c0_i32_0 : i32, i32
  }
  func.func @transform_5(%arg0: i32) -> (i32, i32) {
    %c0_i32 = arith.constant 0 : i32
    %c0_i32_0 = arith.constant 0 : i32
    %c0_i32_1 = arith.constant 0 : i32
    return %c0_i32, %c0_i32_0 : i32, i32
  }
  func.func @transform_6(%arg0: i32) -> (i32, i32) {
    %c0_i32 = arith.constant 0 : i32
    %c0_i32_0 = arith.constant 0 : i32
    %c0_i32_1 = arith.constant 0 : i32
    return %c0_i32, %c0_i32_0 : i32, i32
  }
  func.func @transform_7(%arg0: i32) -> (i32, i32) {
    %c0_i32 = arith.constant 0 : i32
    %c0_i32_0 = arith.constant 0 : i32
    %c0_i32_1 = arith.constant 0 : i32
    return %c0_i32, %c0_i32_0 : i32, i32
  }
  func.func @transform_8(%arg0: i32) -> (i32, i32) {
    %c0_i32 = arith.constant 0 : i32
    %c0_i32_0 = arith.constant 0 : i32
    %c0_i32_1 = arith.constant 0 : i32
    return %c0_i32, %c0_i32_0 : i32, i32
  }
  func.func @transform_9(%arg0: i32) -> (i32, i32) {
    %c0_i32 = arith.constant 0 : i32
    %c0_i32_0 = arith.constant 0 : i32
    %c0_i32_1 = arith.constant 0 : i32
    return %c0_i32, %c0_i32_0 : i32, i32
  }
  func.func @transform_10(%arg0: i32) -> (i32, i32) {
    %c0_i32 = arith.constant 0 : i32
    %c0_i32_0 = arith.constant 0 : i32
    %c0_i32_1 = arith.constant 0 : i32
    return %c0_i32, %c0_i32_0 : i32, i32
  }
  func.func @transform_11(%arg0: i32) -> (i32, i32) {
    %c0_i32 = arith.constant 0 : i32
    %c0_i32_0 = arith.constant 0 : i32
    %c0_i32_1 = arith.constant 0 : i32
    return %c0_i32, %c0_i32_0 : i32, i32
  }
  func.func @transform_12(%arg0: i32) -> (i32, i32, i32) {
    %c0_i32 = arith.constant 0 : i32
    %c0_i32_0 = arith.constant 0 : i32
    %c0_i32_1 = arith.constant 0 : i32
    return %arg0, %c0_i32, %c0_i32_0 : i32, i32, i32
  }
}

module attributes {stable_mosaic.version = 11 : i64} {
  func.func @block_kernel(%arg0: i32, %arg1: memref<2x8x32xf32, #tpu.memory_space<vmem>>, %arg2: memref<1x32xf32, #tpu.memory_space<vmem>>, %arg3: memref<1x32xf32, #tpu.memory_space<vmem>>, %arg4: memref<32x96xbf16, #tpu.memory_space<vmem>>, %arg5: memref<32x32xbf16, #tpu.memory_space<vmem>>, %arg6: memref<1x32xf32, #tpu.memory_space<vmem>>, %arg7: memref<1x32xf32, #tpu.memory_space<vmem>>, %arg8: memref<1x32xf32, #tpu.memory_space<vmem>>, %arg9: memref<32x128xbf16, #tpu.memory_space<vmem>>, %arg10: memref<1x128xf32, #tpu.memory_space<vmem>>, %arg11: memref<128x32xbf16, #tpu.memory_space<vmem>>, %arg12: memref<1x32xf32, #tpu.memory_space<vmem>>, %arg13: memref<2x8x32xf32, #tpu.memory_space<vmem>>) attributes {dimension_semantics = [#tpu.dimension_semantics<parallel>], iteration_bounds = array<i64: 1>, scalar_prefetch = 0 : i64, scratch_operands = 0 : i64, tpu.core_type = #tpu.core_type<tc>, window_params = [{transform_indices = @transform_0, window_bounds = array<i64: 2, 8, 32>}, {pipeline_mode = #tpu.pipeline_mode<synchronous>, transform_indices = @transform_1, window_bounds = array<i64: 1, 32>}, {pipeline_mode = #tpu.pipeline_mode<synchronous>, transform_indices = @transform_2, window_bounds = array<i64: 1, 32>}, {pipeline_mode = #tpu.pipeline_mode<synchronous>, transform_indices = @transform_3, window_bounds = array<i64: 32, 96>}, {pipeline_mode = #tpu.pipeline_mode<synchronous>, transform_indices = @transform_4, window_bounds = array<i64: 32, 32>}, {pipeline_mode = #tpu.pipeline_mode<synchronous>, transform_indices = @transform_5, window_bounds = array<i64: 1, 32>}, {pipeline_mode = #tpu.pipeline_mode<synchronous>, transform_indices = @transform_6, window_bounds = array<i64: 1, 32>}, {pipeline_mode = #tpu.pipeline_mode<synchronous>, transform_indices = @transform_7, window_bounds = array<i64: 1, 32>}, {pipeline_mode = #tpu.pipeline_mode<synchronous>, transform_indices = @transform_8, window_bounds = array<i64: 32, 128>}, {pipeline_mode = #tpu.pipeline_mode<synchronous>, transform_indices = @transform_9, window_bounds = array<i64: 1, 128>}, {pipeline_mode = #tpu.pipeline_mode<synchronous>, transform_indices = @transform_10, window_bounds = array<i64: 128, 32>}, {pipeline_mode = #tpu.pipeline_mode<synchronous>, transform_indices = @transform_11, window_bounds = array<i64: 1, 32>}, {transform_indices = @transform_12, window_bounds = array<i64: 2, 8, 32>}]} {
    %c0 = arith.constant 0 : index
    %c0_0 = arith.constant 0 : index
    %c0_1 = arith.constant 0 : index
    %0 = vector.load %arg1[%c0, %c0_0, %c0_1] : memref<2x8x32xf32, #tpu.memory_space<vmem>>, vector<2x8x32xf32>
    %1 = vector.shape_cast %0 : vector<2x8x32xf32> to vector<16x32xf32>
    %c0_2 = arith.constant 0 : index
    %c0_3 = arith.constant 0 : index
    %2 = vector.load %arg2[%c0_2, %c0_3] : memref<1x32xf32, #tpu.memory_space<vmem>>, vector<1x32xf32>
    %3 = vector.shape_cast %2 : vector<1x32xf32> to vector<32xf32>
    %c0_4 = arith.constant 0 : index
    %c0_5 = arith.constant 0 : index
    %4 = vector.load %arg3[%c0_4, %c0_5] : memref<1x32xf32, #tpu.memory_space<vmem>>, vector<1x32xf32>
    %5 = vector.shape_cast %4 : vector<1x32xf32> to vector<32xf32>
    %cst = arith.constant dense<0.000000e+00> : vector<16xf32>
    %6 = vector.multi_reduction <add>, %1, %cst [1] : vector<16x32xf32> to vector<16xf32>
    %7 = vector.shape_cast %6 : vector<16xf32> to vector<16x1xf32>
    %cst_6 = arith.constant 3.200000e+01 : f32
    %8 = vector.broadcast %cst_6 : f32 to vector<16x1xf32>
    %9 = arith.divf %7, %8 : vector<16x1xf32>
    %10 = vector.broadcast %9 : vector<16x1xf32> to vector<16x32xf32>
    %11 = arith.subf %1, %10 : vector<16x32xf32>
    %12 = arith.mulf %11, %11 : vector<16x32xf32>
    %cst_7 = arith.constant dense<0.000000e+00> : vector<16xf32>
    %13 = vector.multi_reduction <add>, %12, %cst_7 [1] : vector<16x32xf32> to vector<16xf32>
    %14 = vector.shape_cast %13 : vector<16xf32> to vector<16x1xf32>
    %cst_8 = arith.constant 3.200000e+01 : f32
    %15 = vector.broadcast %cst_8 : f32 to vector<16x1xf32>
    %16 = arith.divf %14, %15 : vector<16x1xf32>
    %17 = vector.broadcast %9 : vector<16x1xf32> to vector<16x32xf32>
    %18 = arith.subf %1, %17 : vector<16x32xf32>
    %cst_9 = arith.constant 9.99999974E-6 : f32
    %19 = vector.broadcast %cst_9 : f32 to vector<16x1xf32>
    %20 = arith.addf %16, %19 : vector<16x1xf32>
    %21 = math.rsqrt %20 : vector<16x1xf32>
    %22 = vector.broadcast %21 : vector<16x1xf32> to vector<16x32xf32>
    %23 = arith.mulf %18, %22 : vector<16x32xf32>
    %24 = vector.shape_cast %3 : vector<32xf32> to vector<1x32xf32>
    %25 = vector.broadcast %24 : vector<1x32xf32> to vector<16x32xf32>
    %26 = arith.mulf %23, %25 : vector<16x32xf32>
    %27 = vector.shape_cast %5 : vector<32xf32> to vector<1x32xf32>
    %28 = vector.broadcast %27 : vector<1x32xf32> to vector<16x32xf32>
    %29 = arith.addf %26, %28 : vector<16x32xf32>
    %30 = arith.truncf %29 : vector<16x32xf32> to vector<16x32xbf16>
    %c0_10 = arith.constant 0 : index
    %c0_11 = arith.constant 0 : index
    %31 = vector.load %arg4[%c0_10, %c0_11] : memref<32x96xbf16, #tpu.memory_space<vmem>>, vector<32x96xbf16>
    %cst_12 = arith.constant dense<0.000000e+00> : vector<16x96xf32>
    %32 = tpu.matmul %30, %31, %cst_12 {dimension_numbers = #tpu.dot_dimension_numbers<[1], [0], [0], [1], [0, 0, 1, 1], [], []>} : vector<16x32xbf16>, vector<32x96xbf16>, vector<16x96xf32> -> vector<16x96xf32>
    %33 = vector.extract_strided_slice %32 {offsets = [0, 0], sizes = [8, 96], strides = [1, 1]} : vector<16x96xf32> to vector<8x96xf32>
    %34 = vector.extract_strided_slice %33 {offsets = [0, 0], sizes = [8, 8], strides = [1, 1]} : vector<8x96xf32> to vector<8x8xf32>
    %cst_13 = arith.constant 0.353553385 : f32
    %35 = vector.broadcast %cst_13 : f32 to vector<8x8xf32>
    %36 = arith.mulf %34, %35 : vector<8x8xf32>
    %37 = arith.truncf %36 : vector<8x8xf32> to vector<8x8xbf16>
    %38 = vector.extract_strided_slice %33 {offsets = [0, 8], sizes = [8, 8], strides = [1, 1]} : vector<8x96xf32> to vector<8x8xf32>
    %cst_14 = arith.constant 0.353553385 : f32
    %39 = vector.broadcast %cst_14 : f32 to vector<8x8xf32>
    %40 = arith.mulf %38, %39 : vector<8x8xf32>
    %41 = arith.truncf %40 : vector<8x8xf32> to vector<8x8xbf16>
    %42 = vector.extract_strided_slice %33 {offsets = [0, 16], sizes = [8, 8], strides = [1, 1]} : vector<8x96xf32> to vector<8x8xf32>
    %cst_15 = arith.constant 0.353553385 : f32
    %43 = vector.broadcast %cst_15 : f32 to vector<8x8xf32>
    %44 = arith.mulf %42, %43 : vector<8x8xf32>
    %45 = arith.truncf %44 : vector<8x8xf32> to vector<8x8xbf16>
    %46 = vector.extract_strided_slice %33 {offsets = [0, 24], sizes = [8, 8], strides = [1, 1]} : vector<8x96xf32> to vector<8x8xf32>
    %cst_16 = arith.constant 0.353553385 : f32
    %47 = vector.broadcast %cst_16 : f32 to vector<8x8xf32>
    %48 = arith.mulf %46, %47 : vector<8x8xf32>
    %49 = arith.truncf %48 : vector<8x8xf32> to vector<8x8xbf16>
    %50 = vector.extract_strided_slice %32 {offsets = [8, 0], sizes = [8, 96], strides = [1, 1]} : vector<16x96xf32> to vector<8x96xf32>
    %51 = vector.extract_strided_slice %50 {offsets = [0, 0], sizes = [8, 8], strides = [1, 1]} : vector<8x96xf32> to vector<8x8xf32>
    %cst_17 = arith.constant 0.353553385 : f32
    %52 = vector.broadcast %cst_17 : f32 to vector<8x8xf32>
    %53 = arith.mulf %51, %52 : vector<8x8xf32>
    %54 = arith.truncf %53 : vector<8x8xf32> to vector<8x8xbf16>
    %55 = vector.extract_strided_slice %50 {offsets = [0, 8], sizes = [8, 8], strides = [1, 1]} : vector<8x96xf32> to vector<8x8xf32>
    %cst_18 = arith.constant 0.353553385 : f32
    %56 = vector.broadcast %cst_18 : f32 to vector<8x8xf32>
    %57 = arith.mulf %55, %56 : vector<8x8xf32>
    %58 = arith.truncf %57 : vector<8x8xf32> to vector<8x8xbf16>
    %59 = vector.extract_strided_slice %50 {offsets = [0, 16], sizes = [8, 8], strides = [1, 1]} : vector<8x96xf32> to vector<8x8xf32>
    %cst_19 = arith.constant 0.353553385 : f32
    %60 = vector.broadcast %cst_19 : f32 to vector<8x8xf32>
    %61 = arith.mulf %59, %60 : vector<8x8xf32>
    %62 = arith.truncf %61 : vector<8x8xf32> to vector<8x8xbf16>
    %63 = vector.extract_strided_slice %50 {offsets = [0, 24], sizes = [8, 8], strides = [1, 1]} : vector<8x96xf32> to vector<8x8xf32>
    %cst_20 = arith.constant 0.353553385 : f32
    %64 = vector.broadcast %cst_20 : f32 to vector<8x8xf32>
    %65 = arith.mulf %63, %64 : vector<8x8xf32>
    %66 = arith.truncf %65 : vector<8x8xf32> to vector<8x8xbf16>
    %67 = vector.shape_cast %37 : vector<8x8xbf16> to vector<1x8x8xbf16>
    %68 = vector.shape_cast %41 : vector<8x8xbf16> to vector<1x8x8xbf16>
    %69 = vector.shape_cast %45 : vector<8x8xbf16> to vector<1x8x8xbf16>
    %70 = vector.shape_cast %49 : vector<8x8xbf16> to vector<1x8x8xbf16>
    %71 = vector.shape_cast %54 : vector<8x8xbf16> to vector<1x8x8xbf16>
    %72 = vector.shape_cast %58 : vector<8x8xbf16> to vector<1x8x8xbf16>
    %73 = vector.shape_cast %62 : vector<8x8xbf16> to vector<1x8x8xbf16>
    %74 = vector.shape_cast %66 : vector<8x8xbf16> to vector<1x8x8xbf16>
    %75 = tpu.concatenate %67, %68, %69, %70, %71, %72, %73, %74 in 0 : vector<1x8x8xbf16>, vector<1x8x8xbf16>, vector<1x8x8xbf16>, vector<1x8x8xbf16>, vector<1x8x8xbf16>, vector<1x8x8xbf16>, vector<1x8x8xbf16>, vector<1x8x8xbf16> -> vector<8x8x8xbf16>
    %76 = vector.extract_strided_slice %32 {offsets = [0, 0], sizes = [8, 96], strides = [1, 1]} : vector<16x96xf32> to vector<8x96xf32>
    %77 = vector.extract_strided_slice %76 {offsets = [0, 32], sizes = [8, 8], strides = [1, 1]} : vector<8x96xf32> to vector<8x8xf32>
    %78 = arith.truncf %77 : vector<8x8xf32> to vector<8x8xbf16>
    %79 = vector.extract_strided_slice %76 {offsets = [0, 40], sizes = [8, 8], strides = [1, 1]} : vector<8x96xf32> to vector<8x8xf32>
    %80 = arith.truncf %79 : vector<8x8xf32> to vector<8x8xbf16>
    %81 = vector.extract_strided_slice %76 {offsets = [0, 48], sizes = [8, 8], strides = [1, 1]} : vector<8x96xf32> to vector<8x8xf32>
    %82 = arith.truncf %81 : vector<8x8xf32> to vector<8x8xbf16>
    %83 = vector.extract_strided_slice %76 {offsets = [0, 56], sizes = [8, 8], strides = [1, 1]} : vector<8x96xf32> to vector<8x8xf32>
    %84 = arith.truncf %83 : vector<8x8xf32> to vector<8x8xbf16>
    %85 = vector.extract_strided_slice %32 {offsets = [8, 0], sizes = [8, 96], strides = [1, 1]} : vector<16x96xf32> to vector<8x96xf32>
    %86 = vector.extract_strided_slice %85 {offsets = [0, 32], sizes = [8, 8], strides = [1, 1]} : vector<8x96xf32> to vector<8x8xf32>
    %87 = arith.truncf %86 : vector<8x8xf32> to vector<8x8xbf16>
    %88 = vector.extract_strided_slice %85 {offsets = [0, 40], sizes = [8, 8], strides = [1, 1]} : vector<8x96xf32> to vector<8x8xf32>
    %89 = arith.truncf %88 : vector<8x8xf32> to vector<8x8xbf16>
    %90 = vector.extract_strided_slice %85 {offsets = [0, 48], sizes = [8, 8], strides = [1, 1]} : vector<8x96xf32> to vector<8x8xf32>
    %91 = arith.truncf %90 : vector<8x8xf32> to vector<8x8xbf16>
    %92 = vector.extract_strided_slice %85 {offsets = [0, 56], sizes = [8, 8], strides = [1, 1]} : vector<8x96xf32> to vector<8x8xf32>
    %93 = arith.truncf %92 : vector<8x8xf32> to vector<8x8xbf16>
    %94 = vector.shape_cast %78 : vector<8x8xbf16> to vector<1x8x8xbf16>
    %95 = vector.shape_cast %80 : vector<8x8xbf16> to vector<1x8x8xbf16>
    %96 = vector.shape_cast %82 : vector<8x8xbf16> to vector<1x8x8xbf16>
    %97 = vector.shape_cast %84 : vector<8x8xbf16> to vector<1x8x8xbf16>
    %98 = vector.shape_cast %87 : vector<8x8xbf16> to vector<1x8x8xbf16>
    %99 = vector.shape_cast %89 : vector<8x8xbf16> to vector<1x8x8xbf16>
    %100 = vector.shape_cast %91 : vector<8x8xbf16> to vector<1x8x8xbf16>
    %101 = vector.shape_cast %93 : vector<8x8xbf16> to vector<1x8x8xbf16>
    %102 = tpu.concatenate %94, %95, %96, %97, %98, %99, %100, %101 in 0 : vector<1x8x8xbf16>, vector<1x8x8xbf16>, vector<1x8x8xbf16>, vector<1x8x8xbf16>, vector<1x8x8xbf16>, vector<1x8x8xbf16>, vector<1x8x8xbf16>, vector<1x8x8xbf16> -> vector<8x8x8xbf16>
    %103 = vector.extract_strided_slice %32 {offsets = [0, 0], sizes = [8, 96], strides = [1, 1]} : vector<16x96xf32> to vector<8x96xf32>
    %104 = vector.extract_strided_slice %103 {offsets = [0, 64], sizes = [8, 8], strides = [1, 1]} : vector<8x96xf32> to vector<8x8xf32>
    %105 = arith.truncf %104 : vector<8x8xf32> to vector<8x8xbf16>
    %106 = vector.extract_strided_slice %103 {offsets = [0, 72], sizes = [8, 8], strides = [1, 1]} : vector<8x96xf32> to vector<8x8xf32>
    %107 = arith.truncf %106 : vector<8x8xf32> to vector<8x8xbf16>
    %108 = vector.extract_strided_slice %103 {offsets = [0, 80], sizes = [8, 8], strides = [1, 1]} : vector<8x96xf32> to vector<8x8xf32>
    %109 = arith.truncf %108 : vector<8x8xf32> to vector<8x8xbf16>
    %110 = vector.extract_strided_slice %103 {offsets = [0, 88], sizes = [8, 8], strides = [1, 1]} : vector<8x96xf32> to vector<8x8xf32>
    %111 = arith.truncf %110 : vector<8x8xf32> to vector<8x8xbf16>
    %112 = vector.extract_strided_slice %32 {offsets = [8, 0], sizes = [8, 96], strides = [1, 1]} : vector<16x96xf32> to vector<8x96xf32>
    %113 = vector.extract_strided_slice %112 {offsets = [0, 64], sizes = [8, 8], strides = [1, 1]} : vector<8x96xf32> to vector<8x8xf32>
    %114 = arith.truncf %113 : vector<8x8xf32> to vector<8x8xbf16>
    %115 = vector.extract_strided_slice %112 {offsets = [0, 72], sizes = [8, 8], strides = [1, 1]} : vector<8x96xf32> to vector<8x8xf32>
    %116 = arith.truncf %115 : vector<8x8xf32> to vector<8x8xbf16>
    %117 = vector.extract_strided_slice %112 {offsets = [0, 80], sizes = [8, 8], strides = [1, 1]} : vector<8x96xf32> to vector<8x8xf32>
    %118 = arith.truncf %117 : vector<8x8xf32> to vector<8x8xbf16>
    %119 = vector.extract_strided_slice %112 {offsets = [0, 88], sizes = [8, 8], strides = [1, 1]} : vector<8x96xf32> to vector<8x8xf32>
    %120 = arith.truncf %119 : vector<8x8xf32> to vector<8x8xbf16>
    %121 = vector.shape_cast %105 : vector<8x8xbf16> to vector<1x8x8xbf16>
    %122 = vector.shape_cast %107 : vector<8x8xbf16> to vector<1x8x8xbf16>
    %123 = vector.shape_cast %109 : vector<8x8xbf16> to vector<1x8x8xbf16>
    %124 = vector.shape_cast %111 : vector<8x8xbf16> to vector<1x8x8xbf16>
    %125 = vector.shape_cast %114 : vector<8x8xbf16> to vector<1x8x8xbf16>
    %126 = vector.shape_cast %116 : vector<8x8xbf16> to vector<1x8x8xbf16>
    %127 = vector.shape_cast %118 : vector<8x8xbf16> to vector<1x8x8xbf16>
    %128 = vector.shape_cast %120 : vector<8x8xbf16> to vector<1x8x8xbf16>
    %129 = tpu.concatenate %121, %122, %123, %124, %125, %126, %127, %128 in 0 : vector<1x8x8xbf16>, vector<1x8x8xbf16>, vector<1x8x8xbf16>, vector<1x8x8xbf16>, vector<1x8x8xbf16>, vector<1x8x8xbf16>, vector<1x8x8xbf16>, vector<1x8x8xbf16> -> vector<8x8x8xbf16>
    "tpu.trace_start"() <{level = 10 : i32, message = "gqd,gkd->gqk"}> : () -> ()
    %cst_21 = arith.constant dense<0.000000e+00> : vector<8x8x8xf32>
    %130 = tpu.matmul %75, %102, %cst_21 {dimension_numbers = #tpu.dot_dimension_numbers<[2], [2], [1], [1], [0, 0, 0, 1, 1, 1], [0], [0]>} : vector<8x8x8xbf16>, vector<8x8x8xbf16>, vector<8x8x8xf32> -> vector<8x8x8xf32>
    "tpu.trace_stop"() : () -> ()
    %cst_22 = arith.constant dense<0xFF800000> : vector<8x8xf32>
    %131 = vector.multi_reduction <maximumf>, %130, %cst_22 [2] : vector<8x8x8xf32> to vector<8x8xf32>
    %132 = vector.shape_cast %131 : vector<8x8xf32> to vector<8x8x1xf32>
    %133 = vector.broadcast %132 : vector<8x8x1xf32> to vector<8x8x8xf32>
    %134 = arith.subf %130, %133 : vector<8x8x8xf32>
    %135 = math.exp %134 : vector<8x8x8xf32>
    %cst_23 = arith.constant dense<0.000000e+00> : vector<8x8xf32>
    %136 = vector.multi_reduction <add>, %135, %cst_23 [2] : vector<8x8x8xf32> to vector<8x8xf32>
    %137 = vector.shape_cast %136 : vector<8x8xf32> to vector<8x8x1xf32>
    %138 = tpu.reciprocal %137 {approx = true} : vector<8x8x1xf32> -> vector<8x8x1xf32>
    %139 = vector.broadcast %138 : vector<8x8x1xf32> to vector<8x8x8xf32>
    %140 = arith.mulf %135, %139 : vector<8x8x8xf32>
    %141 = arith.truncf %140 : vector<8x8x8xf32> to vector<8x8x8xbf16>
    "tpu.trace_start"() <{level = 10 : i32, message = "gqk,gkd->gqd"}> : () -> ()
    %cst_24 = arith.constant dense<0.000000e+00> : vector<8x8x8xf32>
    %142 = tpu.matmul %141, %129, %cst_24 {dimension_numbers = #tpu.dot_dimension_numbers<[2], [1], [1], [2], [0, 0, 0, 1, 1, 2], [0], [0]>} : vector<8x8x8xbf16>, vector<8x8x8xbf16>, vector<8x8x8xf32> -> vector<8x8x8xf32>
    "tpu.trace_stop"() : () -> ()
    %143 = arith.truncf %142 : vector<8x8x8xf32> to vector<8x8x8xbf16>
    %144 = vector.extract_strided_slice %143 {offsets = [0, 0, 0], sizes = [1, 8, 8], strides = [1, 1, 1]} : vector<8x8x8xbf16> to vector<1x8x8xbf16>
    %145 = vector.shape_cast %144 : vector<1x8x8xbf16> to vector<8x8xbf16>
    %146 = vector.extract_strided_slice %143 {offsets = [1, 0, 0], sizes = [1, 8, 8], strides = [1, 1, 1]} : vector<8x8x8xbf16> to vector<1x8x8xbf16>
    %147 = vector.shape_cast %146 : vector<1x8x8xbf16> to vector<8x8xbf16>
    %148 = vector.extract_strided_slice %143 {offsets = [2, 0, 0], sizes = [1, 8, 8], strides = [1, 1, 1]} : vector<8x8x8xbf16> to vector<1x8x8xbf16>
    %149 = vector.shape_cast %148 : vector<1x8x8xbf16> to vector<8x8xbf16>
    %150 = vector.extract_strided_slice %143 {offsets = [3, 0, 0], sizes = [1, 8, 8], strides = [1, 1, 1]} : vector<8x8x8xbf16> to vector<1x8x8xbf16>
    %151 = vector.shape_cast %150 : vector<1x8x8xbf16> to vector<8x8xbf16>
    %152 = tpu.concatenate %145, %147, %149, %151 in 1 : vector<8x8xbf16>, vector<8x8xbf16>, vector<8x8xbf16>, vector<8x8xbf16> -> vector<8x32xbf16>
    %153 = vector.extract_strided_slice %143 {offsets = [4, 0, 0], sizes = [1, 8, 8], strides = [1, 1, 1]} : vector<8x8x8xbf16> to vector<1x8x8xbf16>
    %154 = vector.shape_cast %153 : vector<1x8x8xbf16> to vector<8x8xbf16>
    %155 = vector.extract_strided_slice %143 {offsets = [5, 0, 0], sizes = [1, 8, 8], strides = [1, 1, 1]} : vector<8x8x8xbf16> to vector<1x8x8xbf16>
    %156 = vector.shape_cast %155 : vector<1x8x8xbf16> to vector<8x8xbf16>
    %157 = vector.extract_strided_slice %143 {offsets = [6, 0, 0], sizes = [1, 8, 8], strides = [1, 1, 1]} : vector<8x8x8xbf16> to vector<1x8x8xbf16>
    %158 = vector.shape_cast %157 : vector<1x8x8xbf16> to vector<8x8xbf16>
    %159 = vector.extract_strided_slice %143 {offsets = [7, 0, 0], sizes = [1, 8, 8], strides = [1, 1, 1]} : vector<8x8x8xbf16> to vector<1x8x8xbf16>
    %160 = vector.shape_cast %159 : vector<1x8x8xbf16> to vector<8x8xbf16>
    %161 = tpu.concatenate %154, %156, %158, %160 in 1 : vector<8x8xbf16>, vector<8x8xbf16>, vector<8x8xbf16>, vector<8x8xbf16> -> vector<8x32xbf16>
    %162 = tpu.concatenate %152, %161 in 0 : vector<8x32xbf16>, vector<8x32xbf16> -> vector<16x32xbf16>
    %c0_25 = arith.constant 0 : index
    %c0_26 = arith.constant 0 : index
    %163 = vector.load %arg5[%c0_25, %c0_26] : memref<32x32xbf16, #tpu.memory_space<vmem>>, vector<32x32xbf16>
    %cst_27 = arith.constant dense<0.000000e+00> : vector<16x32xf32>
    %164 = tpu.matmul %162, %163, %cst_27 {dimension_numbers = #tpu.dot_dimension_numbers<[1], [0], [0], [1], [0, 0, 1, 1], [], []>} : vector<16x32xbf16>, vector<32x32xbf16>, vector<16x32xf32> -> vector<16x32xf32>
    %c0_28 = arith.constant 0 : index
    %c0_29 = arith.constant 0 : index
    %165 = vector.load %arg6[%c0_28, %c0_29] : memref<1x32xf32, #tpu.memory_space<vmem>>, vector<1x32xf32>
    %166 = vector.shape_cast %165 : vector<1x32xf32> to vector<32xf32>
    %167 = vector.shape_cast %166 : vector<32xf32> to vector<1x32xf32>
    %168 = vector.broadcast %167 : vector<1x32xf32> to vector<16x32xf32>
    %169 = arith.addf %164, %168 : vector<16x32xf32>
    %170 = arith.addf %1, %169 : vector<16x32xf32>
    %c0_30 = arith.constant 0 : index
    %c0_31 = arith.constant 0 : index
    %171 = vector.load %arg7[%c0_30, %c0_31] : memref<1x32xf32, #tpu.memory_space<vmem>>, vector<1x32xf32>
    %172 = vector.shape_cast %171 : vector<1x32xf32> to vector<32xf32>
    %c0_32 = arith.constant 0 : index
    %c0_33 = arith.constant 0 : index
    %173 = vector.load %arg8[%c0_32, %c0_33] : memref<1x32xf32, #tpu.memory_space<vmem>>, vector<1x32xf32>
    %174 = vector.shape_cast %173 : vector<1x32xf32> to vector<32xf32>
    %cst_34 = arith.constant dense<0.000000e+00> : vector<16xf32>
    %175 = vector.multi_reduction <add>, %170, %cst_34 [1] : vector<16x32xf32> to vector<16xf32>
    %176 = vector.shape_cast %175 : vector<16xf32> to vector<16x1xf32>
    %cst_35 = arith.constant 3.200000e+01 : f32
    %177 = vector.broadcast %cst_35 : f32 to vector<16x1xf32>
    %178 = arith.divf %176, %177 : vector<16x1xf32>
    %179 = vector.broadcast %178 : vector<16x1xf32> to vector<16x32xf32>
    %180 = arith.subf %170, %179 : vector<16x32xf32>
    %181 = arith.mulf %180, %180 : vector<16x32xf32>
    %cst_36 = arith.constant dense<0.000000e+00> : vector<16xf32>
    %182 = vector.multi_reduction <add>, %181, %cst_36 [1] : vector<16x32xf32> to vector<16xf32>
    %183 = vector.shape_cast %182 : vector<16xf32> to vector<16x1xf32>
    %cst_37 = arith.constant 3.200000e+01 : f32
    %184 = vector.broadcast %cst_37 : f32 to vector<16x1xf32>
    %185 = arith.divf %183, %184 : vector<16x1xf32>
    %186 = vector.broadcast %178 : vector<16x1xf32> to vector<16x32xf32>
    %187 = arith.subf %170, %186 : vector<16x32xf32>
    %cst_38 = arith.constant 9.99999974E-6 : f32
    %188 = vector.broadcast %cst_38 : f32 to vector<16x1xf32>
    %189 = arith.addf %185, %188 : vector<16x1xf32>
    %190 = math.rsqrt %189 : vector<16x1xf32>
    %191 = vector.broadcast %190 : vector<16x1xf32> to vector<16x32xf32>
    %192 = arith.mulf %187, %191 : vector<16x32xf32>
    %193 = vector.shape_cast %172 : vector<32xf32> to vector<1x32xf32>
    %194 = vector.broadcast %193 : vector<1x32xf32> to vector<16x32xf32>
    %195 = arith.mulf %192, %194 : vector<16x32xf32>
    %196 = vector.shape_cast %174 : vector<32xf32> to vector<1x32xf32>
    %197 = vector.broadcast %196 : vector<1x32xf32> to vector<16x32xf32>
    %198 = arith.addf %195, %197 : vector<16x32xf32>
    %199 = arith.truncf %198 : vector<16x32xf32> to vector<16x32xbf16>
    %c0_39 = arith.constant 0 : index
    %c0_40 = arith.constant 0 : index
    %200 = vector.load %arg9[%c0_39, %c0_40] : memref<32x128xbf16, #tpu.memory_space<vmem>>, vector<32x128xbf16>
    %cst_41 = arith.constant dense<0.000000e+00> : vector<16x128xf32>
    %201 = tpu.matmul %199, %200, %cst_41 {dimension_numbers = #tpu.dot_dimension_numbers<[1], [0], [0], [1], [0, 0, 1, 1], [], []>} : vector<16x32xbf16>, vector<32x128xbf16>, vector<16x128xf32> -> vector<16x128xf32>
    %c0_42 = arith.constant 0 : index
    %c0_43 = arith.constant 0 : index
    %202 = vector.load %arg10[%c0_42, %c0_43] : memref<1x128xf32, #tpu.memory_space<vmem>>, vector<1x128xf32>
    %203 = vector.shape_cast %202 : vector<1x128xf32> to vector<128xf32>
    %204 = vector.shape_cast %203 : vector<128xf32> to vector<1x128xf32>
    %205 = vector.broadcast %204 : vector<1x128xf32> to vector<16x128xf32>
    %206 = arith.addf %201, %205 : vector<16x128xf32>
    %cst_44 = arith.constant 5.000000e-01 : f32
    %207 = vector.broadcast %cst_44 : f32 to vector<16x128xf32>
    %208 = arith.mulf %207, %206 : vector<16x128xf32>
    %cst_45 = arith.constant 0.707106769 : f32
    %209 = vector.broadcast %cst_45 : f32 to vector<16x128xf32>
    %210 = arith.mulf %206, %209 : vector<16x128xf32>
    %211 = math.erf %210 : vector<16x128xf32>
    %cst_46 = arith.constant 1.000000e+00 : f32
    %212 = vector.broadcast %cst_46 : f32 to vector<16x128xf32>
    %213 = arith.addf %212, %211 : vector<16x128xf32>
    %214 = arith.mulf %208, %213 : vector<16x128xf32>
    %215 = arith.truncf %214 : vector<16x128xf32> to vector<16x128xbf16>
    %c0_47 = arith.constant 0 : index
    %c0_48 = arith.constant 0 : index
    %216 = vector.load %arg11[%c0_47, %c0_48] : memref<128x32xbf16, #tpu.memory_space<vmem>>, vector<128x32xbf16>
    %cst_49 = arith.constant dense<0.000000e+00> : vector<16x32xf32>
    %217 = tpu.matmul %215, %216, %cst_49 {dimension_numbers = #tpu.dot_dimension_numbers<[1], [0], [0], [1], [0, 0, 1, 1], [], []>} : vector<16x128xbf16>, vector<128x32xbf16>, vector<16x32xf32> -> vector<16x32xf32>
    %c0_50 = arith.constant 0 : index
    %c0_51 = arith.constant 0 : index
    %218 = vector.load %arg12[%c0_50, %c0_51] : memref<1x32xf32, #tpu.memory_space<vmem>>, vector<1x32xf32>
    %219 = vector.shape_cast %218 : vector<1x32xf32> to vector<32xf32>
    %220 = vector.shape_cast %219 : vector<32xf32> to vector<1x32xf32>
    %221 = vector.broadcast %220 : vector<1x32xf32> to vector<16x32xf32>
    %222 = arith.addf %217, %221 : vector<16x32xf32>
    %223 = arith.addf %170, %222 : vector<16x32xf32>
    %224 = vector.shape_cast %223 : vector<16x32xf32> to vector<2x8x32xf32>
    %c0_52 = arith.constant 0 : index
    %c0_53 = arith.constant 0 : index
    %c0_54 = arith.constant 0 : index
    %225 = vector.load %arg13[%c0_52, %c0_53, %c0_54] : memref<2x8x32xf32, #tpu.memory_space<vmem>>, vector<2x8x32xf32>
    tpu.vector_store %arg13[%c0_52, %c0_53, %c0_54], %224 {strides = array<i32>} : memref<2x8x32xf32, #tpu.memory_space<vmem>>, vector<2x8x32xf32>,
    return
  }
  func.func @transform_0(%arg0: i32) -> (i32, i32, i32) {
    %c0_i32 = arith.constant 0 : i32
    %c0_i32_0 = arith.constant 0 : i32
    %c0_i32_1 = arith.constant 0 : i32
    return %arg0, %c0_i32, %c0_i32_0 : i32, i32, i32
  }
  func.func @transform_1(%arg0: i32) -> (i32, i32) {
    %c0_i32 = arith.constant 0 : i32
    %c0_i32_0 = arith.constant 0 : i32
    %c0_i32_1 = arith.constant 0 : i32
    return %c0_i32, %c0_i32_0 : i32, i32
  }
  func.func @transform_2(%arg0: i32) -> (i32, i32) {
    %c0_i32 = arith.constant 0 : i32
    %c0_i32_0 = arith.constant 0 : i32
    %c0_i32_1 = arith.constant 0 : i32
    return %c0_i32, %c0_i32_0 : i32, i32
  }
  func.func @transform_3(%arg0: i32) -> (i32, i32) {
    %c0_i32 = arith.constant 0 : i32
    %c0_i32_0 = arith.constant 0 : i32
    %c0_i32_1 = arith.constant 0 : i32
    return %c0_i32, %c0_i32_0 : i32, i32
  }
  func.func @transform_4(%arg0: i32) -> (i32, i32) {
    %c0_i32 = arith.constant 0 : i32
    %c0_i32_0 = arith.constant 0 : i32
    %c0_i32_1 = arith.constant 0 : i32
    return %c0_i32, %c0_i32_0 : i32, i32
  }
  func.func @transform_5(%arg0: i32) -> (i32, i32) {
    %c0_i32 = arith.constant 0 : i32
    %c0_i32_0 = arith.constant 0 : i32
    %c0_i32_1 = arith.constant 0 : i32
    return %c0_i32, %c0_i32_0 : i32, i32
  }
  func.func @transform_6(%arg0: i32) -> (i32, i32) {
    %c0_i32 = arith.constant 0 : i32
    %c0_i32_0 = arith.constant 0 : i32
    %c0_i32_1 = arith.constant 0 : i32
    return %c0_i32, %c0_i32_0 : i32, i32
  }
  func.func @transform_7(%arg0: i32) -> (i32, i32) {
    %c0_i32 = arith.constant 0 : i32
    %c0_i32_0 = arith.constant 0 : i32
    %c0_i32_1 = arith.constant 0 : i32
    return %c0_i32, %c0_i32_0 : i32, i32
  }
  func.func @transform_8(%arg0: i32) -> (i32, i32) {
    %c0_i32 = arith.constant 0 : i32
    %c0_i32_0 = arith.constant 0 : i32
    %c0_i32_1 = arith.constant 0 : i32
    return %c0_i32, %c0_i32_0 : i32, i32
  }
  func.func @transform_9(%arg0: i32) -> (i32, i32) {
    %c0_i32 = arith.constant 0 : i32
    %c0_i32_0 = arith.constant 0 : i32
    %c0_i32_1 = arith.constant 0 : i32
    return %c0_i32, %c0_i32_0 : i32, i32
  }
  func.func @transform_10(%arg0: i32) -> (i32, i32) {
    %c0_i32 = arith.constant 0 : i32
    %c0_i32_0 = arith.constant 0 : i32
    %c0_i32_1 = arith.constant 0 : i32
    return %c0_i32, %c0_i32_0 : i32, i32
  }
  func.func @transform_11(%arg0: i32) -> (i32, i32) {
    %c0_i32 = arith.constant 0 : i32
    %c0_i32_0 = arith.constant 0 : i32
    %c0_i32_1 = arith.constant 0 : i32
    return %c0_i32, %c0_i32_0 : i32, i32
  }
  func.func @transform_12(%arg0: i32) -> (i32, i32, i32) {
    %c0_i32 = arith.constant 0 : i32
    %c0_i32_0 = arith.constant 0 : i32
    %c0_i32_1 = arith.constant 0 : i32
    return %arg0, %c0_i32, %c0_i32_0 : i32, i32, i32
  }
}

</mosaic_0001>

<bundles_post_ra>
// kernel: tpu_custom_call.1
= control target key start
LH: loop header
LB: loop body
LE: loop exit
PB: predicated region body
PF: predicated region fallthrough
CT: control target
= control target key end

     0   :  { %17 = vsyncpa [#allocation3], 0  ;;  %s2762_s0 = inlined_call_operand.hbm [shape: f32[2,8,32], index: 0, kind: input, shape index: {}]   ;;  %s2763_s1 = inlined_call_operand.hbm [shape: f32[1,32], index: 1, kind: input, shape index: {}]   ;;  %s2764_s2 = inlined_call_operand.hbm [shape: f32[1,32], index: 2, kind: input, shape index: {}]   ;;  %s2765_s3 = inlined_call_operand.hbm [shape: bf16[32,96], index: 3, kind: input, shape index: {}]   ;;  %s2766_s4 = inlined_call_operand.hbm [shape: bf16[32,32], index: 4, kind: input, shape index: {}]   ;;  %s2767_s5 = inlined_call_operand.hbm [shape: f32[1,32], index: 5, kind: input, shape index: {}]   ;;  %s2768_s6 = inlined_call_operand.hbm [shape: f32[1,32], index: 6, kind: input, shape index: {}]   ;;  %s2769_s7 = inlined_call_operand.hbm [shape: f32[1,32], index: 7, kind: input, shape index: {}]   ;;  %s2770_s8 = inlined_call_operand.hbm [shape: bf16[32,128], index: 8, kind: input, shape index: {}]   ;;  %s2771_s9 = inlined_call_operand.hbm [shape: f32[1,128], index: 9, kind: input, shape index: {}]   ;;  %s2772_s10 = inlined_call_operand.hbm [shape: bf16[128,32], index: 10, kind: input, shape index: {}]   ;;  %s2773_s11 = inlined_call_operand.hbm [shape: f32[1,32], index: 11, kind: input, shape index: {}]   ;;  %s2774_s12 = inlined_call_operand.hbm [shape: f32[2,8,32], index: 12, kind: output, shape index: {}]  }
   0x1   :  { %18 = vsyncpa [#allocation6], 0 }
   0x2   :  { %19 = vsyncpa [#allocation9], 0 }
   0x3   :  { %20 = vsyncpa [#allocation12], 0 }
   0x4   :  { %21 = vsyncpa [#allocation15], 0 }
   0x5   :  { %22 = vsyncpa [#allocation18], 0 }
   0x6   :  { %23 = vsyncpa [#allocation21], 0 }
   0x7   :  { %24 = vsyncpa [#allocation4], 0  ;;  %s2192_s21 = smov [#allocation5]   ;;  %s2193_s23 = smov [#allocation8]  }
   0x8   :  { %s43_s22 = sshll.u32 %s2192_s21, 4  ;;  %s62_s24 = sshll.u32 %s2193_s23, 4  ;;  %s44_s22 = int_to_ptr.vmem [resolvable:$true] %s43_s22  ;;  %s2282_s24 = int_to_ptr.vmem [resolvable:$true] %s62_s24 }
   0x9   :  { %s1890_s27 = scalar_lea.hbm %s2763_s1, 16 }
   0xa   :  { %p1891_p0 = scmp.ne.s32.totalorder %s2763_s1, %s1890_s27  ;;  %p1894_p1 = scmp.lt.u32.totalorder %s1890_s27, %s2763_s1 }
   0xc   :  { %p1896_p2 = pnand %p1894_p1, %p1891_p0 }
   0xe   :  { %1899 = shalt.err (!%p1896_p2)
}
   0xf   :  { %s1900_s14 = scalar_lea.vmem %s44_s22, 16  ;;  %s1904_s15 = scalar_lea.vmem %s44_s22, 32 }
  0x10   :  { %p1901_p3 = scmp.ne.s32.totalorder %s44_s22, %s1900_s14  ;;  %p1905_p4 = scmp.lt.s32.totalorder %s44_s22, %s44_s22 }
  0x11   :  { %p1906_p5 = scmp.lt.s32.totalorder %s1904_s15, %s1900_s14 }
  0x13   :  { %p1907_p6 = por %p1906_p5, %p1905_p4 }
  0x15   :  { %p1908_p7 = pnand %p1907_p6, %p1901_p3 }
  0x17   :  { %1911 = shalt.err (!%p1908_p7)
}
  0x18   :  { %46 = dma.hbm_to_vmem [thread:$0]  %s2763_s1, 16, %s44_s22, [#allocation6]  }
  0x19   :  { %s1912_s20 = scalar_lea.hbm %s2765_s3, 256 }
  0x1a   :  { %p1913_p8 = scmp.ne.s32.totalorder %s2765_s3, %s1912_s20  ;;  %p1916_p9 = scmp.lt.u32.totalorder %s1912_s20, %s2765_s3 }
  0x1c   :  { %p1918_p10 = pnand %p1916_p9, %p1913_p8 }
  0x1e   :  { %1921 = shalt.err (!%p1918_p10)
}
  0x1f   :  { %s1922_s27 = scalar_lea.vmem %s2282_s24, 256  ;;  %p1927_p12 = scmp.lt.s32.totalorder %s2282_s24, %s2282_s24 }
  0x20   :  { %p1923_p11 = scmp.ne.s32.totalorder %s2282_s24, %s1922_s27  ;;  %p1928_p13 = scmp.lt.s32.totalorder %s1922_s27, %s1922_s27 }
  0x22   :  { %p1929_p0 = por %p1928_p13, %p1927_p12 }
  0x24   :  { %p1930_p1 = pnand %p1929_p0, %p1923_p11 }
  0x26   :  { %1933 = shalt.err (!%p1930_p1)
}
  0x27   :  { %s2194_s1 = smov 64   ;;  %s2195_s22 = smov 4  }
  0x28   :  { %68 = dma.hbm_to_vmem [thread:$0]  %s2765_s3, 256, %s2282_s24, [#allocation9], %s2194_s1, %s2194_s1, %s2195_s22  }
  0x29   :  { %s2196_s30 = smov [#allocation11]   ;;  %s2197_s14 = smov [#allocation14]  }
  0x2a   :  { %s87_s13 = sshll.u32 %s2196_s30, 4  ;;  %s107_s15 = sshll.u32 %s2197_s14, 4  ;;  %s88_s13 = int_to_ptr.vmem [resolvable:$true] %s87_s13  ;;  %s108_s15 = int_to_ptr.vmem [resolvable:$true] %s107_s15 }
  0x2b   :  { %s1934_s18 = scalar_lea.hbm %s2767_s5, 16 }
  0x2c   :  { %p1935_p2 = scmp.ne.s32.totalorder %s2767_s5, %s1934_s18  ;;  %p1938_p3 = scmp.lt.u32.totalorder %s1934_s18, %s2767_s5 }
  0x2e   :  { %p1940_p4 = pnand %p1938_p3, %p1935_p2 }
  0x30   :  { %1943 = shalt.err (!%p1940_p4)
}
  0x31   :  { %s1944_s3 = scalar_lea.vmem %s88_s13, 16  ;;  %s1948_s24 = scalar_lea.vmem %s88_s13, 32 }
  0x32   :  { %p1945_p5 = scmp.ne.s32.totalorder %s88_s13, %s1944_s3  ;;  %p1949_p6 = scmp.lt.s32.totalorder %s88_s13, %s88_s13 }
  0x33   :  { %p1950_p7 = scmp.lt.s32.totalorder %s1948_s24, %s1944_s3 }
  0x35   :  { %p1951_p8 = por %p1950_p7, %p1949_p6 }
  0x37   :  { %p1952_p9 = pnand %p1951_p8, %p1945_p5 }
  0x39   :  { %1955 = shalt.err (!%p1952_p9)
}
  0x3a   :  { %90 = dma.hbm_to_vmem [thread:$0]  %s2767_s5, 16, %s88_s13, [#allocation12]  }
  0x3b   :  { %s1956_s29 = scalar_lea.hbm %s2769_s7, 16 }
  0x3c   :  { %p1957_p10 = scmp.ne.s32.totalorder %s2769_s7, %s1956_s29  ;;  %p1960_p11 = scmp.lt.u32.totalorder %s1956_s29, %s2769_s7 }
  0x3e   :  { %p1962_p12 = pnand %p1960_p11, %p1957_p10 }
  0x40   :  { %1965 = shalt.err (!%p1962_p12)
}
  0x41   :  { %s1966_s18 = scalar_lea.vmem %s108_s15, 16  ;;  %s1970_s19 = scalar_lea.vmem %s108_s15, 32 }
  0x42   :  { %p1967_p13 = scmp.ne.s32.totalorder %s108_s15, %s1966_s18  ;;  %p1971_p0 = scmp.lt.s32.totalorder %s108_s15, %s108_s15 }
  0x43   :  { %p1972_p1 = scmp.lt.s32.totalorder %s1970_s19, %s1966_s18 }
  0x45   :  { %p1973_p2 = por %p1972_p1, %p1971_p0 }
  0x47   :  { %p1974_p3 = pnand %p1973_p2, %p1967_p13 }
  0x49   :  { %1977 = shalt.err (!%p1974_p3)
}
  0x4a   :  { %110 = dma.hbm_to_vmem [thread:$0]  %s2769_s7, 16, %s108_s15, [#allocation15]  }
  0x4b   :  { %s2198_s20 = smov [#allocation17]   ;;  %s2199_s23 = smov [#allocation2]  }
  0x4c   :  { %s129_s21 = sshll.u32 %s2198_s20, 4  ;;  %s30_s3 = sshll.u32 %s2199_s23, 4  ;;  %s130_s21 = int_to_ptr.vmem [resolvable:$true] %s129_s21  ;;  %s2340_s3 = int_to_ptr.vmem [resolvable:$true] %s30_s3 }
  0x4d   :  { %s1978_s26 = scalar_lea.hbm %s2771_s9, 16 }
  0x4e   :  { %p1979_p4 = scmp.ne.s32.totalorder %s2771_s9, %s1978_s26  ;;  %p1982_p5 = scmp.lt.u32.totalorder %s1978_s26, %s2771_s9 }
  0x50   :  { %p1984_p6 = pnand %p1982_p5, %p1979_p4 }
  0x52   :  { %1987 = shalt.err (!%p1984_p6)
}
  0x53   :  { %s1988_s7 = scalar_lea.vmem %s130_s21, 16  ;;  %s1992_s15 = scalar_lea.vmem %s130_s21, 32 }
  0x54   :  { %p1989_p7 = scmp.ne.s32.totalorder %s130_s21, %s1988_s7  ;;  %p1993_p8 = scmp.lt.s32.totalorder %s130_s21, %s130_s21 }
  0x55   :  { %p1994_p9 = scmp.lt.s32.totalorder %s1992_s15, %s1988_s7 }
  0x57   :  { %p1995_p10 = por %p1994_p9, %p1993_p8 }
  0x59   :  { %p1996_p11 = pnand %p1995_p10, %p1989_p7 }
  0x5b   :  { %1999 = shalt.err (!%p1996_p11)
}
  0x5c   :  { %132 = dma.hbm_to_vmem [thread:$0]  %s2771_s9, 16, %s130_s21, [#allocation18]  }
  0x5d   :  { %s2000_s19 = scalar_lea.hbm %s2762_s0, 256 }
  0x5e   :  { %p2001_p12 = scmp.ne.s32.totalorder %s2762_s0, %s2000_s19  ;;  %p2004_p13 = scmp.lt.u32.totalorder %s2000_s19, %s2762_s0 }
  0x60   :  { %p2006_p0 = pnand %p2004_p13, %p2001_p12 }
  0x62   :  { %2009 = shalt.err (!%p2006_p0)
}
  0x63   :  { %s2010_s24 = scalar_lea.vmem %s2340_s3, 256  ;;  %p2015_p2 = scmp.lt.s32.totalorder %s2340_s3, %s2340_s3 }
  0x64   :  { %p2011_p1 = scmp.ne.s32.totalorder %s2340_s3, %s2010_s24  ;;  %p2016_p3 = scmp.lt.s32.totalorder %s2010_s24, %s2010_s24 }
  0x66   :  { %p2017_p4 = por %p2016_p3, %p2015_p2 }
  0x68   :  { %p2018_p5 = pnand %p2017_p4, %p2011_p1 }
  0x6a   :  { %2021 = shalt.err (!%p2018_p5)
}
  0x6b   :  { %s2200_s9 = smov 128   ;;  %s2201_s21 = smov 8  }
  0x6c   :  { %36 = dma.hbm_to_vmem [thread:$0]  %s2762_s0, 256, %s2340_s3, [#allocation3], %s2200_s9, %s2200_s9, %s2201_s21  }
  0x6d   :  { %s2202_s27 = smov [#allocation7]   ;;  %s2203_s29 = smov [#allocation10]  }
  0x6e   :  { %s53_s28 = sshll.u32 %s2202_s27, 4  ;;  %s74_s30 = sshll.u32 %s2203_s29, 4  ;;  %s54_s28 = int_to_ptr.vmem [resolvable:$true] %s53_s28  ;;  %s2374_s30 = int_to_ptr.vmem [resolvable:$true] %s74_s30 }
  0x6f   :  { %s2022_s14 = scalar_lea.hbm %s2764_s2, 16 }
  0x70   :  { %p2023_p6 = scmp.ne.s32.totalorder %s2764_s2, %s2022_s14  ;;  %p2026_p7 = scmp.lt.u32.totalorder %s2022_s14, %s2764_s2 }
  0x72   :  { %p2028_p8 = pnand %p2026_p7, %p2023_p6 }
  0x74   :  { %2031 = shalt.err (!%p2028_p8)
}
  0x75   :  { %s2032_s0 = scalar_lea.vmem %s54_s28, 16  ;;  %s2036_s3 = scalar_lea.vmem %s54_s28, 32 }
  0x76   :  { %p2033_p9 = scmp.ne.s32.totalorder %s54_s28, %s2032_s0  ;;  %p2037_p10 = scmp.lt.s32.totalorder %s54_s28, %s54_s28 }
  0x77   :  { %p2038_p11 = scmp.lt.s32.totalorder %s2036_s3, %s2032_s0 }
  0x79   :  { %p2039_p12 = por %p2038_p11, %p2037_p10 }
  0x7b   :  { %p2040_p13 = pnand %p2039_p12, %p2033_p9 }
  0x7d   :  { %2043 = shalt.err (!%p2040_p13)
}
  0x7e   :  { %56 = dma.hbm_to_vmem [thread:$0]  %s2764_s2, 16, %s54_s28, [#allocation6]  }
  0x7f   :  { %s2044_s24 = scalar_lea.hbm %s2766_s4, 256 }
  0x80   :  { %p2045_p0 = scmp.ne.s32.totalorder %s2766_s4, %s2044_s24  ;;  %p2048_p1 = scmp.lt.u32.totalorder %s2044_s24, %s2766_s4 }
  0x82   :  { %p2050_p2 = pnand %p2048_p1, %p2045_p0 }
  0x84   :  { %2053 = shalt.err (!%p2050_p2)
}
  0x85   :  { %s2054_s7 = scalar_lea.vmem %s2374_s30, 256  ;;  %p2059_p4 = scmp.lt.s32.totalorder %s2374_s30, %s2374_s30 }
  0x86   :  { %p2055_p3 = scmp.ne.s32.totalorder %s2374_s30, %s2054_s7  ;;  %p2060_p5 = scmp.lt.s32.totalorder %s2054_s7, %s2054_s7 }
  0x88   :  { %p2061_p6 = por %p2060_p5, %p2059_p4 }
  0x8a   :  { %p2062_p7 = pnand %p2061_p6, %p2055_p3 }
  0x8c   :  { %2065 = shalt.err (!%p2062_p7)
}
  0x8d   :  { %80 = dma.hbm_to_vmem [thread:$0]  %s2766_s4, 256, %s2374_s30, [#allocation9], %s2194_s1, %s2194_s1, %s2195_s22  }
  0x8e   :  { %s2204_s15 = smov [#allocation13]   ;;  %s2205_s16 = smov [#allocation16]  }
  0x8f   :  { %s97_s14 = sshll.u32 %s2204_s15, 4  ;;  %s116_s17 = sshll.u32 %s2205_s16, 4  ;;  %s98_s14 = int_to_ptr.vmem [resolvable:$true] %s97_s14  ;;  %s2408_s17 = int_to_ptr.vmem [resolvable:$true] %s116_s17 }
  0x90   :  { %s2066_s0 = scalar_lea.hbm %s2768_s6, 16 }
  0x91   :  { %p2067_p8 = scmp.ne.s32.totalorder %s2768_s6, %s2066_s0  ;;  %p2070_p9 = scmp.lt.u32.totalorder %s2066_s0, %s2768_s6 }
  0x93   :  { %p2072_p10 = pnand %p2070_p9, %p2067_p8 }
  0x95   :  { %2075 = shalt.err (!%p2072_p10)
}
  0x96   :  { %s2076_s4 = scalar_lea.vmem %s98_s14, 16  ;;  %s2080_s30 = scalar_lea.vmem %s98_s14, 32 }
  0x97   :  { %p2077_p11 = scmp.ne.s32.totalorder %s98_s14, %s2076_s4  ;;  %p2081_p12 = scmp.lt.s32.totalorder %s98_s14, %s98_s14 }
  0x98   :  { %p2082_p13 = scmp.lt.s32.totalorder %s2080_s30, %s2076_s4 }
  0x9a   :  { %p2083_p0 = por %p2082_p13, %p2081_p12 }
  0x9c   :  { %p2084_p1 = pnand %p2083_p0, %p2077_p11 }
  0x9e   :  { %2087 = shalt.err (!%p2084_p1)
}
  0x9f   :  { %100 = dma.hbm_to_vmem [thread:$0]  %s2768_s6, 16, %s98_s14, [#allocation12]  }
  0xa0   :  { %s2088_s27 = scalar_lea.hbm %s2770_s8, 256 }
  0xa1   :  { %p2089_p2 = scmp.ne.s32.totalorder %s2770_s8, %s2088_s27  ;;  %p2092_p3 = scmp.lt.u32.totalorder %s2088_s27, %s2770_s8 }
  0xa3   :  { %p2094_p4 = pnand %p2092_p3, %p2089_p2 }
  0xa5   :  { %2097 = shalt.err (!%p2094_p4)
}
  0xa6   :  { %s2098_s15 = scalar_lea.vmem %s2408_s17, 256  ;;  %p2103_p6 = scmp.lt.s32.totalorder %s2408_s17, %s2408_s17 }
  0xa7   :  { %p2099_p5 = scmp.ne.s32.totalorder %s2408_s17, %s2098_s15  ;;  %p2104_p7 = scmp.lt.s32.totalorder %s2098_s15, %s2098_s15 }
  0xa9   :  { %p2105_p8 = por %p2104_p7, %p2103_p6 }
  0xab   :  { %p2106_p9 = pnand %p2105_p8, %p2099_p5 }
  0xad   :  { %2109 = shalt.err (!%p2106_p9)
}
  0xae   :  { %122 = dma.hbm_to_vmem [thread:$0]  %s2770_s8, 256, %s2408_s17, [#allocation15], %s2194_s1, %s2194_s1, %s2195_s22  }
  0xaf   :  { %s2206_s16 = smov [#allocation19]   ;;  %s2207_s19 = smov [#allocation20]  }
  0xb0   :  { %s138_s18 = sshll.u32 %s2206_s16, 4  ;;  %s151_s0 = sshll.u32 %s2207_s19, 4  ;;  %s139_s18 = int_to_ptr.vmem [resolvable:$true] %s138_s18  ;;  %s152_s0 = int_to_ptr.vmem [resolvable:$true] %s151_s0 }
  0xb1   :  { %s2110_s13 = scalar_lea.hbm %s2772_s10, 1024 }
  0xb2   :  { %p2111_p10 = scmp.ne.s32.totalorder %s2772_s10, %s2110_s13  ;;  %p2114_p11 = scmp.lt.u32.totalorder %s2110_s13, %s2772_s10 }
  0xb4   :  { %p2116_p12 = pnand %p2114_p11, %p2111_p10 }
  0xb6   :  { %2119 = shalt.err (!%p2116_p12)
}
  0xb7   :  { %s2120_s8 = scalar_lea.vmem %s139_s18, 1024  ;;  %p2125_p0 = scmp.lt.s32.totalorder %s139_s18, %s139_s18 }
  0xb8   :  { %p2121_p13 = scmp.ne.s32.totalorder %s139_s18, %s2120_s8  ;;  %p2126_p1 = scmp.lt.s32.totalorder %s2120_s8, %s2120_s8 }
  0xba   :  { %p2127_p2 = por %p2126_p1, %p2125_p0 }
  0xbc   :  { %p2128_p3 = pnand %p2127_p2, %p2121_p13 }
  0xbe   :  { %2131 = shalt.err (!%p2128_p3)
}
  0xbf   :  { %144 = dma.hbm_to_vmem [thread:$0]  %s2772_s10, 1024, %s139_s18, [#allocation18], %s2194_s1, %s2194_s1, %s2195_s22  }
  0xc0   :  { %s2132_s27 = scalar_lea.hbm %s2773_s11, 16 }
  0xc1   :  { %p2133_p4 = scmp.ne.s32.totalorder %s2773_s11, %s2132_s27  ;;  %p2136_p5 = scmp.lt.u32.totalorder %s2132_s27, %s2773_s11 }
  0xc3   :  { %p2138_p6 = pnand %p2136_p5, %p2133_p4 }
  0xc5   :  { %2141 = shalt.err (!%p2138_p6)
}
  0xc6   :  { %s2142_s15 = scalar_lea.vmem %s152_s0, 16  ;;  %s2146_s6 = scalar_lea.vmem %s152_s0, 32 }
  0xc7   :  { %p2143_p7 = scmp.ne.s32.totalorder %s152_s0, %s2142_s15  ;;  %p2147_p8 = scmp.lt.s32.totalorder %s152_s0, %s152_s0 }
  0xc8   :  { %p2148_p9 = scmp.lt.s32.totalorder %s2146_s6, %s2142_s15 }
  0xca   :  { %p2149_p10 = por %p2148_p9, %p2147_p8 }
  0xcc   :  { %p2150_p11 = pnand %p2149_p10, %p2143_p7 }
  0xce   :  { %2153 = shalt.err (!%p2150_p11)
}
  0xcf   :  { %154 = dma.hbm_to_vmem [thread:$0]  %s2773_s11, 16, %s152_s0, [#allocation21]  }
  0xd0   :  { %2176 = dma.done.wait [#allocation3], 256  }
  0xd1   :  { %2177 = vsyncadd [#allocation3], 4294967040 }
  0xd2   :  { %2178 = dma.done.wait [#allocation6], 32  }
  0xd3   :  { %2179 = vsyncadd [#allocation6], 4294967264 }
  0xd4   :  { %2180 = dma.done.wait [#allocation9], 512  }
  0xd5   :  { %2181 = vsyncadd [#allocation9], 4294966784 }
  0xd6   :  { %2182 = dma.done.wait [#allocation12], 32  }
  0xd7   :  { %2183 = vsyncadd [#allocation12], 4294967264 }
  0xd8   :  { %2184 = dma.done.wait [#allocation15], 272  }
  0xd9   :  { %2185 = vsyncadd [#allocation15], 4294967024 }
  0xda   :  { %2186 = dma.done.wait [#allocation18], 1040  }
  0xdb   :  { %2187 = vsyncadd [#allocation18], 4294966256 }
  0xdc   :  { %2188 = dma.done.wait [#allocation21], 16  }
  0xdd   :  { %2189 = vsyncadd [#allocation21], 4294967280  ;;  %vm196_vm0 = vcmask 261120   ;;  %v2469_v0 = vld [vmem:[#allocation2] sm:$0xff]  ;;  %v2471_v1 = vld [vmem:[#allocation2 + $0x8] sm:$0xff]  ;;  %v2208_v15 = vmov 0.0  }
  0xde   :  { %v197_v2 = vsel %vm196_vm0, %v2469_v0, 0.0  ;;  %v200_v3 = vsel %vm196_vm0, %v2471_v1, 0.0  ;;  %v1832_v14 = vld [vmem:[#allocation8] sm:$0xff]   ;;  %1667 = vmatprep.subr.bf16.mxu0 %v2208_v15  ;;  %1687 = vmatprep.subr.bf16.mxu1 %v2208_v15  ;;  %v1833_v16 = vld [vmem:[#allocation8 + $0x8] sm:$0xff]   ;;  %vm2209_vm1 = vmmov 0   ;;  %s2210_s11 = smov 112  }
  0xdf   :  { %198 = vadd.xlane.f32.xlu0 %v197_v2  ;;  %1668 = vmatpush3.bf16.msra.mxu0 %v1832_v14  ;;  %v1577_v25 = vld [vmem:[#allocation5] ss:$0 sm:$0xff]  ;;  %v1578_v29 = vld [vmem:[#allocation7] ss:$0 sm:$0xff]  ;;  %s2211_s14 = smov 120   ;;  %s2212_s16 = smov 104  }
  0xe0   :  { %1671 = vmatprep.mubr.msk.bf16.mxu0 %vm2209_vm1, %v2208_v15  ;;  %1669 = vmatprep.subr.bf16.mxu0 %v2208_v15  ;;  %s2213_s18 = smov 96   ;;  %vm337_vm2 = vcmask 64512   ;;  %vm821_vm3 = vcmask 1043456   ;;  %s2215_s19 = smov 24   ;;  %vm1221_vm4 = vcmask 130048   ;;  %vm1224_vm5 = vcmask 195584  }
  0xe1   :  { %1689 = vmatprep.mubr.msk.bf16.mxu1 %vm2209_vm1, %v2208_v15  ;;  %s2216_s0 = smov [#allocation22]  }
  0xe2   :  { %s1559_s3 = sshll.u32 %s2216_s0, 4  ;;  %s1560_s3 = int_to_ptr.vmem [resolvable:$true] %s1559_s3 }
  0xe3   :  { %201 = vadd.xlane.f32.xlu0 %v200_v3  ;;  %1670 = vmatpush3.bf16.msra.mxu0 %v1833_v16  ;;  %s2154_s5 = scalar_lea.vmem %s1560_s3, 256  ;;  %p2159_p13 = scmp.lt.s32.totalorder %s1560_s3, %s1560_s3 }
  0xe4   :  { %1675 = vmatprep.subr.bf16.mxu0 %v2208_v15  ;;  %p2155_p12 = scmp.ne.s32.totalorder %s1560_s3, %s2154_s5  ;;  %p2160_p0 = scmp.lt.s32.totalorder %s2154_s5, %s2154_s5 }
  0xe6   :  { %p2161_p1 = por %p2160_p0, %p2159_p13 }
  0xe8   :  { %p2162_p2 = pnand %p2161_p1, %p2155_p12 }
 0x16c   :  { %v199_v4 = vpop.xlane.xlu0 %198 }
 0x16d   :  { %v204_v5 = vmul.f32 0.03125, %v199_v4 }
 0x16f   :  { %v206_v6 = vsub.f32 %v2469_v0, %v204_v5 }
 0x170   :  { %v202_v7 = vpop.xlane.xlu0 %201 }
 0x171   :  { %v205_v8 = vmul.f32 0.03125, %v202_v7  ;;  %v208_v9 = vmul.f32 %v206_v6, %v206_v6 }
 0x173   :  { %v207_v10 = vsub.f32 %v2471_v1, %v205_v8  ;;  %v210_v11 = vsel %vm196_vm0, %v208_v9, 0.0 }
 0x174   :  { %211 = vadd.xlane.f32.xlu1 %v210_v11 }
 0x175   :  { %v209_v12 = vmul.f32 %v207_v10, %v207_v10 }
 0x177   :  { %v213_v13 = vsel %vm196_vm0, %v209_v12, 0.0 }
 0x178   :  { %214 = vadd.xlane.f32.xlu1 %v213_v13 }
 0x201   :  { %v212_v17 = vpop.xlane.xlu1 %211 }
 0x202   :  { %v216_v18 = vmul.f32 0.03125, %v212_v17 }
 0x204   :  { %v218_v19 = vadd.f32 1e-05, %v216_v18 }
 0x205   :  { %v215_v20 = vpop.xlane.xlu1 %214 }
 0x206   :  { %1846 = vrsqrt.f32 %v218_v19  ;;  %v217_v21 = vmul.f32 0.03125, %v215_v20 }
 0x208   :  { %v219_v22 = vadd.f32 1e-05, %v217_v21 }
 0x20a   :  { %1848 = vrsqrt.f32 %v219_v22 }
 0x210   :  { %v1847_v23 = vpop.eup %1846 }
 0x211   :  { %v222_v24 = vmul.f32 %v1847_v23, %v206_v6 }
 0x213   :  { %v230_v28 = vmul.f32 %v1577_v25, %v222_v24 }
 0x214   :  { %v1849_v26 = vpop.eup %1848 }
 0x215   :  { %v223_v27 = vmul.f32 %v1849_v26, %v207_v10  ;;  %v238_v31 = vadd.f32 %v1578_v29, %v230_v28 }
 0x217   :  { %v231_v30 = vmul.f32 %v1577_v25, %v223_v27 }
 0x219   :  { %v239_v32 = vadd.f32 %v1578_v29, %v231_v30 }
 0x21b   :  { %v240_v33 = vpack.c.bf16 %v239_v32, %v238_v31 }
 0x21d   :  { %1672 = vmatmul.mubr.msk.bf16.vlgmr.msra.gmra.mrb[0].mxu0 %vm196_vm0, %v240_v33 }
 0x21e   :  { %1677 = vmatprep.mubr.msk.bf16.mxu0 %vm2209_vm1, %v2208_v15 }
 0x2f0   :  { %v294_v34 = vpop.f32.mrb[0].mxu0 }
 0x2f1   :  { %v2492_v35 = vpack.c.bf16 %v294_v34, %v294_v34  ;;  %v1673_v36 = vpop.f32.mrb[1].mxu0  ;;  %v301_v40 = vmul.f32 0.35355338, %v294_v34 }
 0x2f2   :  { %v297_v37 = vpop.f32.mrb[2].mxu0 }
 0x2f3   :  { %324 = vrot.lane.b32.xlu1 %v2492_v35, %s2210_s11  ;;  %322 = vrot.lane.b32.xlu0 %v2492_v35, %s2211_s14  ;;  %v1674_v38 = vpop.f32.mrb[3].mxu0  ;;  %v2498_v39 = vpack.c.bf16 %v297_v37, %v297_v37  ;;  %v302_v43 = vpack.c.bf16 %v301_v40, %v301_v40  ;;  %v303_v48 = vmul.f32 0.35355338, %v297_v37 }
 0x2f5   :  { %v304_v50 = vpack.c.bf16 %v303_v48, %v303_v48 }
 0x2f7   :  { %326 = vrot.lane.b32.xlu1 %v2492_v35, %s2212_s16  ;;  %331 = vrot.lane.b32.xlu0 %v2498_v39, %s2210_s11 }
 0x2fb   :  { %335 = vrot.lane.b32.xlu0 %v2492_v35, %s2213_s18  ;;  %329 = vrot.lane.b32.xlu1 %v2498_v39, %s2211_s14 }
 0x2ff   :  { %333 = vrot.lane.b32.xlu1 %v2498_v39, %s2212_s16 }
 0x365   :  { %v2510_v41 = vpop.permute.xlu1 %324  ;;  %v2512_v42 = vpop.permute.xlu0 %322 }
 0x366   :  { %432 = vrot.lane.b32.xlu0 %v2510_v41, %s2213_s18  ;;  %384 = vrot.lane.b32.xlu1 %v2512_v42, %s2213_s18 }
 0x369   :  { %v2518_v44 = vpop.permute.xlu1 %326  ;;  %v2520_v45 = vpop.permute.xlu0 %331 }
 0x36a   :  { %480 = vrot.lane.b32.xlu0 %v2518_v44, %s2213_s18  ;;  %306 = vrot.lane.b32.xlu1 %v302_v43, %s2211_s14 }
 0x36d   :  { %v336_v46 = vpop.permute.xlu0 %335  ;;  %v2530_v49 = vpop.permute.xlu1 %329 }
 0x36e   :  { %v342_v47 = vsel %vm337_vm2, %v336_v46, 0  ;;  %528 = vrot.lane.b32.xlu0 %v2498_v39, %s2213_s18  ;;  %308 = vrot.lane.b32.xlu1 %v302_v43, %s2210_s11 }
 0x36f   :  { %1676 = vmatpush3.bf16.xpose.msra.mxu0 %v342_v47 }
 0x370   :  { %1681 = vmatprep.subr.bf16.mxu0 %v2208_v15 }
 0x371   :  { %v2541_v51 = vpop.permute.xlu1 %333 }
 0x372   :  { %310 = vrot.lane.b32.xlu1 %v302_v43, %s2212_s16  ;;  %576 = vrot.lane.b32.xlu0 %v2530_v49, %s2213_s18 }
 0x376   :  { %1678 = vmatmul.mubr.msk.bf16.vlgmr.msra.gmra.mrb[4].mxu0 %vm337_vm2, %v302_v43  ;;  %624 = vrot.lane.b32.xlu1 %v2520_v45, %s2213_s18 }
 0x377   :  { %313 = vrot.lane.b32.xlu0 %v304_v50, %s2211_s14  ;;  %1683 = vmatprep.mubr.msk.bf16.mxu0 %vm2209_vm1, %v2208_v15 }
 0x37a   :  { %672 = vrot.lane.b32.xlu1 %v2541_v51, %s2213_s18 }
 0x37b   :  { %315 = vrot.lane.b32.xlu0 %v304_v50, %s2210_s11 }
 0x37e   :  { %317 = vrot.lane.b32.xlu1 %v304_v50, %s2212_s16 }
 0x3d8   :  { %v433_v52 = vpop.permute.xlu0 %432  ;;  %v385_v53 = vpop.permute.xlu1 %384 }
 0x3d9   :  { %v390_v54 = vsel %vm337_vm2, %v385_v53, 0  ;;  %v438_v55 = vsel %vm337_vm2, %v433_v52, 0 }
 0x3da   :  { %1682 = vmatpush3.bf16.xpose.msra.mxu0 %v390_v54  ;;  %1688 = vmatpush3.bf16.xpose.msra.mxu1 %v438_v55 }
 0x3db   :  { %1693 = vmatprep.subr.bf16.mxu0 %v2208_v15  ;;  %1699 = vmatprep.subr.bf16.mxu1 %v2208_v15 }
 0x3dc   :  { %v481_v56 = vpop.permute.xlu0 %480  ;;  %v307_v57 = vpop.permute.xlu1 %306 }
 0x3dd   :  { %v486_v60 = vsel %vm337_vm2, %v481_v56, 0 }
 0x3e0   :  { %v529_v58 = vpop.permute.xlu0 %528  ;;  %v309_v59 = vpop.permute.xlu1 %308 }
 0x3e1   :  { %v534_v61 = vsel %vm337_vm2, %v529_v58, 0  ;;  %1684 = vmatmul.mubr.msk.bf16.vlgmr.msra.gmra.mrb[8].mxu0 %vm337_vm2, %v307_v57  ;;  %1690 = vmatmul.mubr.msk.bf16.vlgmr.msra.gmra.mrb[0].mxu1 %vm337_vm2, %v309_v59 }
 0x3e2   :  { %1694 = vmatpush3.bf16.xpose.msra.mxu0 %v486_v60  ;;  %1700 = vmatpush3.bf16.xpose.msra.mxu1 %v534_v61 }
 0x3e3   :  { %1695 = vmatprep.mubr.msk.bf16.mxu0 %vm2209_vm1, %v2208_v15  ;;  %1701 = vmatprep.mubr.msk.bf16.mxu1 %vm2209_vm1, %v2208_v15 }
 0x3e4   :  { %v577_v62 = vpop.permute.xlu0 %576  ;;  %v311_v63 = vpop.permute.xlu1 %310  ;;  %1705 = vmatprep.subr.bf16.mxu0 %v2208_v15  ;;  %1711 = vmatprep.subr.bf16.mxu1 %v2208_v15 }
 0x3e5   :  { %v582_v3 = vsel %vm337_vm2, %v577_v62, 0 }
 0x3e8   :  { %v625_v2 = vpop.permute.xlu1 %624 }
 0x3e9   :  { %v630_v4 = vsel %vm337_vm2, %v625_v2, 0  ;;  %1696 = vmatmul.mubr.msk.bf16.vlgmr.msra.gmra.mrb[12].mxu0 %vm337_vm2, %v311_v63  ;;  %1702 = vmatmul.mubr.msk.bf16.vlgmr.msra.gmra.mrb[4].mxu1 %vm337_vm2, %v304_v50  ;;  %v314_v5 = vpop.permute.xlu0 %313 }
 0x3ea   :  { %1706 = vmatpush3.bf16.xpose.msra.mxu0 %v582_v3  ;;  %1712 = vmatpush3.bf16.xpose.msra.mxu1 %v630_v4 }
 0x3eb   :  { %1707 = vmatprep.mubr.msk.bf16.mxu0 %vm2209_vm1, %v2208_v15  ;;  %1713 = vmatprep.mubr.msk.bf16.mxu1 %vm2209_vm1, %v2208_v15 }
 0x3ec   :  { %1717 = vmatprep.subr.bf16.mxu0 %v2208_v15  ;;  %1723 = vmatprep.subr.bf16.mxu1 %v2208_v15  ;;  %v673_v6 = vpop.permute.xlu1 %672 }
 0x3ed   :  { %v316_v7 = vpop.permute.xlu0 %315  ;;  %v678_v8 = vsel %vm337_vm2, %v673_v6, 0 }
 0x3f0   :  { %v318_v9 = vpop.permute.xlu1 %317 }
 0x3f1   :  { %1708 = vmatmul.mubr.msk.bf16.vlgmr.msra.gmra.mrb[16].mxu0 %vm337_vm2, %v314_v5  ;;  %1714 = vmatmul.mubr.msk.bf16.vlgmr.msra.gmra.mrb[8].mxu1 %vm337_vm2, %v316_v7 }
 0x3f2   :  { %1718 = vmatpush3.bf16.xpose.msra.mxu0 %v678_v8  ;;  %1719 = vmatprep.mubr.msk.bf16.mxu0 %vm2209_vm1, %v2208_v15 }
 0x3f3   :  { %1729 = vmatprep.subr.bf16.mxu0 %v2208_v15  ;;  %1725 = vmatprep.mubr.msk.bf16.mxu1 %vm2209_vm1, %v2208_v15 }
 0x3f9   :  { %1720 = vmatmul.mubr.msk.bf16.vlgmr.msra.gmra.mrb[20].mxu0 %vm337_vm2, %v318_v9 }
 0x3fa   :  { %1731 = vmatprep.mubr.msk.bf16.mxu0 %vm2209_vm1, %v2208_v15 }
 0x449   :  { %v378_v10 = vpop.f32.mrb[4].mxu0 }
 0x44a   :  { %v1679_v11 = vpop.f32.mrb[5].mxu0  ;;  %v720_v12 = vsel %vm337_vm2, %v378_v10, -inf }
 0x44b   :  { %721 = vmax.xlane.f32.xlu0 %v720_v12  ;;  %v381_v13 = vpop.f32.mrb[6].mxu0 }
 0x44c   :  { %v1680_v14 = vpop.f32.mrb[7].mxu0 }
 0x4b4   :  { %v426_v16 = vpop.f32.mrb[8].mxu0  ;;  %v474_v17 = vpop.f32.mrb[0].mxu1 }
 0x4b5   :  { %v1685_v18 = vpop.f32.mrb[9].mxu0  ;;  %v1691_v19 = vpop.f32.mrb[1].mxu1  ;;  %v726_v20 = vsel %vm337_vm2, %v474_v17, -inf  ;;  %v723_v21 = vsel %vm337_vm2, %v426_v16, -inf }
 0x4b6   :  { %v477_v22 = vpop.f32.mrb[2].mxu1  ;;  %727 = vmax.xlane.f32.xlu0 %v726_v20  ;;  %724 = vmax.xlane.f32.xlu1 %v723_v21  ;;  %v429_v23 = vpop.f32.mrb[10].mxu0 }
 0x4b7   :  { %v1686_v24 = vpop.f32.mrb[11].mxu0  ;;  %v1692_v25 = vpop.f32.mrb[3].mxu1 }
 0x4bc   :  { %v2585_v26 = vpop.f32.mrb[12].mxu0  ;;  %v2587_v27 = vpop.f32.mrb[4].mxu1 }
 0x4bd   :  { %v1697_v28 = vpop.f32.mrb[13].mxu0  ;;  %v1703_v29 = vpop.f32.mrb[5].mxu1  ;;  %v729_v30 = vsel %vm337_vm2, %v2585_v26, -inf  ;;  %v732_v36 = vsel %vm337_vm2, %v2587_v27, -inf }
 0x4be   :  { %v573_v31 = vpop.f32.mrb[6].mxu1  ;;  %730 = vmax.xlane.f32.xlu0 %v729_v30  ;;  %v525_v32 = vpop.f32.mrb[14].mxu0 }
 0x4bf   :  { %v1698_v33 = vpop.f32.mrb[15].mxu0  ;;  %v1704_v34 = vpop.f32.mrb[7].mxu1 }
 0x4c2   :  { %733 = vmax.xlane.f32.xlu0 %v732_v36 }
 0x4c4   :  { %v2593_v37 = vpop.f32.mrb[16].mxu0  ;;  %v2595_v38 = vpop.f32.mrb[8].mxu1 }
 0x4c5   :  { %v1709_v40 = vpop.f32.mrb[17].mxu0  ;;  %v1715_v43 = vpop.f32.mrb[9].mxu1  ;;  %v738_v46 = vsel %vm337_vm2, %v2595_v38, -inf  ;;  %v735_v47 = vsel %vm337_vm2, %v2593_v37, -inf }
 0x4c6   :  { %v669_v48 = vpop.f32.mrb[10].mxu1  ;;  %739 = vmax.xlane.f32.xlu0 %v738_v46  ;;  %736 = vmax.xlane.f32.xlu1 %v735_v47  ;;  %v621_v50 = vpop.f32.mrb[18].mxu0 }
 0x4c7   :  { %v1710_v52 = vpop.f32.mrb[19].mxu0  ;;  %v1716_v53 = vpop.f32.mrb[11].mxu1 }
 0x4cc   :  { %v2601_v54 = vpop.f32.mrb[20].mxu0 }
 0x4cd   :  { %v1721_v55 = vpop.f32.mrb[21].mxu0  ;;  %v741_v63 = vsel %vm337_vm2, %v2601_v54, -inf }
 0x4ce   :  { %v717_v56 = vpop.f32.mrb[22].mxu0 }
 0x4cf   :  { %v1722_v57 = vpop.f32.mrb[23].mxu0 }
 0x4d7   :  { %865 = vrot.lane.b32.xlu1 %v2512_v42, %s2194_s1 }
 0x4d8   :  { %v722_v58 = vpop.xlane.xlu0 %721 }
 0x4d9   :  { %v744_v59 = vsub.f32 %v378_v10, %v722_v58 }
 0x4db   :  { %913 = vrot.lane.b32.xlu1 %v2510_v41, %s2194_s1  ;;  %v752_v60 = vmul.f32 1.442695, %v744_v59 }
 0x4dc   :  { %816 = vrot.lane.b32.xlu0 %v2492_v35, %s2194_s1 }
 0x4dd   :  { %1850 = vpow2.f32 %v752_v60 }
 0x4e7   :  { %v2609_v61 = vpop.eup %1850 }
 0x4e8   :  { %v768_v62 = vsel %vm337_vm2, %v2609_v61, 0.0 }
 0x4fb   :  { %769 = vadd.xlane.f32.xlu0 %v768_v62 }
 0x4ff   :  { %742 = vmax.xlane.f32.xlu1 %v741_v63 }
 0x510   :  { %961 = vrot.lane.b32.xlu1 %v2518_v44, %s2194_s1 }
 0x543   :  { %v728_v41 = vpop.xlane.xlu0 %727  ;;  %v725_v42 = vpop.xlane.xlu1 %724 }
 0x544   :  { %v746_v35 = vsub.f32 %v474_v17, %v728_v41  ;;  %v745_v2 = vsub.f32 %v426_v16, %v725_v42 }
 0x546   :  { %v756_v3 = vmul.f32 1.442695, %v746_v35  ;;  %v754_v4 = vmul.f32 1.442695, %v745_v2 }
 0x548   :  { %1852 = vpow2.f32 %v756_v3 }
 0x549   :  { %1854 = vpow2.f32 %v754_v4 }
 0x54b   :  { %v731_v5 = vpop.xlane.xlu0 %730 }
 0x54c   :  { %v747_v18 = vsub.f32 %v2585_v26, %v731_v5 }
 0x54e   :  { %v758_v21 = vmul.f32 1.442695, %v747_v18 }
 0x54f   :  { %v734_v6 = vpop.xlane.xlu0 %733 }
 0x550   :  { %v748_v17 = vsub.f32 %v2587_v27, %v734_v6 }
 0x552   :  { %v2617_v7 = vpop.eup %1852  ;;  %v760_v19 = vmul.f32 1.442695, %v748_v17 }
 0x553   :  { %v2619_v8 = vpop.eup %1854  ;;  %v740_v9 = vpop.xlane.xlu0 %739  ;;  %v774_v11 = vsel %vm337_vm2, %v2617_v7, 0.0 }
 0x554   :  { %v737_v10 = vpop.xlane.xlu1 %736  ;;  %775 = vadd.xlane.f32.xlu0 %v774_v11  ;;  %v771_v44 = vsel %vm337_vm2, %v2619_v8, 0.0  ;;  %v750_v20 = vsub.f32 %v2595_v38, %v740_v9  ;;  %1856 = vpow2.f32 %v760_v19 }
 0x555   :  { %772 = vadd.xlane.f32.xlu1 %v771_v44  ;;  %v749_v22 = vsub.f32 %v2593_v37, %v737_v10  ;;  %1858 = vpow2.f32 %v758_v21 }
 0x556   :  { %v764_v23 = vmul.f32 1.442695, %v750_v20 }
 0x557   :  { %v817_v12 = vpop.permute.xlu0 %816  ;;  %v762_v24 = vmul.f32 1.442695, %v749_v22 }
 0x558   :  { %v866_v13 = vpop.permute.xlu1 %865  ;;  %v823_v14 = vsel %vm821_vm3, %v817_v12, 0  ;;  %1860 = vpow2.f32 %v764_v23 }
 0x559   :  { %v871_v16 = vsel %vm821_vm3, %v866_v13, 0  ;;  %1724 = vmatpush3.bf16.msra.mxu1 %v823_v14  ;;  %1862 = vpow2.f32 %v762_v24 }
 0x55a   :  { %1730 = vmatpush3.bf16.msra.mxu0 %v871_v16  ;;  %1735 = vmatprep.subr.bf16.mxu1 %v2208_v15 }
 0x55b   :  { %1741 = vmatprep.subr.bf16.mxu0 %v2208_v15 }
 0x566   :  { %1057 = vrot.lane.b32.xlu1 %v2530_v49, %s2194_s1  ;;  %v2637_v49 = vpop.eup %1856 }
 0x567   :  { %v2639_v25 = vpop.eup %1858  ;;  %v780_v26 = vsel %vm337_vm2, %v2637_v49, 0.0 }
 0x568   :  { %v2643_v28 = vpop.eup %1860  ;;  %v777_v29 = vsel %vm337_vm2, %v2639_v25, 0.0 }
 0x569   :  { %v2647_v30 = vpop.eup %1862  ;;  %v786_v32 = vsel %vm337_vm2, %v2643_v28, 0.0 }
 0x56a   :  { %1009 = vrot.lane.b32.xlu0 %v2498_v39, %s2194_s1  ;;  %v914_v39 = vpop.permute.xlu1 %913  ;;  %v783_v34 = vsel %vm337_vm2, %v2647_v30, 0.0 }
 0x56b   :  { %v919_v43 = vsel %vm821_vm3, %v914_v39, 0 }
 0x588   :  { %v770_v27 = vpop.xlane.xlu0 %769 }
 0x589   :  { %1864 = vrcp.f32 %v770_v27  ;;  %781 = vadd.xlane.f32.xlu0 %v780_v26 }
 0x58a   :  { %778 = vadd.xlane.f32.xlu1 %v777_v29 }
 0x58c   :  { %v743_v31 = vpop.xlane.xlu1 %742 }
 0x58d   :  { %v751_v33 = vsub.f32 %v2601_v54, %v743_v31  ;;  %787 = vadd.xlane.f32.xlu0 %v786_v32 }
 0x58e   :  { %784 = vadd.xlane.f32.xlu1 %v783_v34 }
 0x58f   :  { %v766_v36 = vmul.f32 1.442695, %v751_v33 }
 0x590   :  { %v962_v48 = vpop.permute.xlu1 %961 }
 0x591   :  { %1866 = vpow2.f32 %v766_v36 }
 0x593   :  { %v1865_v37 = vpop.eup %1864 }
 0x594   :  { %v800_v38 = vmul.f32 %v1865_v37, %v2609_v61 }
 0x596   :  { %v808_v40 = vpack.c.bf16 %v800_v38, %v800_v38 }
 0x598   :  { %1726 = vmatmul.mubr.msk.bf16.vlgmr.msra.gmra.mrb[12].mxu1 %vm337_vm2, %v808_v40 }
 0x599   :  { %1736 = vmatpush3.bf16.msra.mxu1 %v919_v43  ;;  %1737 = vmatprep.mubr.msk.bf16.mxu1 %vm2209_vm1, %v2208_v15  ;;  %v1834_v43 = vld [vmem:[#allocation10] sm:$0xff]  }
 0x59a   :  { %1747 = vmatprep.subr.bf16.mxu1 %v2208_v15 }
 0x59b   :  { %v2660_v46 = vpop.eup %1866 }
 0x59c   :  { %v789_v47 = vsel %vm337_vm2, %v2660_v46, 0.0 }
 0x59d   :  { %790 = vadd.xlane.f32.xlu1 %v789_v47 }
 0x5a3   :  { %1105 = vrot.lane.b32.xlu0 %v2520_v45, %s2194_s1  ;;  %v967_v45 = vsel %vm821_vm3, %v962_v48, 0 }
 0x5ae   :  { %1153 = vrot.lane.b32.xlu1 %v2541_v51, %s2194_s1  ;;  %s2214_s1 = smov 16  }
 0x5e1   :  { %v776_v50 = vpop.xlane.xlu0 %775 }
 0x5e2   :  { %1868 = vrcp.f32 %v776_v50  ;;  %v773_v52 = vpop.xlane.xlu1 %772 }
 0x5e3   :  { %1870 = vrcp.f32 %v773_v52 }
 0x5e5   :  { %v1010_v57 = vpop.permute.xlu0 %1009 }
 0x5e6   :  { %v1015_v60 = vsel %vm821_vm3, %v1010_v57, 0  ;;  %v1058_v51 = vpop.permute.xlu1 %1057 }
 0x5e7   :  { %v1063_v10 = vsel %vm821_vm3, %v1058_v51, 0 }
 0x5ec   :  { %v1869_v53 = vpop.eup %1868 }
 0x5ed   :  { %v1871_v54 = vpop.eup %1870  ;;  %v802_v55 = vmul.f32 %v1869_v53, %v2617_v7 }
 0x5ee   :  { %v801_v56 = vmul.f32 %v1871_v54, %v2619_v8 }
 0x5ef   :  { %v810_v58 = vpack.c.bf16 %v802_v55, %v802_v55 }
 0x5f0   :  { %v809_v59 = vpack.c.bf16 %v801_v56, %v801_v56 }
 0x5f1   :  { %1738 = vmatmul.mubr.msk.bf16.vlgmr.msra.gmra.mrb[16].mxu1 %vm337_vm2, %v810_v58  ;;  %v1835_v58 = vld [vmem:[#allocation10 + $0x8] sm:$0xff]  }
 0x5f2   :  { %1732 = vmatmul.mubr.msk.bf16.vlgmr.msra.gmra.mrb[24].mxu0 %vm337_vm2, %v809_v59  ;;  %1748 = vmatpush3.bf16.msra.mxu1 %v1015_v60 }
 0x5f3   :  { %1742 = vmatpush3.bf16.msra.mxu0 %v967_v45  ;;  %1743 = vmatprep.mubr.msk.bf16.mxu0 %vm2209_vm1, %v2208_v15 }
 0x5f4   :  { %1749 = vmatprep.mubr.msk.bf16.mxu1 %vm2209_vm1, %v2208_v15  ;;  %1753 = vmatprep.subr.bf16.mxu0 %v2208_v15 }
 0x5f5   :  { %1759 = vmatprep.subr.bf16.mxu1 %v2208_v15 }
 0x616   :  { %v782_v61 = vpop.xlane.xlu0 %781 }
 0x617   :  { %1872 = vrcp.f32 %v782_v61  ;;  %v779_v62 = vpop.xlane.xlu1 %778 }
 0x618   :  { %1874 = vrcp.f32 %v779_v62 }
 0x61a   :  { %v788_v63 = vpop.xlane.xlu0 %787 }
 0x61b   :  { %1876 = vrcp.f32 %v788_v63  ;;  %v785_v41 = vpop.xlane.xlu1 %784 }
 0x61c   :  { %1878 = vrcp.f32 %v785_v41 }
 0x61e   :  { %v1106_v4 = vpop.permute.xlu0 %1105 }
 0x61f   :  { %v1111_v9 = vsel %vm821_vm3, %v1106_v4, 0 }
 0x621   :  { %v1873_v42 = vpop.eup %1872 }
 0x622   :  { %v1875_v35 = vpop.eup %1874  ;;  %v804_v2 = vmul.f32 %v1873_v42, %v2637_v49 }
 0x623   :  { %v803_v3 = vmul.f32 %v1875_v35, %v2639_v25 }
 0x624   :  { %v812_v5 = vpack.c.bf16 %v804_v2, %v804_v2 }
 0x625   :  { %v1877_v6 = vpop.eup %1876  ;;  %v811_v7 = vpack.c.bf16 %v803_v3, %v803_v3 }
 0x626   :  { %v1879_v8 = vpop.eup %1878  ;;  %1750 = vmatmul.mubr.msk.bf16.vlgmr.msra.gmra.mrb[20].mxu1 %vm337_vm2, %v812_v5  ;;  %v806_v11 = vmul.f32 %v1877_v6, %v2643_v28 }
 0x627   :  { %1744 = vmatmul.mubr.msk.bf16.vlgmr.msra.gmra.mrb[28].mxu0 %vm337_vm2, %v811_v7  ;;  %1760 = vmatpush3.bf16.msra.mxu1 %v1111_v9  ;;  %v805_v44 = vmul.f32 %v1879_v8, %v2647_v30 }
 0x628   :  { %1754 = vmatpush3.bf16.msra.mxu0 %v1063_v10  ;;  %1755 = vmatprep.mubr.msk.bf16.mxu0 %vm2209_vm1, %v2208_v15  ;;  %v814_v13 = vpack.c.bf16 %v806_v11, %v806_v11 }
 0x629   :  { %1761 = vmatprep.mubr.msk.bf16.mxu1 %vm2209_vm1, %v2208_v15  ;;  %1765 = vmatprep.subr.bf16.mxu0 %v2208_v15  ;;  %v813_v14 = vpack.c.bf16 %v805_v44, %v805_v44 }
 0x62a   :  { %v791_v12 = vpop.xlane.xlu1 %790  ;;  %1771 = vmatprep.subr.bf16.mxu1 %v2208_v15 }
 0x62b   :  { %1880 = vrcp.f32 %v791_v12 }
 0x62e   :  { %1762 = vmatmul.mubr.msk.bf16.vlgmr.msra.gmra.mrb[24].mxu1 %vm337_vm2, %v814_v13  ;;  %v1154_v16 = vpop.permute.xlu1 %1153 }
 0x62f   :  { %1756 = vmatmul.mubr.msk.bf16.vlgmr.msra.gmra.mrb[32].mxu0 %vm337_vm2, %v813_v14  ;;  %v1159_v17 = vsel %vm821_vm3, %v1154_v16, 0  ;;  %1775 = vmatprep.mubr.msk.bf16.mxu1 %vm2209_vm1, %v2208_v15  ;;  %v1598_v16 = vld [vmem:[#allocation11] ss:$0 sm:$0xff] }
 0x630   :  { %1766 = vmatpush3.bf16.msra.mxu0 %v1159_v17  ;;  %1767 = vmatprep.mubr.msk.bf16.mxu0 %vm2209_vm1, %v2208_v15 }
 0x631   :  { %1779 = vmatprep.subr.bf16.mxu0 %v2208_v15  ;;  %1772 = vmatpush3.bf16.msra.mxu1 %v1834_v43 }
 0x632   :  { %1773 = vmatprep.subr.bf16.mxu1 %v2208_v15 }
 0x635   :  { %v1881_v18 = vpop.eup %1880  ;;  %1774 = vmatpush3.bf16.msra.mxu1 %v1835_v58 }
 0x636   :  { %v807_v19 = vmul.f32 %v1881_v18, %v2660_v46  ;;  %1787 = vmatprep.subr.bf16.mxu1 %v2208_v15 }
 0x638   :  { %v815_v20 = vpack.c.bf16 %v807_v19, %v807_v19 }
 0x63a   :  { %1768 = vmatmul.mubr.msk.bf16.vlgmr.msra.gmra.mrb[36].mxu0 %vm337_vm2, %v815_v20 }
 0x63b   :  { %1783 = vmatprep.mubr.msk.bf16.mxu0 %vm2209_vm1, %v2208_v15 }
 0x66b   :  { %v2706_v21 = vpop.f32.mrb[12].mxu1 }
 0x66c   :  { %v1727_v22 = vpop.f32.mrb[13].mxu1  ;;  %v1201_v7 = vpack.c.bf16 %v2706_v21, %v2706_v21 }
 0x66d   :  { %v862_v23 = vpop.f32.mrb[14].mxu1 }
 0x66e   :  { %v1728_v24 = vpop.f32.mrb[15].mxu1 }
 0x6c4   :  { %v955_v49 = vpop.f32.mrb[16].mxu1 }
 0x6c5   :  { %v907_v25 = vpop.f32.mrb[24].mxu0  ;;  %v1739_v39 = vpop.f32.mrb[17].mxu1  ;;  %v1203_v60 = vpack.c.bf16 %v955_v49, %v955_v49 }
 0x6c6   :  { %v1202_v27 = vpack.c.bf16 %v907_v25, %v907_v25  ;;  %v1733_v26 = vpop.f32.mrb[25].mxu0  ;;  %v958_v28 = vpop.f32.mrb[18].mxu1 }
 0x6c7   :  { %v910_v29 = vpop.f32.mrb[26].mxu0  ;;  %v1740_v30 = vpop.f32.mrb[19].mxu1 }
 0x6c8   :  { %1210 = vrot.lane.b32.xlu0 %v1202_v27, %s2201_s21  ;;  %v1734_v31 = vpop.f32.mrb[27].mxu0 }
 0x6f9   :  { %v1051_v32 = vpop.f32.mrb[20].mxu1 }
 0x6fa   :  { %v1003_v33 = vpop.f32.mrb[28].mxu0  ;;  %v1751_v34 = vpop.f32.mrb[21].mxu1  ;;  %v1205_v2 = vpack.c.bf16 %v1051_v32, %v1051_v32 }
 0x6fb   :  { %v1745_v36 = vpop.f32.mrb[29].mxu0  ;;  %v1054_v37 = vpop.f32.mrb[22].mxu1  ;;  %v1204_v41 = vpack.c.bf16 %v1003_v33, %v1003_v33  ;;  %v1836_v33 = vld [vmem:[#allocation16] sm:$0xff]   ;;  %v1837_v34 = vld [vmem:[#allocation16 + $0x8] sm:$0xff]  }
 0x6fc   :  { %v1006_v38 = vpop.f32.mrb[30].mxu0  ;;  %v1752_v40 = vpop.f32.mrb[23].mxu1  ;;  %1780 = vmatpush3.bf16.msra.mxu0 %v1836_v33  ;;  %v1838_v36 = vld [vmem:[#allocation19] sm:$0xff]   ;;  %v1839_v37 = vld [vmem:[#allocation19 + $0x8] sm:$0xff]  }
 0x6fd   :  { %v1746_v46 = vpop.f32.mrb[31].mxu0  ;;  %1781 = vmatprep.subr.bf16.mxu0 %v2208_v15 }
 0x700   :  { %1782 = vmatpush3.bf16.msra.mxu0 %v1837_v34 }
 0x701   :  { %v1147_v47 = vpop.f32.mrb[24].mxu1 }
 0x702   :  { %v1099_v48 = vpop.f32.mrb[32].mxu0  ;;  %v1207_v50 = vpack.c.bf16 %v1147_v47, %v1147_v47  ;;  %v1763_v52 = vpop.f32.mrb[25].mxu1 }
 0x703   :  { %v1206_v53 = vpack.c.bf16 %v1099_v48, %v1099_v48  ;;  %v1757_v54 = vpop.f32.mrb[33].mxu0  ;;  %v1150_v55 = vpop.f32.mrb[26].mxu1 }
 0x704   :  { %v1102_v56 = vpop.f32.mrb[34].mxu0  ;;  %v1764_v57 = vpop.f32.mrb[27].mxu1  ;;  %1231 = vrot.lane.b32.xlu1 %v1207_v50, %s2214_s1 }
 0x705   :  { %1228 = vrot.lane.b32.xlu0 %v1206_v53, %s2201_s21  ;;  %v1758_v59 = vpop.f32.mrb[35].mxu0  ;;  %v1602_v53 = vld [vmem:[#allocation13] ss:$0 sm:$0xff]  ;;  %v1603_v57 = vld [vmem:[#allocation14] ss:$0 sm:$0xff] }
 0x709   :  { %1213 = vrot.lane.b32.xlu0 %v1203_v60, %s2214_s1 }
 0x70d   :  { %v1195_v45 = vpop.f32.mrb[36].mxu0 }
 0x70e   :  { %v1208_v51 = vpack.c.bf16 %v1195_v45, %v1195_v45  ;;  %v1769_v61 = vpop.f32.mrb[37].mxu0 }
 0x70f   :  { %v1198_v62 = vpop.f32.mrb[38].mxu0  ;;  %v1841_v61 = vld [vmem:[#allocation19 + $0x18] sm:$0xff]  }
 0x710   :  { %1234 = vrot.lane.b32.xlu1 %v1208_v51, %s2215_s19  ;;  %v1770_v63 = vpop.f32.mrb[39].mxu0  ;;  %v1840_v51 = vld [vmem:[#allocation19 + $0x10] sm:$0xff]   ;;  %v1842_v62 = vld [vmem:[#allocation19 + $0x20] sm:$0xff]  }
 0x711   :  { %v1843_v63 = vld [vmem:[#allocation19 + $0x28] sm:$0xff]  }
 0x714   :  { %1216 = vrot.lane.b32.xlu1 %v1204_v41, %s2215_s19  ;;  %v1844_v41 = vld [vmem:[#allocation19 + $0x30] sm:$0xff]  }
 0x73a   :  { %v1211_v42 = vpop.permute.xlu0 %1210 }
 0x73b   :  { %v1220_v10 = vsel %vm337_vm2, %v1201_v7, %v1211_v42  ;;  %v1845_v42 = vld [vmem:[#allocation19 + $0x38] sm:$0xff]  }
 0x776   :  { %v1232_v3 = vpop.permute.xlu1 %1231 }
 0x777   :  { %v1229_v35 = vpop.permute.xlu0 %1228 }
 0x778   :  { %v1238_v4 = vsel %vm337_vm2, %v1205_v2, %v1229_v35  ;;  %v1604_v35 = vld [vmem:[#allocation17] ss:$0 sm:$0xff] }
 0x779   :  { %v1240_v5 = vsel %vm1221_vm4, %v1238_v4, %v1232_v3 }
 0x77b   :  { %v1214_v8 = vpop.permute.xlu0 %1213 }
 0x77c   :  { %v1223_v11 = vsel %vm1221_vm4, %v1220_v10, %v1214_v8 }
 0x782   :  { %v1235_v6 = vpop.permute.xlu1 %1234 }
 0x783   :  { %v1242_v9 = vsel %vm1224_vm5, %v1240_v5, %v1235_v6 }
 0x784   :  { %v1244_v44 = vrot.slane %v1242_v9, 4 }
 0x786   :  { %v1217_v12 = vpop.permute.xlu1 %1216 }
 0x787   :  { %v1226_v13 = vsel %vm1224_vm5, %v1223_v11, %v1217_v12 }
 0x788   :  { %v1246_v14 = vsel %vm821_vm3, %v1226_v13, %v1244_v44 }
 0x789   :  { %1776 = vmatmul.mubr.msk.bf16.vlgmr.msra.gmra.mrb[28].mxu1 %vm196_vm0, %v1246_v14 }
 0x78a   :  { %1803 = vmatprep.mubr.msk.bf16.mxu1 %vm2209_vm1, %v2208_v15  ;;  %1788 = vmatpush3.bf16.msra.mxu1 %v1838_v36 }
 0x78b   :  { %1789 = vmatprep.subr.bf16.mxu1 %v2208_v15 }
 0x78e   :  { %1790 = vmatpush3.bf16.msra.mxu1 %v1839_v37 }
 0x78f   :  { %1791 = vmatprep.subr.bf16.mxu1 %v2208_v15 }
 0x792   :  { %1792 = vmatpush3.bf16.msra.mxu1 %v1840_v51 }
 0x793   :  { %1793 = vmatprep.subr.bf16.mxu1 %v2208_v15 }
 0x796   :  { %1794 = vmatpush3.bf16.msra.mxu1 %v1841_v61 }
 0x797   :  { %1795 = vmatprep.subr.bf16.mxu1 %v2208_v15 }
 0x79a   :  { %1796 = vmatpush3.bf16.msra.mxu1 %v1842_v62 }
 0x79b   :  { %1797 = vmatprep.subr.bf16.mxu1 %v2208_v15 }
 0x79e   :  { %1798 = vmatpush3.bf16.msra.mxu1 %v1843_v63 }
 0x79f   :  { %1799 = vmatprep.subr.bf16.mxu1 %v2208_v15 }
 0x7a2   :  { %1800 = vmatpush3.bf16.msra.mxu1 %v1844_v41 }
 0x7a3   :  { %1801 = vmatprep.subr.bf16.mxu1 %v2208_v15 }
 0x7a6   :  { %1802 = vmatpush3.bf16.msra.mxu1 %v1845_v42 }
 0x85c   :  { %v1306_v17 = vpop.f32.mrb[28].mxu1 }
 0x85d   :  { %v1307_v18 = vadd.f32 %v1598_v16, %v1306_v17  ;;  %v1777_v19 = vpop.f32.mrb[29].mxu1 }
 0x85e   :  { %v1309_v20 = vpop.f32.mrb[30].mxu1 }
 0x85f   :  { %v2721_v21 = vadd.f32 %v1307_v18, %v2469_v0  ;;  %v1310_v22 = vadd.f32 %v1598_v16, %v1309_v20  ;;  %v1778_v23 = vpop.f32.mrb[31].mxu1  ;;  %v1608_v18 = vld [vmem:[#allocation20] ss:$0 sm:$0xff] }
 0x861   :  { %v2724_v24 = vadd.f32 %v1310_v22, %v2471_v1  ;;  %v1317_v49 = vsel %vm196_vm0, %v2721_v21, 0.0 }
 0x862   :  { %1318 = vadd.xlane.f32.xlu0 %v1317_v49 }
 0x863   :  { %v1320_v25 = vsel %vm196_vm0, %v2724_v24, 0.0 }
 0x864   :  { %1321 = vadd.xlane.f32.xlu1 %v1320_v25 }
 0x8ef   :  { %v1319_v39 = vpop.xlane.xlu0 %1318 }
 0x8f0   :  { %v1323_v27 = vmul.f32 0.03125, %v1319_v39 }
 0x8f1   :  { %v1322_v26 = vpop.xlane.xlu1 %1321 }
 0x8f2   :  { %v1325_v28 = vsub.f32 %v2721_v21, %v1323_v27  ;;  %v1324_v0 = vmul.f32 0.03125, %v1322_v26 }
 0x8f4   :  { %v1326_v29 = vsub.f32 %v2724_v24, %v1324_v0  ;;  %v1327_v30 = vmul.f32 %v1325_v28, %v1325_v28 }
 0x8f6   :  { %v1329_v1 = vsel %vm196_vm0, %v1327_v30, 0.0  ;;  %v1328_v31 = vmul.f32 %v1326_v29, %v1326_v29 }
 0x8f7   :  { %1330 = vadd.xlane.f32.xlu0 %v1329_v1 }
 0x8f8   :  { %v1332_v32 = vsel %vm196_vm0, %v1328_v31, 0.0 }
 0x8fb   :  { %1333 = vadd.xlane.f32.xlu0 %v1332_v32 }
 0x984   :  { %v1331_v38 = vpop.xlane.xlu0 %1330 }
 0x985   :  { %v1335_v40 = vmul.f32 0.03125, %v1331_v38 }
 0x987   :  { %v1337_v43 = vadd.f32 1e-05, %v1335_v40 }
 0x988   :  { %v1334_v46 = vpop.xlane.xlu0 %1333 }
 0x989   :  { %1882 = vrsqrt.f32 %v1337_v43  ;;  %v1336_v47 = vmul.f32 0.03125, %v1334_v46 }
 0x98b   :  { %v1338_v48 = vadd.f32 1e-05, %v1336_v47 }
 0x98d   :  { %1884 = vrsqrt.f32 %v1338_v48 }
 0x993   :  { %v1883_v50 = vpop.eup %1882 }
 0x994   :  { %v1341_v52 = vmul.f32 %v1883_v50, %v1325_v28 }
 0x996   :  { %v1349_v55 = vmul.f32 %v1602_v53, %v1341_v52 }
 0x997   :  { %v1885_v54 = vpop.eup %1884 }
 0x998   :  { %v1342_v56 = vmul.f32 %v1885_v54, %v1326_v29  ;;  %v1357_v59 = vadd.f32 %v1603_v57, %v1349_v55 }
 0x99a   :  { %v1350_v58 = vmul.f32 %v1602_v53, %v1342_v56 }
 0x99c   :  { %v1358_v60 = vadd.f32 %v1603_v57, %v1350_v58 }
 0x99e   :  { %v1359_v45 = vpack.c.bf16 %v1358_v60, %v1357_v59 }
 0x9a0   :  { %1784 = vmatmul.mubr.msk.bf16.vlgmr.msra.gmra.mrb[40].mxu0 %vm196_vm0, %v1359_v45 }
 0xa73   :  { %v1420_v2 = vpop.f32.mrb[40].mxu0 }
 0xa74   :  { %v1421_v3 = vadd.f32 %v1604_v35, %v1420_v2  ;;  %v1785_v4 = vpop.f32.mrb[41].mxu0 }
 0xa75   :  { %v1423_v5 = vpop.f32.mrb[42].mxu0 }
 0xa76   :  { %v1429_v6 = vmul.f32 0.70710677, %v1421_v3  ;;  %v1424_v7 = vadd.f32 %v1604_v35, %v1423_v5  ;;  %v1786_v8 = vpop.f32.mrb[43].mxu0  ;;  %v1427_v12 = vmul.f32 0.5, %v1421_v3 }
 0xa78   :  { %1886 = verf.f32 %v1429_v6  ;;  %v1430_v9 = vmul.f32 0.70710677, %v1424_v7  ;;  %v1428_v13 = vmul.f32 0.5, %v1424_v7 }
 0xa7a   :  { %1888 = verf.f32 %v1430_v9 }
 0xa82   :  { %v1887_v10 = vpop.eup %1886 }
 0xa83   :  { %v1433_v11 = vadd.f32 1.0, %v1887_v10 }
 0xa84   :  { %v1889_v44 = vpop.eup %1888 }
 0xa85   :  { %v1434_v14 = vadd.f32 1.0, %v1889_v44  ;;  %v1435_v15 = vmul.f32 %v1433_v11, %v1427_v12 }
 0xa87   :  { %v1436_v16 = vmul.f32 %v1434_v14, %v1428_v13 }
 0xa89   :  { %v1437_v17 = vpack.c.bf16 %v1436_v16, %v1435_v15 }
 0xa8b   :  { %1804 = vmatmul.mubr.bf16.vlgmr.msra.gmra.mrb[32].mxu1 %v1437_v17 }
 0xb5e   :  { %v1543_v19 = vpop.f32.mrb[32].mxu1 }
 0xb5f   :  { %v1544_v20 = vadd.f32 %v1608_v18, %v1543_v19  ;;  %v1805_v22 = vpop.f32.mrb[33].mxu1 }
 0xb60   :  { %v1546_v23 = vpop.f32.mrb[34].mxu1 }
 0xb61   :  { %v1550_v49 = vadd.f32 %v1544_v20, %v2721_v21  ;;  %v1547_v25 = vadd.f32 %v1608_v18, %v1546_v23  ;;  %v1806_v39 = vpop.f32.mrb[35].mxu1 }
 0xb63   :  { %1552 = vst.msk [vmem:[#allocation22] sm:$0xff] %vm196_vm0, %v1550_v49  ;;  %v1551_v27 = vadd.f32 %v1547_v25, %v2724_v24 }
 0xb65   :  { %1553 = vst.msk [vmem:[#allocation22 + $0x8] sm:$0xff] %vm196_vm0, %v1551_v27 }
 0xb66   :  { %2165 = shalt.err (!%p2162_p2)
}
 0xb67   :  { %s2166_s4 = scalar_lea.hbm %s2774_s12, 256 }
 0xb68   :  { %p2167_p3 = scmp.ne.s32.totalorder %s2774_s12, %s2166_s4  ;;  %p2170_p4 = scmp.lt.u32.totalorder %s2166_s4, %s2774_s12 }
 0xb6a   :  { %p2172_p5 = pnand %p2170_p4, %p2167_p3 }
 0xb6c   :  { %2175 = shalt.err (!%p2172_p5)
}
 0xb6d   :  { %1565 = dma.vmem_to_hbm [thread:$0]  %s1560_s3, 256, %s2774_s12, [#allocation4], %s2200_s9, %s2200_s9, %s2201_s21  }
 0xb6e   :  { %2190 = dma.done.wait [#allocation4], 256  }
 0xb6f   :  { %2191 = vsyncadd [#allocation4], 4294967040 }
 0xb70   :  { %1569 = vsyncpa [#allocation3], 1 }
 0xb71   :  { %1570 = vsyncpa [#allocation6], 1 }
 0xb72   :  { %1571 = vsyncpa [#allocation9], 1 }
 0xb73   :  { %1572 = vsyncpa [#allocation12], 1 }
 0xb74   :  { %1573 = vsyncpa [#allocation15], 1 }
 0xb75   :  { %1574 = vsyncpa [#allocation18], 1 }
 0xb76   :  { %1575 = vsyncpa [#allocation21], 1 }
 0xb77   :  { %1576 = vsyncpa [#allocation4], 1 }

// kernel: tpu_custom_call.1
= control target key start
LH: loop header
LB: loop body
LE: loop exit
PB: predicated region body
PF: predicated region fallthrough
CT: control target
= control target key end

     0   :  { %17 = vsyncpa [#allocation3], 0  ;;  %s2762_s0 = inlined_call_operand.hbm [shape: f32[2,8,32], index: 0, kind: input, shape index: {}]   ;;  %s2763_s1 = inlined_call_operand.hbm [shape: f32[1,32], index: 1, kind: input, shape index: {}]   ;;  %s2764_s2 = inlined_call_operand.hbm [shape: f32[1,32], index: 2, kind: input, shape index: {}]   ;;  %s2765_s3 = inlined_call_operand.hbm [shape: bf16[32,96], index: 3, kind: input, shape index: {}]   ;;  %s2766_s4 = inlined_call_operand.hbm [shape: bf16[32,32], index: 4, kind: input, shape index: {}]   ;;  %s2767_s5 = inlined_call_operand.hbm [shape: f32[1,32], index: 5, kind: input, shape index: {}]   ;;  %s2768_s6 = inlined_call_operand.hbm [shape: f32[1,32], index: 6, kind: input, shape index: {}]   ;;  %s2769_s7 = inlined_call_operand.hbm [shape: f32[1,32], index: 7, kind: input, shape index: {}]   ;;  %s2770_s8 = inlined_call_operand.hbm [shape: bf16[32,128], index: 8, kind: input, shape index: {}]   ;;  %s2771_s9 = inlined_call_operand.hbm [shape: f32[1,128], index: 9, kind: input, shape index: {}]   ;;  %s2772_s10 = inlined_call_operand.hbm [shape: bf16[128,32], index: 10, kind: input, shape index: {}]   ;;  %s2773_s11 = inlined_call_operand.hbm [shape: f32[1,32], index: 11, kind: input, shape index: {}]   ;;  %s2774_s12 = inlined_call_operand.hbm [shape: f32[2,8,32], index: 12, kind: output, shape index: {}]  }
   0x1   :  { %18 = vsyncpa [#allocation6], 0 }
   0x2   :  { %19 = vsyncpa [#allocation9], 0 }
   0x3   :  { %20 = vsyncpa [#allocation12], 0 }
   0x4   :  { %21 = vsyncpa [#allocation15], 0 }
   0x5   :  { %22 = vsyncpa [#allocation18], 0 }
   0x6   :  { %23 = vsyncpa [#allocation21], 0 }
   0x7   :  { %24 = vsyncpa [#allocation4], 0  ;;  %s2192_s21 = smov [#allocation5]   ;;  %s2193_s23 = smov [#allocation8]  }
   0x8   :  { %s43_s22 = sshll.u32 %s2192_s21, 4  ;;  %s62_s24 = sshll.u32 %s2193_s23, 4  ;;  %s44_s22 = int_to_ptr.vmem [resolvable:$true] %s43_s22  ;;  %s2282_s24 = int_to_ptr.vmem [resolvable:$true] %s62_s24 }
   0x9   :  { %s1890_s27 = scalar_lea.hbm %s2763_s1, 16 }
   0xa   :  { %p1891_p0 = scmp.ne.s32.totalorder %s2763_s1, %s1890_s27  ;;  %p1894_p1 = scmp.lt.u32.totalorder %s1890_s27, %s2763_s1 }
   0xc   :  { %p1896_p2 = pnand %p1894_p1, %p1891_p0 }
   0xe   :  { %1899 = shalt.err (!%p1896_p2)
}
   0xf   :  { %s1900_s14 = scalar_lea.vmem %s44_s22, 16  ;;  %s1904_s15 = scalar_lea.vmem %s44_s22, 32 }
  0x10   :  { %p1901_p3 = scmp.ne.s32.totalorder %s44_s22, %s1900_s14  ;;  %p1905_p4 = scmp.lt.s32.totalorder %s44_s22, %s44_s22 }
  0x11   :  { %p1906_p5 = scmp.lt.s32.totalorder %s1904_s15, %s1900_s14 }
  0x13   :  { %p1907_p6 = por %p1906_p5, %p1905_p4 }
  0x15   :  { %p1908_p7 = pnand %p1907_p6, %p1901_p3 }
  0x17   :  { %1911 = shalt.err (!%p1908_p7)
}
  0x18   :  { %46 = dma.hbm_to_vmem [thread:$0]  %s2763_s1, 16, %s44_s22, [#allocation6]  }
  0x19   :  { %s1912_s20 = scalar_lea.hbm %s2765_s3, 256 }
  0x1a   :  { %p1913_p8 = scmp.ne.s32.totalorder %s2765_s3, %s1912_s20  ;;  %p1916_p9 = scmp.lt.u32.totalorder %s1912_s20, %s2765_s3 }
  0x1c   :  { %p1918_p10 = pnand %p1916_p9, %p1913_p8 }
  0x1e   :  { %1921 = shalt.err (!%p1918_p10)
}
  0x1f   :  { %s1922_s27 = scalar_lea.vmem %s2282_s24, 256  ;;  %p1927_p12 = scmp.lt.s32.totalorder %s2282_s24, %s2282_s24 }
  0x20   :  { %p1923_p11 = scmp.ne.s32.totalorder %s2282_s24, %s1922_s27  ;;  %p1928_p13 = scmp.lt.s32.totalorder %s1922_s27, %s1922_s27 }
  0x22   :  { %p1929_p0 = por %p1928_p13, %p1927_p12 }
  0x24   :  { %p1930_p1 = pnand %p1929_p0, %p1923_p11 }
  0x26   :  { %1933 = shalt.err (!%p1930_p1)
}
  0x27   :  { %s2194_s1 = smov 64   ;;  %s2195_s22 = smov 4  }
  0x28   :  { %68 = dma.hbm_to_vmem [thread:$0]  %s2765_s3, 256, %s2282_s24, [#allocation9], %s2194_s1, %s2194_s1, %s2195_s22  }
  0x29   :  { %s2196_s30 = smov [#allocation11]   ;;  %s2197_s14 = smov [#allocation14]  }
  0x2a   :  { %s87_s13 = sshll.u32 %s2196_s30, 4  ;;  %s107_s15 = sshll.u32 %s2197_s14, 4  ;;  %s88_s13 = int_to_ptr.vmem [resolvable:$true] %s87_s13  ;;  %s108_s15 = int_to_ptr.vmem [resolvable:$true] %s107_s15 }
  0x2b   :  { %s1934_s18 = scalar_lea.hbm %s2767_s5, 16 }
  0x2c   :  { %p1935_p2 = scmp.ne.s32.totalorder %s2767_s5, %s1934_s18  ;;  %p1938_p3 = scmp.lt.u32.totalorder %s1934_s18, %s2767_s5 }
  0x2e   :  { %p1940_p4 = pnand %p1938_p3, %p1935_p2 }
  0x30   :  { %1943 = shalt.err (!%p1940_p4)
}
  0x31   :  { %s1944_s3 = scalar_lea.vmem %s88_s13, 16  ;;  %s1948_s24 = scalar_lea.vmem %s88_s13, 32 }
  0x32   :  { %p1945_p5 = scmp.ne.s32.totalorder %s88_s13, %s1944_s3  ;;  %p1949_p6 = scmp.lt.s32.totalorder %s88_s13, %s88_s13 }
  0x33   :  { %p1950_p7 = scmp.lt.s32.totalorder %s1948_s24, %s1944_s3 }
  0x35   :  { %p1951_p8 = por %p1950_p7, %p1949_p6 }
  0x37   :  { %p1952_p9 = pnand %p1951_p8, %p1945_p5 }
  0x39   :  { %1955 = shalt.err (!%p1952_p9)
}
  0x3a   :  { %90 = dma.hbm_to_vmem [thread:$0]  %s2767_s5, 16, %s88_s13, [#allocation12]  }
  0x3b   :  { %s1956_s29 = scalar_lea.hbm %s2769_s7, 16 }
  0x3c   :  { %p1957_p10 = scmp.ne.s32.totalorder %s2769_s7, %s1956_s29  ;;  %p1960_p11 = scmp.lt.u32.totalorder %s1956_s29, %s2769_s7 }
  0x3e   :  { %p1962_p12 = pnand %p1960_p11, %p1957_p10 }
  0x40   :  { %1965 = shalt.err (!%p1962_p12)
}
  0x41   :  { %s1966_s18 = scalar_lea.vmem %s108_s15, 16  ;;  %s1970_s19 = scalar_lea.vmem %s108_s15, 32 }
  0x42   :  { %p1967_p13 = scmp.ne.s32.totalorder %s108_s15, %s1966_s18  ;;  %p1971_p0 = scmp.lt.s32.totalorder %s108_s15, %s108_s15 }
  0x43   :  { %p1972_p1 = scmp.lt.s32.totalorder %s1970_s19, %s1966_s18 }
  0x45   :  { %p1973_p2 = por %p1972_p1, %p1971_p0 }
  0x47   :  { %p1974_p3 = pnand %p1973_p2, %p1967_p13 }
  0x49   :  { %1977 = shalt.err (!%p1974_p3)
}
  0x4a   :  { %110 = dma.hbm_to_vmem [thread:$0]  %s2769_s7, 16, %s108_s15, [#allocation15]  }
  0x4b   :  { %s2198_s20 = smov [#allocation17]   ;;  %s2199_s23 = smov [#allocation2]  }
  0x4c   :  { %s129_s21 = sshll.u32 %s2198_s20, 4  ;;  %s30_s3 = sshll.u32 %s2199_s23, 4  ;;  %s130_s21 = int_to_ptr.vmem [resolvable:$true] %s129_s21  ;;  %s2340_s3 = int_to_ptr.vmem [resolvable:$true] %s30_s3 }
  0x4d   :  { %s1978_s26 = scalar_lea.hbm %s2771_s9, 16 }
  0x4e   :  { %p1979_p4 = scmp.ne.s32.totalorder %s2771_s9, %s1978_s26  ;;  %p1982_p5 = scmp.lt.u32.totalorder %s1978_s26, %s2771_s9 }
  0x50   :  { %p1984_p6 = pnand %p1982_p5, %p1979_p4 }
  0x52   :  { %1987 = shalt.err (!%p1984_p6)
}
  0x53   :  { %s1988_s7 = scalar_lea.vmem %s130_s21, 16  ;;  %s1992_s15 = scalar_lea.vmem %s130_s21, 32 }
  0x54   :  { %p1989_p7 = scmp.ne.s32.totalorder %s130_s21, %s1988_s7  ;;  %p1993_p8 = scmp.lt.s32.totalorder %s130_s21, %s130_s21 }
  0x55   :  { %p1994_p9 = scmp.lt.s32.totalorder %s1992_s15, %s1988_s7 }
  0x57   :  { %p1995_p10 = por %p1994_p9, %p1993_p8 }
  0x59   :  { %p1996_p11 = pnand %p1995_p10, %p1989_p7 }
  0x5b   :  { %1999 = shalt.err (!%p1996_p11)
}
  0x5c   :  { %132 = dma.hbm_to_vmem [thread:$0]  %s2771_s9, 16, %s130_s21, [#allocation18]  }
  0x5d   :  { %s2000_s19 = scalar_lea.hbm %s2762_s0, 256 }
  0x5e   :  { %p2001_p12 = scmp.ne.s32.totalorder %s2762_s0, %s2000_s19  ;;  %p2004_p13 = scmp.lt.u32.totalorder %s2000_s19, %s2762_s0 }
  0x60   :  { %p2006_p0 = pnand %p2004_p13, %p2001_p12 }
  0x62   :  { %2009 = shalt.err (!%p2006_p0)
}
  0x63   :  { %s2010_s24 = scalar_lea.vmem %s2340_s3, 256  ;;  %p2015_p2 = scmp.lt.s32.totalorder %s2340_s3, %s2340_s3 }
  0x64   :  { %p2011_p1 = scmp.ne.s32.totalorder %s2340_s3, %s2010_s24  ;;  %p2016_p3 = scmp.lt.s32.totalorder %s2010_s24, %s2010_s24 }
  0x66   :  { %p2017_p4 = por %p2016_p3, %p2015_p2 }
  0x68   :  { %p2018_p5 = pnand %p2017_p4, %p2011_p1 }
  0x6a   :  { %2021 = shalt.err (!%p2018_p5)
}
  0x6b   :  { %s2200_s9 = smov 128   ;;  %s2201_s21 = smov 8  }
  0x6c   :  { %36 = dma.hbm_to_vmem [thread:$0]  %s2762_s0, 256, %s2340_s3, [#allocation3], %s2200_s9, %s2200_s9, %s2201_s21  }
  0x6d   :  { %s2202_s27 = smov [#allocation7]   ;;  %s2203_s29 = smov [#allocation10]  }
  0x6e   :  { %s53_s28 = sshll.u32 %s2202_s27, 4  ;;  %s74_s30 = sshll.u32 %s2203_s29, 4  ;;  %s54_s28 = int_to_ptr.vmem [resolvable:$true] %s53_s28  ;;  %s2374_s30 = int_to_ptr.vmem [resolvable:$true] %s74_s30 }
  0x6f   :  { %s2022_s14 = scalar_lea.hbm %s2764_s2, 16 }
  0x70   :  { %p2023_p6 = scmp.ne.s32.totalorder %s2764_s2, %s2022_s14  ;;  %p2026_p7 = scmp.lt.u32.totalorder %s2022_s14, %s2764_s2 }
  0x72   :  { %p2028_p8 = pnand %p2026_p7, %p2023_p6 }
  0x74   :  { %2031 = shalt.err (!%p2028_p8)
}
  0x75   :  { %s2032_s0 = scalar_lea.vmem %s54_s28, 16  ;;  %s2036_s3 = scalar_lea.vmem %s54_s28, 32 }
  0x76   :  { %p2033_p9 = scmp.ne.s32.totalorder %s54_s28, %s2032_s0  ;;  %p2037_p10 = scmp.lt.s32.totalorder %s54_s28, %s54_s28 }
  0x77   :  { %p2038_p11 = scmp.lt.s32.totalorder %s2036_s3, %s2032_s0 }
  0x79   :  { %p2039_p12 = por %p2038_p11, %p2037_p10 }
  0x7b   :  { %p2040_p13 = pnand %p2039_p12, %p2033_p9 }
  0x7d   :  { %2043 = shalt.err (!%p2040_p13)
}
  0x7e   :  { %56 = dma.hbm_to_vmem [thread:$0]  %s2764_s2, 16, %s54_s28, [#allocation6]  }
  0x7f   :  { %s2044_s24 = scalar_lea.hbm %s2766_s4, 256 }
  0x80   :  { %p2045_p0 = scmp.ne.s32.totalorder %s2766_s4, %s2044_s24  ;;  %p2048_p1 = scmp.lt.u32.totalorder %s2044_s24, %s2766_s4 }
  0x82   :  { %p2050_p2 = pnand %p2048_p1, %p2045_p0 }
  0x84   :  { %2053 = shalt.err (!%p2050_p2)
}
  0x85   :  { %s2054_s7 = scalar_lea.vmem %s2374_s30, 256  ;;  %p2059_p4 = scmp.lt.s32.totalorder %s2374_s30, %s2374_s30 }
  0x86   :  { %p2055_p3 = scmp.ne.s32.totalorder %s2374_s30, %s2054_s7  ;;  %p2060_p5 = scmp.lt.s32.totalorder %s2054_s7, %s2054_s7 }
  0x88   :  { %p2061_p6 = por %p2060_p5, %p2059_p4 }
  0x8a   :  { %p2062_p7 = pnand %p2061_p6, %p2055_p3 }
  0x8c   :  { %2065 = shalt.err (!%p2062_p7)
}
  0x8d   :  { %80 = dma.hbm_to_vmem [thread:$0]  %s2766_s4, 256, %s2374_s30, [#allocation9], %s2194_s1, %s2194_s1, %s2195_s22  }
  0x8e   :  { %s2204_s15 = smov [#allocation13]   ;;  %s2205_s16 = smov [#allocation16]  }
  0x8f   :  { %s97_s14 = sshll.u32 %s2204_s15, 4  ;;  %s116_s17 = sshll.u32 %s2205_s16, 4  ;;  %s98_s14 = int_to_ptr.vmem [resolvable:$true] %s97_s14  ;;  %s2408_s17 = int_to_ptr.vmem [resolvable:$true] %s116_s17 }
  0x90   :  { %s2066_s0 = scalar_lea.hbm %s2768_s6, 16 }
  0x91   :  { %p2067_p8 = scmp.ne.s32.totalorder %s2768_s6, %s2066_s0  ;;  %p2070_p9 = scmp.lt.u32.totalorder %s2066_s0, %s2768_s6 }
  0x93   :  { %p2072_p10 = pnand %p2070_p9, %p2067_p8 }
  0x95   :  { %2075 = shalt.err (!%p2072_p10)
}
  0x96   :  { %s2076_s4 = scalar_lea.vmem %s98_s14, 16  ;;  %s2080_s30 = scalar_lea.vmem %s98_s14, 32 }
  0x97   :  { %p2077_p11 = scmp.ne.s32.totalorder %s98_s14, %s2076_s4  ;;  %p2081_p12 = scmp.lt.s32.totalorder %s98_s14, %s98_s14 }
  0x98   :  { %p2082_p13 = scmp.lt.s32.totalorder %s2080_s30, %s2076_s4 }
  0x9a   :  { %p2083_p0 = por %p2082_p13, %p2081_p12 }
  0x9c   :  { %p2084_p1 = pnand %p2083_p0, %p2077_p11 }
  0x9e   :  { %2087 = shalt.err (!%p2084_p1)
}
  0x9f   :  { %100 = dma.hbm_to_vmem [thread:$0]  %s2768_s6, 16, %s98_s14, [#allocation12]  }
  0xa0   :  { %s2088_s27 = scalar_lea.hbm %s2770_s8, 256 }
  0xa1   :  { %p2089_p2 = scmp.ne.s32.totalorder %s2770_s8, %s2088_s27  ;;  %p2092_p3 = scmp.lt.u32.totalorder %s2088_s27, %s2770_s8 }
  0xa3   :  { %p2094_p4 = pnand %p2092_p3, %p2089_p2 }
  0xa5   :  { %2097 = shalt.err (!%p2094_p4)
}
  0xa6   :  { %s2098_s15 = scalar_lea.vmem %s2408_s17, 256  ;;  %p2103_p6 = scmp.lt.s32.totalorder %s2408_s17, %s2408_s17 }
  0xa7   :  { %p2099_p5 = scmp.ne.s32.totalorder %s2408_s17, %s2098_s15  ;;  %p2104_p7 = scmp.lt.s32.totalorder %s2098_s15, %s2098_s15 }
  0xa9   :  { %p2105_p8 = por %p2104_p7, %p2103_p6 }
  0xab   :  { %p2106_p9 = pnand %p2105_p8, %p2099_p5 }
  0xad   :  { %2109 = shalt.err (!%p2106_p9)
}
  0xae   :  { %122 = dma.hbm_to_vmem [thread:$0]  %s2770_s8, 256, %s2408_s17, [#allocation15], %s2194_s1, %s2194_s1, %s2195_s22  }
  0xaf   :  { %s2206_s16 = smov [#allocation19]   ;;  %s2207_s19 = smov [#allocation20]  }
  0xb0   :  { %s138_s18 = sshll.u32 %s2206_s16, 4  ;;  %s151_s0 = sshll.u32 %s2207_s19, 4  ;;  %s139_s18 = int_to_ptr.vmem [resolvable:$true] %s138_s18  ;;  %s152_s0 = int_to_ptr.vmem [resolvable:$true] %s151_s0 }
  0xb1   :  { %s2110_s13 = scalar_lea.hbm %s2772_s10, 1024 }
  0xb2   :  { %p2111_p10 = scmp.ne.s32.totalorder %s2772_s10, %s2110_s13  ;;  %p2114_p11 = scmp.lt.u32.totalorder %s2110_s13, %s2772_s10 }
  0xb4   :  { %p2116_p12 = pnand %p2114_p11, %p2111_p10 }
  0xb6   :  { %2119 = shalt.err (!%p2116_p12)
}
  0xb7   :  { %s2120_s8 = scalar_lea.vmem %s139_s18, 1024  ;;  %p2125_p0 = scmp.lt.s32.totalorder %s139_s18, %s139_s18 }
  0xb8   :  { %p2121_p13 = scmp.ne.s32.totalorder %s139_s18, %s2120_s8  ;;  %p2126_p1 = scmp.lt.s32.totalorder %s2120_s8, %s2120_s8 }
  0xba   :  { %p2127_p2 = por %p2126_p1, %p2125_p0 }
  0xbc   :  { %p2128_p3 = pnand %p2127_p2, %p2121_p13 }
  0xbe   :  { %2131 = shalt.err (!%p2128_p3)
}
  0xbf   :  { %144 = dma.hbm_to_vmem [thread:$0]  %s2772_s10, 1024, %s139_s18, [#allocation18], %s2194_s1, %s2194_s1, %s2195_s22  }
  0xc0   :  { %s2132_s27 = scalar_lea.hbm %s2773_s11, 16 }
  0xc1   :  { %p2133_p4 = scmp.ne.s32.totalorder %s2773_s11, %s2132_s27  ;;  %p2136_p5 = scmp.lt.u32.totalorder %s2132_s27, %s2773_s11 }
  0xc3   :  { %p2138_p6 = pnand %p2136_p5, %p2133_p4 }
  0xc5   :  { %2141 = shalt.err (!%p2138_p6)
}
  0xc6   :  { %s2142_s15 = scalar_lea.vmem %s152_s0, 16  ;;  %s2146_s6 = scalar_lea.vmem %s152_s0, 32 }
  0xc7   :  { %p2143_p7 = scmp.ne.s32.totalorder %s152_s0, %s2142_s15  ;;  %p2147_p8 = scmp.lt.s32.totalorder %s152_s0, %s152_s0 }
  0xc8   :  { %p2148_p9 = scmp.lt.s32.totalorder %s2146_s6, %s2142_s15 }
  0xca   :  { %p2149_p10 = por %p2148_p9, %p2147_p8 }
  0xcc   :  { %p2150_p11 = pnand %p2149_p10, %p2143_p7 }
  0xce   :  { %2153 = shalt.err (!%p2150_p11)
}
  0xcf   :  { %154 = dma.hbm_to_vmem [thread:$0]  %s2773_s11, 16, %s152_s0, [#allocation21]  }
  0xd0   :  { %2176 = dma.done.wait [#allocation3], 256  }
  0xd1   :  { %2177 = vsyncadd [#allocation3], 4294967040 }
  0xd2   :  { %2178 = dma.done.wait [#allocation6], 32  }
  0xd3   :  { %2179 = vsyncadd [#allocation6], 4294967264 }
  0xd4   :  { %2180 = dma.done.wait [#allocation9], 512  }
  0xd5   :  { %2181 = vsyncadd [#allocation9], 4294966784 }
  0xd6   :  { %2182 = dma.done.wait [#allocation12], 32  }
  0xd7   :  { %2183 = vsyncadd [#allocation12], 4294967264 }
  0xd8   :  { %2184 = dma.done.wait [#allocation15], 272  }
  0xd9   :  { %2185 = vsyncadd [#allocation15], 4294967024 }
  0xda   :  { %2186 = dma.done.wait [#allocation18], 1040  }
  0xdb   :  { %2187 = vsyncadd [#allocation18], 4294966256 }
  0xdc   :  { %2188 = dma.done.wait [#allocation21], 16  }
  0xdd   :  { %2189 = vsyncadd [#allocation21], 4294967280  ;;  %vm196_vm0 = vcmask 261120   ;;  %v2469_v0 = vld [vmem:[#allocation2] sm:$0xff]  ;;  %v2471_v1 = vld [vmem:[#allocation2 + $0x8] sm:$0xff]  ;;  %v2208_v15 = vmov 0.0  }
  0xde   :  { %v197_v2 = vsel %vm196_vm0, %v2469_v0, 0.0  ;;  %v200_v3 = vsel %vm196_vm0, %v2471_v1, 0.0  ;;  %v1832_v14 = vld [vmem:[#allocation8] sm:$0xff]   ;;  %1667 = vmatprep.subr.bf16.mxu0 %v2208_v15  ;;  %1687 = vmatprep.subr.bf16.mxu1 %v2208_v15  ;;  %v1833_v16 = vld [vmem:[#allocation8 + $0x8] sm:$0xff]   ;;  %vm2209_vm1 = vmmov 0   ;;  %s2210_s11 = smov 112  }
  0xdf   :  { %198 = vadd.xlane.f32.xlu0 %v197_v2  ;;  %1668 = vmatpush3.bf16.msra.mxu0 %v1832_v14  ;;  %v1577_v25 = vld [vmem:[#allocation5] ss:$0 sm:$0xff]  ;;  %v1578_v29 = vld [vmem:[#allocation7] ss:$0 sm:$0xff]  ;;  %s2211_s14 = smov 120   ;;  %s2212_s16 = smov 104  }
  0xe0   :  { %1671 = vmatprep.mubr.msk.bf16.mxu0 %vm2209_vm1, %v2208_v15  ;;  %1669 = vmatprep.subr.bf16.mxu0 %v2208_v15  ;;  %s2213_s18 = smov 96   ;;  %vm337_vm2 = vcmask 64512   ;;  %vm821_vm3 = vcmask 1043456   ;;  %s2215_s19 = smov 24   ;;  %vm1221_vm4 = vcmask 130048   ;;  %vm1224_vm5 = vcmask 195584  }
  0xe1   :  { %1689 = vmatprep.mubr.msk.bf16.mxu1 %vm2209_vm1, %v2208_v15  ;;  %s2216_s0 = smov [#allocation22]  }
  0xe2   :  { %s1559_s3 = sshll.u32 %s2216_s0, 4  ;;  %s1560_s3 = int_to_ptr.vmem [resolvable:$true] %s1559_s3 }
  0xe3   :  { %201 = vadd.xlane.f32.xlu0 %v200_v3  ;;  %1670 = vmatpush3.bf16.msra.mxu0 %v1833_v16  ;;  %s2154_s5 = scalar_lea.vmem %s1560_s3, 256  ;;  %p2159_p13 = scmp.lt.s32.totalorder %s1560_s3, %s1560_s3 }
  0xe4   :  { %1675 = vmatprep.subr.bf16.mxu0 %v2208_v15  ;;  %p2155_p12 = scmp.ne.s32.totalorder %s1560_s3, %s2154_s5  ;;  %p2160_p0 = scmp.lt.s32.totalorder %s2154_s5, %s2154_s5 }
  0xe6   :  { %p2161_p1 = por %p2160_p0, %p2159_p13 }
  0xe8   :  { %p2162_p2 = pnand %p2161_p1, %p2155_p12 }
 0x16c   :  { %v199_v4 = vpop.xlane.xlu0 %198 }
 0x16d   :  { %v204_v5 = vmul.f32 0.03125, %v199_v4 }
 0x16f   :  { %v206_v6 = vsub.f32 %v2469_v0, %v204_v5 }
 0x170   :  { %v202_v7 = vpop.xlane.xlu0 %201 }
 0x171   :  { %v205_v8 = vmul.f32 0.03125, %v202_v7  ;;  %v208_v9 = vmul.f32 %v206_v6, %v206_v6 }
 0x173   :  { %v207_v10 = vsub.f32 %v2471_v1, %v205_v8  ;;  %v210_v11 = vsel %vm196_vm0, %v208_v9, 0.0 }
 0x174   :  { %211 = vadd.xlane.f32.xlu1 %v210_v11 }
 0x175   :  { %v209_v12 = vmul.f32 %v207_v10, %v207_v10 }
 0x177   :  { %v213_v13 = vsel %vm196_vm0, %v209_v12, 0.0 }
 0x178   :  { %214 = vadd.xlane.f32.xlu1 %v213_v13 }
 0x201   :  { %v212_v17 = vpop.xlane.xlu1 %211 }
 0x202   :  { %v216_v18 = vmul.f32 0.03125, %v212_v17 }
 0x204   :  { %v218_v19 = vadd.f32 1e-05, %v216_v18 }
 0x205   :  { %v215_v20 = vpop.xlane.xlu1 %214 }
 0x206   :  { %1846 = vrsqrt.f32 %v218_v19  ;;  %v217_v21 = vmul.f32 0.03125, %v215_v20 }
 0x208   :  { %v219_v22 = vadd.f32 1e-05, %v217_v21 }
 0x20a   :  { %1848 = vrsqrt.f32 %v219_v22 }
 0x210   :  { %v1847_v23 = vpop.eup %1846 }
 0x211   :  { %v222_v24 = vmul.f32 %v1847_v23, %v206_v6 }
 0x213   :  { %v230_v28 = vmul.f32 %v1577_v25, %v222_v24 }
 0x214   :  { %v1849_v26 = vpop.eup %1848 }
 0x215   :  { %v223_v27 = vmul.f32 %v1849_v26, %v207_v10  ;;  %v238_v31 = vadd.f32 %v1578_v29, %v230_v28 }
 0x217   :  { %v231_v30 = vmul.f32 %v1577_v25, %v223_v27 }
 0x219   :  { %v239_v32 = vadd.f32 %v1578_v29, %v231_v30 }
 0x21b   :  { %v240_v33 = vpack.c.bf16 %v239_v32, %v238_v31 }
 0x21d   :  { %1672 = vmatmul.mubr.msk.bf16.vlgmr.msra.gmra.mrb[0].mxu0 %vm196_vm0, %v240_v33 }
 0x21e   :  { %1677 = vmatprep.mubr.msk.bf16.mxu0 %vm2209_vm1, %v2208_v15 }
 0x2f0   :  { %v294_v34 = vpop.f32.mrb[0].mxu0 }
 0x2f1   :  { %v2492_v35 = vpack.c.bf16 %v294_v34, %v294_v34  ;;  %v1673_v36 = vpop.f32.mrb[1].mxu0  ;;  %v301_v40 = vmul.f32 0.35355338, %v294_v34 }
 0x2f2   :  { %v297_v37 = vpop.f32.mrb[2].mxu0 }
 0x2f3   :  { %324 = vrot.lane.b32.xlu1 %v2492_v35, %s2210_s11  ;;  %322 = vrot.lane.b32.xlu0 %v2492_v35, %s2211_s14  ;;  %v1674_v38 = vpop.f32.mrb[3].mxu0  ;;  %v2498_v39 = vpack.c.bf16 %v297_v37, %v297_v37  ;;  %v302_v43 = vpack.c.bf16 %v301_v40, %v301_v40  ;;  %v303_v48 = vmul.f32 0.35355338, %v297_v37 }
 0x2f5   :  { %v304_v50 = vpack.c.bf16 %v303_v48, %v303_v48 }
 0x2f7   :  { %326 = vrot.lane.b32.xlu1 %v2492_v35, %s2212_s16  ;;  %331 = vrot.lane.b32.xlu0 %v2498_v39, %s2210_s11 }
 0x2fb   :  { %335 = vrot.lane.b32.xlu0 %v2492_v35, %s2213_s18  ;;  %329 = vrot.lane.b32.xlu1 %v2498_v39, %s2211_s14 }
 0x2ff   :  { %333 = vrot.lane.b32.xlu1 %v2498_v39, %s2212_s16 }
 0x365   :  { %v2510_v41 = vpop.permute.xlu1 %324  ;;  %v2512_v42 = vpop.permute.xlu0 %322 }
 0x366   :  { %432 = vrot.lane.b32.xlu0 %v2510_v41, %s2213_s18  ;;  %384 = vrot.lane.b32.xlu1 %v2512_v42, %s2213_s18 }
 0x369   :  { %v2518_v44 = vpop.permute.xlu1 %326  ;;  %v2520_v45 = vpop.permute.xlu0 %331 }
 0x36a   :  { %480 = vrot.lane.b32.xlu0 %v2518_v44, %s2213_s18  ;;  %306 = vrot.lane.b32.xlu1 %v302_v43, %s2211_s14 }
 0x36d   :  { %v336_v46 = vpop.permute.xlu0 %335  ;;  %v2530_v49 = vpop.permute.xlu1 %329 }
 0x36e   :  { %v342_v47 = vsel %vm337_vm2, %v336_v46, 0  ;;  %528 = vrot.lane.b32.xlu0 %v2498_v39, %s2213_s18  ;;  %308 = vrot.lane.b32.xlu1 %v302_v43, %s2210_s11 }
 0x36f   :  { %1676 = vmatpush3.bf16.xpose.msra.mxu0 %v342_v47 }
 0x370   :  { %1681 = vmatprep.subr.bf16.mxu0 %v2208_v15 }
 0x371   :  { %v2541_v51 = vpop.permute.xlu1 %333 }
 0x372   :  { %310 = vrot.lane.b32.xlu1 %v302_v43, %s2212_s16  ;;  %576 = vrot.lane.b32.xlu0 %v2530_v49, %s2213_s18 }
 0x376   :  { %1678 = vmatmul.mubr.msk.bf16.vlgmr.msra.gmra.mrb[4].mxu0 %vm337_vm2, %v302_v43  ;;  %624 = vrot.lane.b32.xlu1 %v2520_v45, %s2213_s18 }
 0x377   :  { %313 = vrot.lane.b32.xlu0 %v304_v50, %s2211_s14  ;;  %1683 = vmatprep.mubr.msk.bf16.mxu0 %vm2209_vm1, %v2208_v15 }
 0x37a   :  { %672 = vrot.lane.b32.xlu1 %v2541_v51, %s2213_s18 }
 0x37b   :  { %315 = vrot.lane.b32.xlu0 %v304_v50, %s2210_s11 }
 0x37e   :  { %317 = vrot.lane.b32.xlu1 %v304_v50, %s2212_s16 }
 0x3d8   :  { %v433_v52 = vpop.permute.xlu0 %432  ;;  %v385_v53 = vpop.permute.xlu1 %384 }
 0x3d9   :  { %v390_v54 = vsel %vm337_vm2, %v385_v53, 0  ;;  %v438_v55 = vsel %vm337_vm2, %v433_v52, 0 }
 0x3da   :  { %1682 = vmatpush3.bf16.xpose.msra.mxu0 %v390_v54  ;;  %1688 = vmatpush3.bf16.xpose.msra.mxu1 %v438_v55 }
 0x3db   :  { %1693 = vmatprep.subr.bf16.mxu0 %v2208_v15  ;;  %1699 = vmatprep.subr.bf16.mxu1 %v2208_v15 }
 0x3dc   :  { %v481_v56 = vpop.permute.xlu0 %480  ;;  %v307_v57 = vpop.permute.xlu1 %306 }
 0x3dd   :  { %v486_v60 = vsel %vm337_vm2, %v481_v56, 0 }
 0x3e0   :  { %v529_v58 = vpop.permute.xlu0 %528  ;;  %v309_v59 = vpop.permute.xlu1 %308 }
 0x3e1   :  { %v534_v61 = vsel %vm337_vm2, %v529_v58, 0  ;;  %1684 = vmatmul.mubr.msk.bf16.vlgmr.msra.gmra.mrb[8].mxu0 %vm337_vm2, %v307_v57  ;;  %1690 = vmatmul.mubr.msk.bf16.vlgmr.msra.gmra.mrb[0].mxu1 %vm337_vm2, %v309_v59 }
 0x3e2   :  { %1694 = vmatpush3.bf16.xpose.msra.mxu0 %v486_v60  ;;  %1700 = vmatpush3.bf16.xpose.msra.mxu1 %v534_v61 }
 0x3e3   :  { %1695 = vmatprep.mubr.msk.bf16.mxu0 %vm2209_vm1, %v2208_v15  ;;  %1701 = vmatprep.mubr.msk.bf16.mxu1 %vm2209_vm1, %v2208_v15 }
 0x3e4   :  { %v577_v62 = vpop.permute.xlu0 %576  ;;  %v311_v63 = vpop.permute.xlu1 %310  ;;  %1705 = vmatprep.subr.bf16.mxu0 %v2208_v15  ;;  %1711 = vmatprep.subr.bf16.mxu1 %v2208_v15 }
 0x3e5   :  { %v582_v3 = vsel %vm337_vm2, %v577_v62, 0 }
 0x3e8   :  { %v625_v2 = vpop.permute.xlu1 %624 }
 0x3e9   :  { %v630_v4 = vsel %vm337_vm2, %v625_v2, 0  ;;  %1696 = vmatmul.mubr.msk.bf16.vlgmr.msra.gmra.mrb[12].mxu0 %vm337_vm2, %v311_v63  ;;  %1702 = vmatmul.mubr.msk.bf16.vlgmr.msra.gmra.mrb[4].mxu1 %vm337_vm2, %v304_v50  ;;  %v314_v5 = vpop.permute.xlu0 %313 }
 0x3ea   :  { %1706 = vmatpush3.bf16.xpose.msra.mxu0 %v582_v3  ;;  %1712 = vmatpush3.bf16.xpose.msra.mxu1 %v630_v4 }
 0x3eb   :  { %1707 = vmatprep.mubr.msk.bf16.mxu0 %vm2209_vm1, %v2208_v15  ;;  %1713 = vmatprep.mubr.msk.bf16.mxu1 %vm2209_vm1, %v2208_v15 }
 0x3ec   :  { %1717 = vmatprep.subr.bf16.mxu0 %v2208_v15  ;;  %1723 = vmatprep.subr.bf16.mxu1 %v2208_v15  ;;  %v673_v6 = vpop.permute.xlu1 %672 }
 0x3ed   :  { %v316_v7 = vpop.permute.xlu0 %315  ;;  %v678_v8 = vsel %vm337_vm2, %v673_v6, 0 }
 0x3f0   :  { %v318_v9 = vpop.permute.xlu1 %317 }
 0x3f1   :  { %1708 = vmatmul.mubr.msk.bf16.vlgmr.msra.gmra.mrb[16].mxu0 %vm337_vm2, %v314_v5  ;;  %1714 = vmatmul.mubr.msk.bf16.vlgmr.msra.gmra.mrb[8].mxu1 %vm337_vm2, %v316_v7 }
 0x3f2   :  { %1718 = vmatpush3.bf16.xpose.msra.mxu0 %v678_v8  ;;  %1719 = vmatprep.mubr.msk.bf16.mxu0 %vm2209_vm1, %v2208_v15 }
 0x3f3   :  { %1729 = vmatprep.subr.bf16.mxu0 %v2208_v15  ;;  %1725 = vmatprep.mubr.msk.bf16.mxu1 %vm2209_vm1, %v2208_v15 }
 0x3f9   :  { %1720 = vmatmul.mubr.msk.bf16.vlgmr.msra.gmra.mrb[20].mxu0 %vm337_vm2, %v318_v9 }
 0x3fa   :  { %1731 = vmatprep.mubr.msk.bf16.mxu0 %vm2209_vm1, %v2208_v15 }
 0x449   :  { %v378_v10 = vpop.f32.mrb[4].mxu0 }
 0x44a   :  { %v1679_v11 = vpop.f32.mrb[5].mxu0  ;;  %v720_v12 = vsel %vm337_vm2, %v378_v10, -inf }
 0x44b   :  { %721 = vmax.xlane.f32.xlu0 %v720_v12  ;;  %v381_v13 = vpop.f32.mrb[6].mxu0 }
 0x44c   :  { %v1680_v14 = vpop.f32.mrb[7].mxu0 }
 0x4b4   :  { %v426_v16 = vpop.f32.mrb[8].mxu0  ;;  %v474_v17 = vpop.f32.mrb[0].mxu1 }
 0x4b5   :  { %v1685_v18 = vpop.f32.mrb[9].mxu0  ;;  %v1691_v19 = vpop.f32.mrb[1].mxu1  ;;  %v726_v20 = vsel %vm337_vm2, %v474_v17, -inf  ;;  %v723_v21 = vsel %vm337_vm2, %v426_v16, -inf }
 0x4b6   :  { %v477_v22 = vpop.f32.mrb[2].mxu1  ;;  %727 = vmax.xlane.f32.xlu0 %v726_v20  ;;  %724 = vmax.xlane.f32.xlu1 %v723_v21  ;;  %v429_v23 = vpop.f32.mrb[10].mxu0 }
 0x4b7   :  { %v1686_v24 = vpop.f32.mrb[11].mxu0  ;;  %v1692_v25 = vpop.f32.mrb[3].mxu1 }
 0x4bc   :  { %v2585_v26 = vpop.f32.mrb[12].mxu0  ;;  %v2587_v27 = vpop.f32.mrb[4].mxu1 }
 0x4bd   :  { %v1697_v28 = vpop.f32.mrb[13].mxu0  ;;  %v1703_v29 = vpop.f32.mrb[5].mxu1  ;;  %v729_v30 = vsel %vm337_vm2, %v2585_v26, -inf  ;;  %v732_v36 = vsel %vm337_vm2, %v2587_v27, -inf }
 0x4be   :  { %v573_v31 = vpop.f32.mrb[6].mxu1  ;;  %730 = vmax.xlane.f32.xlu0 %v729_v30  ;;  %v525_v32 = vpop.f32.mrb[14].mxu0 }
 0x4bf   :  { %v1698_v33 = vpop.f32.mrb[15].mxu0  ;;  %v1704_v34 = vpop.f32.mrb[7].mxu1 }
 0x4c2   :  { %733 = vmax.xlane.f32.xlu0 %v732_v36 }
 0x4c4   :  { %v2593_v37 = vpop.f32.mrb[16].mxu0  ;;  %v2595_v38 = vpop.f32.mrb[8].mxu1 }
 0x4c5   :  { %v1709_v40 = vpop.f32.mrb[17].mxu0  ;;  %v1715_v43 = vpop.f32.mrb[9].mxu1  ;;  %v738_v46 = vsel %vm337_vm2, %v2595_v38, -inf  ;;  %v735_v47 = vsel %vm337_vm2, %v2593_v37, -inf }
 0x4c6   :  { %v669_v48 = vpop.f32.mrb[10].mxu1  ;;  %739 = vmax.xlane.f32.xlu0 %v738_v46  ;;  %736 = vmax.xlane.f32.xlu1 %v735_v47  ;;  %v621_v50 = vpop.f32.mrb[18].mxu0 }
 0x4c7   :  { %v1710_v52 = vpop.f32.mrb[19].mxu0  ;;  %v1716_v53 = vpop.f32.mrb[11].mxu1 }
 0x4cc   :  { %v2601_v54 = vpop.f32.mrb[20].mxu0 }
 0x4cd   :  { %v1721_v55 = vpop.f32.mrb[21].mxu0  ;;  %v741_v63 = vsel %vm337_vm2, %v2601_v54, -inf }
 0x4ce   :  { %v717_v56 = vpop.f32.mrb[22].mxu0 }
 0x4cf   :  { %v1722_v57 = vpop.f32.mrb[23].mxu0 }
 0x4d7   :  { %865 = vrot.lane.b32.xlu1 %v2512_v42, %s2194_s1 }
 0x4d8   :  { %v722_v58 = vpop.xlane.xlu0 %721 }
 0x4d9   :  { %v744_v59 = vsub.f32 %v378_v10, %v722_v58 }
 0x4db   :  { %913 = vrot.lane.b32.xlu1 %v2510_v41, %s2194_s1  ;;  %v752_v60 = vmul.f32 1.442695, %v744_v59 }
 0x4dc   :  { %816 = vrot.lane.b32.xlu0 %v2492_v35, %s2194_s1 }
 0x4dd   :  { %1850 = vpow2.f32 %v752_v60 }
 0x4e7   :  { %v2609_v61 = vpop.eup %1850 }
 0x4e8   :  { %v768_v62 = vsel %vm337_vm2, %v2609_v61, 0.0 }
 0x4fb   :  { %769 = vadd.xlane.f32.xlu0 %v768_v62 }
 0x4ff   :  { %742 = vmax.xlane.f32.xlu1 %v741_v63 }
 0x510   :  { %961 = vrot.lane.b32.xlu1 %v2518_v44, %s2194_s1 }
 0x543   :  { %v728_v41 = vpop.xlane.xlu0 %727  ;;  %v725_v42 = vpop.xlane.xlu1 %724 }
 0x544   :  { %v746_v35 = vsub.f32 %v474_v17, %v728_v41  ;;  %v745_v2 = vsub.f32 %v426_v16, %v725_v42 }
 0x546   :  { %v756_v3 = vmul.f32 1.442695, %v746_v35  ;;  %v754_v4 = vmul.f32 1.442695, %v745_v2 }
 0x548   :  { %1852 = vpow2.f32 %v756_v3 }
 0x549   :  { %1854 = vpow2.f32 %v754_v4 }
 0x54b   :  { %v731_v5 = vpop.xlane.xlu0 %730 }
 0x54c   :  { %v747_v18 = vsub.f32 %v2585_v26, %v731_v5 }
 0x54e   :  { %v758_v21 = vmul.f32 1.442695, %v747_v18 }
 0x54f   :  { %v734_v6 = vpop.xlane.xlu0 %733 }
 0x550   :  { %v748_v17 = vsub.f32 %v2587_v27, %v734_v6 }
 0x552   :  { %v2617_v7 = vpop.eup %1852  ;;  %v760_v19 = vmul.f32 1.442695, %v748_v17 }
 0x553   :  { %v2619_v8 = vpop.eup %1854  ;;  %v740_v9 = vpop.xlane.xlu0 %739  ;;  %v774_v11 = vsel %vm337_vm2, %v2617_v7, 0.0 }
 0x554   :  { %v737_v10 = vpop.xlane.xlu1 %736  ;;  %775 = vadd.xlane.f32.xlu0 %v774_v11  ;;  %v771_v44 = vsel %vm337_vm2, %v2619_v8, 0.0  ;;  %v750_v20 = vsub.f32 %v2595_v38, %v740_v9  ;;  %1856 = vpow2.f32 %v760_v19 }
 0x555   :  { %772 = vadd.xlane.f32.xlu1 %v771_v44  ;;  %v749_v22 = vsub.f32 %v2593_v37, %v737_v10  ;;  %1858 = vpow2.f32 %v758_v21 }
 0x556   :  { %v764_v23 = vmul.f32 1.442695, %v750_v20 }
 0x557   :  { %v817_v12 = vpop.permute.xlu0 %816  ;;  %v762_v24 = vmul.f32 1.442695, %v749_v22 }
 0x558   :  { %v866_v13 = vpop.permute.xlu1 %865  ;;  %v823_v14 = vsel %vm821_vm3, %v817_v12, 0  ;;  %1860 = vpow2.f32 %v764_v23 }
 0x559   :  { %v871_v16 = vsel %vm821_vm3, %v866_v13, 0  ;;  %1724 = vmatpush3.bf16.msra.mxu1 %v823_v14  ;;  %1862 = vpow2.f32 %v762_v24 }
 0x55a   :  { %1730 = vmatpush3.bf16.msra.mxu0 %v871_v16  ;;  %1735 = vmatprep.subr.bf16.mxu1 %v2208_v15 }
 0x55b   :  { %1741 = vmatprep.subr.bf16.mxu0 %v2208_v15 }
 0x566   :  { %1057 = vrot.lane.b32.xlu1 %v2530_v49, %s2194_s1  ;;  %v2637_v49 = vpop.eup %1856 }
 0x567   :  { %v2639_v25 = vpop.eup %1858  ;;  %v780_v26 = vsel %vm337_vm2, %v2637_v49, 0.0 }
 0x568   :  { %v2643_v28 = vpop.eup %1860  ;;  %v777_v29 = vsel %vm337_vm2, %v2639_v25, 0.0 }
 0x569   :  { %v2647_v30 = vpop.eup %1862  ;;  %v786_v32 = vsel %vm337_vm2, %v2643_v28, 0.0 }
 0x56a   :  { %1009 = vrot.lane.b32.xlu0 %v2498_v39, %s2194_s1  ;;  %v914_v39 = vpop.permute.xlu1 %913  ;;  %v783_v34 = vsel %vm337_vm2, %v2647_v30, 0.0 }
 0x56b   :  { %v919_v43 = vsel %vm821_vm3, %v914_v39, 0 }
 0x588   :  { %v770_v27 = vpop.xlane.xlu0 %769 }
 0x589   :  { %1864 = vrcp.f32 %v770_v27  ;;  %781 = vadd.xlane.f32.xlu0 %v780_v26 }
 0x58a   :  { %778 = vadd.xlane.f32.xlu1 %v777_v29 }
 0x58c   :  { %v743_v31 = vpop.xlane.xlu1 %742 }
 0x58d   :  { %v751_v33 = vsub.f32 %v2601_v54, %v743_v31  ;;  %787 = vadd.xlane.f32.xlu0 %v786_v32 }
 0x58e   :  { %784 = vadd.xlane.f32.xlu1 %v783_v34 }
 0x58f   :  { %v766_v36 = vmul.f32 1.442695, %v751_v33 }
 0x590   :  { %v962_v48 = vpop.permute.xlu1 %961 }
 0x591   :  { %1866 = vpow2.f32 %v766_v36 }
 0x593   :  { %v1865_v37 = vpop.eup %1864 }
 0x594   :  { %v800_v38 = vmul.f32 %v1865_v37, %v2609_v61 }
 0x596   :  { %v808_v40 = vpack.c.bf16 %v800_v38, %v800_v38 }
 0x598   :  { %1726 = vmatmul.mubr.msk.bf16.vlgmr.msra.gmra.mrb[12].mxu1 %vm337_vm2, %v808_v40 }
 0x599   :  { %1736 = vmatpush3.bf16.msra.mxu1 %v919_v43  ;;  %1737 = vmatprep.mubr.msk.bf16.mxu1 %vm2209_vm1, %v2208_v15  ;;  %v1834_v43 = vld [vmem:[#allocation10] sm:$0xff]  }
 0x59a   :  { %1747 = vmatprep.subr.bf16.mxu1 %v2208_v15 }
 0x59b   :  { %v2660_v46 = vpop.eup %1866 }
 0x59c   :  { %v789_v47 = vsel %vm337_vm2, %v2660_v46, 0.0 }
 0x59d   :  { %790 = vadd.xlane.f32.xlu1 %v789_v47 }
 0x5a3   :  { %1105 = vrot.lane.b32.xlu0 %v2520_v45, %s2194_s1  ;;  %v967_v45 = vsel %vm821_vm3, %v962_v48, 0 }
 0x5ae   :  { %1153 = vrot.lane.b32.xlu1 %v2541_v51, %s2194_s1  ;;  %s2214_s1 = smov 16  }
 0x5e1   :  { %v776_v50 = vpop.xlane.xlu0 %775 }
 0x5e2   :  { %1868 = vrcp.f32 %v776_v50  ;;  %v773_v52 = vpop.xlane.xlu1 %772 }
 0x5e3   :  { %1870 = vrcp.f32 %v773_v52 }
 0x5e5   :  { %v1010_v57 = vpop.permute.xlu0 %1009 }
 0x5e6   :  { %v1015_v60 = vsel %vm821_vm3, %v1010_v57, 0  ;;  %v1058_v51 = vpop.permute.xlu1 %1057 }
 0x5e7   :  { %v1063_v10 = vsel %vm821_vm3, %v1058_v51, 0 }
 0x5ec   :  { %v1869_v53 = vpop.eup %1868 }
 0x5ed   :  { %v1871_v54 = vpop.eup %1870  ;;  %v802_v55 = vmul.f32 %v1869_v53, %v2617_v7 }
 0x5ee   :  { %v801_v56 = vmul.f32 %v1871_v54, %v2619_v8 }
 0x5ef   :  { %v810_v58 = vpack.c.bf16 %v802_v55, %v802_v55 }
 0x5f0   :  { %v809_v59 = vpack.c.bf16 %v801_v56, %v801_v56 }
 0x5f1   :  { %1738 = vmatmul.mubr.msk.bf16.vlgmr.msra.gmra.mrb[16].mxu1 %vm337_vm2, %v810_v58  ;;  %v1835_v58 = vld [vmem:[#allocation10 + $0x8] sm:$0xff]  }
 0x5f2   :  { %1732 = vmatmul.mubr.msk.bf16.vlgmr.msra.gmra.mrb[24].mxu0 %vm337_vm2, %v809_v59  ;;  %1748 = vmatpush3.bf16.msra.mxu1 %v1015_v60 }
 0x5f3   :  { %1742 = vmatpush3.bf16.msra.mxu0 %v967_v45  ;;  %1743 = vmatprep.mubr.msk.bf16.mxu0 %vm2209_vm1, %v2208_v15 }
 0x5f4   :  { %1749 = vmatprep.mubr.msk.bf16.mxu1 %vm2209_vm1, %v2208_v15  ;;  %1753 = vmatprep.subr.bf16.mxu0 %v2208_v15 }
 0x5f5   :  { %1759 = vmatprep.subr.bf16.mxu1 %v2208_v15 }
 0x616   :  { %v782_v61 = vpop.xlane.xlu0 %781 }
 0x617   :  { %1872 = vrcp.f32 %v782_v61  ;;  %v779_v62 = vpop.xlane.xlu1 %778 }
 0x618   :  { %1874 = vrcp.f32 %v779_v62 }
 0x61a   :  { %v788_v63 = vpop.xlane.xlu0 %787 }
 0x61b   :  { %1876 = vrcp.f32 %v788_v63  ;;  %v785_v41 = vpop.xlane.xlu1 %784 }
 0x61c   :  { %1878 = vrcp.f32 %v785_v41 }
 0x61e   :  { %v1106_v4 = vpop.permute.xlu0 %1105 }
 0x61f   :  { %v1111_v9 = vsel %vm821_vm3, %v1106_v4, 0 }
 0x621   :  { %v1873_v42 = vpop.eup %1872 }
 0x622   :  { %v1875_v35 = vpop.eup %1874  ;;  %v804_v2 = vmul.f32 %v1873_v42, %v2637_v49 }
 0x623   :  { %v803_v3 = vmul.f32 %v1875_v35, %v2639_v25 }
 0x624   :  { %v812_v5 = vpack.c.bf16 %v804_v2, %v804_v2 }
 0x625   :  { %v1877_v6 = vpop.eup %1876  ;;  %v811_v7 = vpack.c.bf16 %v803_v3, %v803_v3 }
 0x626   :  { %v1879_v8 = vpop.eup %1878  ;;  %1750 = vmatmul.mubr.msk.bf16.vlgmr.msra.gmra.mrb[20].mxu1 %vm337_vm2, %v812_v5  ;;  %v806_v11 = vmul.f32 %v1877_v6, %v2643_v28 }
 0x627   :  { %1744 = vmatmul.mubr.msk.bf16.vlgmr.msra.gmra.mrb[28].mxu0 %vm337_vm2, %v811_v7  ;;  %1760 = vmatpush3.bf16.msra.mxu1 %v1111_v9  ;;  %v805_v44 = vmul.f32 %v1879_v8, %v2647_v30 }
 0x628   :  { %1754 = vmatpush3.bf16.msra.mxu0 %v1063_v10  ;;  %1755 = vmatprep.mubr.msk.bf16.mxu0 %vm2209_vm1, %v2208_v15  ;;  %v814_v13 = vpack.c.bf16 %v806_v11, %v806_v11 }
 0x629   :  { %1761 = vmatprep.mubr.msk.bf16.mxu1 %vm2209_vm1, %v2208_v15  ;;  %1765 = vmatprep.subr.bf16.mxu0 %v2208_v15  ;;  %v813_v14 = vpack.c.bf16 %v805_v44, %v805_v44 }
 0x62a   :  { %v791_v12 = vpop.xlane.xlu1 %790  ;;  %1771 = vmatprep.subr.bf16.mxu1 %v2208_v15 }
 0x62b   :  { %1880 = vrcp.f32 %v791_v12 }
 0x62e   :  { %1762 = vmatmul.mubr.msk.bf16.vlgmr.msra.gmra.mrb[24].mxu1 %vm337_vm2, %v814_v13  ;;  %v1154_v16 = vpop.permute.xlu1 %1153 }
 0x62f   :  { %1756 = vmatmul.mubr.msk.bf16.vlgmr.msra.gmra.mrb[32].mxu0 %vm337_vm2, %v813_v14  ;;  %v1159_v17 = vsel %vm821_vm3, %v1154_v16, 0  ;;  %1775 = vmatprep.mubr.msk.bf16.mxu1 %vm2209_vm1, %v2208_v15  ;;  %v1598_v16 = vld [vmem:[#allocation11] ss:$0 sm:$0xff] }
 0x630   :  { %1766 = vmatpush3.bf16.msra.mxu0 %v1159_v17  ;;  %1767 = vmatprep.mubr.msk.bf16.mxu0 %vm2209_vm1, %v2208_v15 }
 0x631   :  { %1779 = vmatprep.subr.bf16.mxu0 %v2208_v15  ;;  %1772 = vmatpush3.bf16.msra.mxu1 %v1834_v43 }
 0x632   :  { %1773 = vmatprep.subr.bf16.mxu1 %v2208_v15 }
 0x635   :  { %v1881_v18 = vpop.eup %1880  ;;  %1774 = vmatpush3.bf16.msra.mxu1 %v1835_v58 }
 0x636   :  { %v807_v19 = vmul.f32 %v1881_v18, %v2660_v46  ;;  %1787 = vmatprep.subr.bf16.mxu1 %v2208_v15 }
 0x638   :  { %v815_v20 = vpack.c.bf16 %v807_v19, %v807_v19 }
 0x63a   :  { %1768 = vmatmul.mubr.msk.bf16.vlgmr.msra.gmra.mrb[36].mxu0 %vm337_vm2, %v815_v20 }
 0x63b   :  { %1783 = vmatprep.mubr.msk.bf16.mxu0 %vm2209_vm1, %v2208_v15 }
 0x66b   :  { %v2706_v21 = vpop.f32.mrb[12].mxu1 }
 0x66c   :  { %v1727_v22 = vpop.f32.mrb[13].mxu1  ;;  %v1201_v7 = vpack.c.bf16 %v2706_v21, %v2706_v21 }
 0x66d   :  { %v862_v23 = vpop.f32.mrb[14].mxu1 }
 0x66e   :  { %v1728_v24 = vpop.f32.mrb[15].mxu1 }
 0x6c4   :  { %v955_v49 = vpop.f32.mrb[16].mxu1 }
 0x6c5   :  { %v907_v25 = vpop.f32.mrb[24].mxu0  ;;  %v1739_v39 = vpop.f32.mrb[17].mxu1  ;;  %v1203_v60 = vpack.c.bf16 %v955_v49, %v955_v49 }
 0x6c6   :  { %v1202_v27 = vpack.c.bf16 %v907_v25, %v907_v25  ;;  %v1733_v26 = vpop.f32.mrb[25].mxu0  ;;  %v958_v28 = vpop.f32.mrb[18].mxu1 }
 0x6c7   :  { %v910_v29 = vpop.f32.mrb[26].mxu0  ;;  %v1740_v30 = vpop.f32.mrb[19].mxu1 }
 0x6c8   :  { %1210 = vrot.lane.b32.xlu0 %v1202_v27, %s2201_s21  ;;  %v1734_v31 = vpop.f32.mrb[27].mxu0 }
 0x6f9   :  { %v1051_v32 = vpop.f32.mrb[20].mxu1 }
 0x6fa   :  { %v1003_v33 = vpop.f32.mrb[28].mxu0  ;;  %v1751_v34 = vpop.f32.mrb[21].mxu1  ;;  %v1205_v2 = vpack.c.bf16 %v1051_v32, %v1051_v32 }
 0x6fb   :  { %v1745_v36 = vpop.f32.mrb[29].mxu0  ;;  %v1054_v37 = vpop.f32.mrb[22].mxu1  ;;  %v1204_v41 = vpack.c.bf16 %v1003_v33, %v1003_v33  ;;  %v1836_v33 = vld [vmem:[#allocation16] sm:$0xff]   ;;  %v1837_v34 = vld [vmem:[#allocation16 + $0x8] sm:$0xff]  }
 0x6fc   :  { %v1006_v38 = vpop.f32.mrb[30].mxu0  ;;  %v1752_v40 = vpop.f32.mrb[23].mxu1  ;;  %1780 = vmatpush3.bf16.msra.mxu0 %v1836_v33  ;;  %v1838_v36 = vld [vmem:[#allocation19] sm:$0xff]   ;;  %v1839_v37 = vld [vmem:[#allocation19 + $0x8] sm:$0xff]  }
 0x6fd   :  { %v1746_v46 = vpop.f32.mrb[31].mxu0  ;;  %1781 = vmatprep.subr.bf16.mxu0 %v2208_v15 }
 0x700   :  { %1782 = vmatpush3.bf16.msra.mxu0 %v1837_v34 }
 0x701   :  { %v1147_v47 = vpop.f32.mrb[24].mxu1 }
 0x702   :  { %v1099_v48 = vpop.f32.mrb[32].mxu0  ;;  %v1207_v50 = vpack.c.bf16 %v1147_v47, %v1147_v47  ;;  %v1763_v52 = vpop.f32.mrb[25].mxu1 }
 0x703   :  { %v1206_v53 = vpack.c.bf16 %v1099_v48, %v1099_v48  ;;  %v1757_v54 = vpop.f32.mrb[33].mxu0  ;;  %v1150_v55 = vpop.f32.mrb[26].mxu1 }
 0x704   :  { %v1102_v56 = vpop.f32.mrb[34].mxu0  ;;  %v1764_v57 = vpop.f32.mrb[27].mxu1  ;;  %1231 = vrot.lane.b32.xlu1 %v1207_v50, %s2214_s1 }
 0x705   :  { %1228 = vrot.lane.b32.xlu0 %v1206_v53, %s2201_s21  ;;  %v1758_v59 = vpop.f32.mrb[35].mxu0  ;;  %v1602_v53 = vld [vmem:[#allocation13] ss:$0 sm:$0xff]  ;;  %v1603_v57 = vld [vmem:[#allocation14] ss:$0 sm:$0xff] }
 0x709   :  { %1213 = vrot.lane.b32.xlu0 %v1203_v60, %s2214_s1 }
 0x70d   :  { %v1195_v45 = vpop.f32.mrb[36].mxu0 }
 0x70e   :  { %v1208_v51 = vpack.c.bf16 %v1195_v45, %v1195_v45  ;;  %v1769_v61 = vpop.f32.mrb[37].mxu0 }
 0x70f   :  { %v1198_v62 = vpop.f32.mrb[38].mxu0  ;;  %v1841_v61 = vld [vmem:[#allocation19 + $0x18] sm:$0xff]  }
 0x710   :  { %1234 = vrot.lane.b32.xlu1 %v1208_v51, %s2215_s19  ;;  %v1770_v63 = vpop.f32.mrb[39].mxu0  ;;  %v1840_v51 = vld [vmem:[#allocation19 + $0x10] sm:$0xff]   ;;  %v1842_v62 = vld [vmem:[#allocation19 + $0x20] sm:$0xff]  }
 0x711   :  { %v1843_v63 = vld [vmem:[#allocation19 + $0x28] sm:$0xff]  }
 0x714   :  { %1216 = vrot.lane.b32.xlu1 %v1204_v41, %s2215_s19  ;;  %v1844_v41 = vld [vmem:[#allocation19 + $0x30] sm:$0xff]  }
 0x73a   :  { %v1211_v42 = vpop.permute.xlu0 %1210 }
 0x73b   :  { %v1220_v10 = vsel %vm337_vm2, %v1201_v7, %v1211_v42  ;;  %v1845_v42 = vld [vmem:[#allocation19 + $0x38] sm:$0xff]  }
 0x776   :  { %v1232_v3 = vpop.permute.xlu1 %1231 }
 0x777   :  { %v1229_v35 = vpop.permute.xlu0 %1228 }
 0x778   :  { %v1238_v4 = vsel %vm337_vm2, %v1205_v2, %v1229_v35  ;;  %v1604_v35 = vld [vmem:[#allocation17] ss:$0 sm:$0xff] }
 0x779   :  { %v1240_v5 = vsel %vm1221_vm4, %v1238_v4, %v1232_v3 }
 0x77b   :  { %v1214_v8 = vpop.permute.xlu0 %1213 }
 0x77c   :  { %v1223_v11 = vsel %vm1221_vm4, %v1220_v10, %v1214_v8 }
 0x782   :  { %v1235_v6 = vpop.permute.xlu1 %1234 }
 0x783   :  { %v1242_v9 = vsel %vm1224_vm5, %v1240_v5, %v1235_v6 }
 0x784   :  { %v1244_v44 = vrot.slane %v1242_v9, 4 }
 0x786   :  { %v1217_v12 = vpop.permute.xlu1 %1216 }
 0x787   :  { %v1226_v13 = vsel %vm1224_vm5, %v1223_v11, %v1217_v12 }
 0x788   :  { %v1246_v14 = vsel %vm821_vm3, %v1226_v13, %v1244_v44 }
 0x789   :  { %1776 = vmatmul.mubr.msk.bf16.vlgmr.msra.gmra.mrb[28].mxu1 %vm196_vm0, %v1246_v14 }
 0x78a   :  { %1803 = vmatprep.mubr.msk.bf16.mxu1 %vm2209_vm1, %v2208_v15  ;;  %1788 = vmatpush3.bf16.msra.mxu1 %v1838_v36 }
 0x78b   :  { %1789 = vmatprep.subr.bf16.mxu1 %v2208_v15 }
 0x78e   :  { %1790 = vmatpush3.bf16.msra.mxu1 %v1839_v37 }
 0x78f   :  { %1791 = vmatprep.subr.bf16.mxu1 %v2208_v15 }
 0x792   :  { %1792 = vmatpush3.bf16.msra.mxu1 %v1840_v51 }
 0x793   :  { %1793 = vmatprep.subr.bf16.mxu1 %v2208_v15 }
 0x796   :  { %1794 = vmatpush3.bf16.msra.mxu1 %v1841_v61 }
 0x797   :  { %1795 = vmatprep.subr.bf16.mxu1 %v2208_v15 }
 0x79a   :  { %1796 = vmatpush3.bf16.msra.mxu1 %v1842_v62 }
 0x79b   :  { %1797 = vmatprep.subr.bf16.mxu1 %v2208_v15 }
 0x79e   :  { %1798 = vmatpush3.bf16.msra.mxu1 %v1843_v63 }
 0x79f   :  { %1799 = vmatprep.subr.bf16.mxu1 %v2208_v15 }
 0x7a2   :  { %1800 = vmatpush3.bf16.msra.mxu1 %v1844_v41 }
 0x7a3   :  { %1801 = vmatprep.subr.bf16.mxu1 %v2208_v15 }
 0x7a6   :  { %1802 = vmatpush3.bf16.msra.mxu1 %v1845_v42 }
 0x85c   :  { %v1306_v17 = vpop.f32.mrb[28].mxu1 }
 0x85d   :  { %v1307_v18 = vadd.f32 %v1598_v16, %v1306_v17  ;;  %v1777_v19 = vpop.f32.mrb[29].mxu1 }
 0x85e   :  { %v1309_v20 = vpop.f32.mrb[30].mxu1 }
 0x85f   :  { %v2721_v21 = vadd.f32 %v1307_v18, %v2469_v0  ;;  %v1310_v22 = vadd.f32 %v1598_v16, %v1309_v20  ;;  %v1778_v23 = vpop.f32.mrb[31].mxu1  ;;  %v1608_v18 = vld [vmem:[#allocation20] ss:$0 sm:$0xff] }
 0x861   :  { %v2724_v24 = vadd.f32 %v1310_v22, %v2471_v1  ;;  %v1317_v49 = vsel %vm196_vm0, %v2721_v21, 0.0 }
 0x862   :  { %1318 = vadd.xlane.f32.xlu0 %v1317_v49 }
 0x863   :  { %v1320_v25 = vsel %vm196_vm0, %v2724_v24, 0.0 }
 0x864   :  { %1321 = vadd.xlane.f32.xlu1 %v1320_v25 }
 0x8ef   :  { %v1319_v39 = vpop.xlane.xlu0 %1318 }
 0x8f0   :  { %v1323_v27 = vmul.f32 0.03125, %v1319_v39 }
 0x8f1   :  { %v1322_v26 = vpop.xlane.xlu1 %1321 }
 0x8f2   :  { %v1325_v28 = vsub.f32 %v2721_v21, %v1323_v27  ;;  %v1324_v0 = vmul.f32 0.03125, %v1322_v26 }
 0x8f4   :  { %v1326_v29 = vsub.f32 %v2724_v24, %v1324_v0  ;;  %v1327_v30 = vmul.f32 %v1325_v28, %v1325_v28 }
 0x8f6   :  { %v1329_v1 = vsel %vm196_vm0, %v1327_v30, 0.0  ;;  %v1328_v31 = vmul.f32 %v1326_v29, %v1326_v29 }
 0x8f7   :  { %1330 = vadd.xlane.f32.xlu0 %v1329_v1 }
 0x8f8   :  { %v1332_v32 = vsel %vm196_vm0, %v1328_v31, 0.0 }
 0x8fb   :  { %1333 = vadd.xlane.f32.xlu0 %v1332_v32 }
 0x984   :  { %v1331_v38 = vpop.xlane.xlu0 %1330 }
 0x985   :  { %v1335_v40 = vmul.f32 0.03125, %v1331_v38 }
 0x987   :  { %v1337_v43 = vadd.f32 1e-05, %v1335_v40 }
 0x988   :  { %v1334_v46 = vpop.xlane.xlu0 %1333 }
 0x989   :  { %1882 = vrsqrt.f32 %v1337_v43  ;;  %v1336_v47 = vmul.f32 0.03125, %v1334_v46 }
 0x98b   :  { %v1338_v48 = vadd.f32 1e-05, %v1336_v47 }
 0x98d   :  { %1884 = vrsqrt.f32 %v1338_v48 }
 0x993   :  { %v1883_v50 = vpop.eup %1882 }
 0x994   :  { %v1341_v52 = vmul.f32 %v1883_v50, %v1325_v28 }
 0x996   :  { %v1349_v55 = vmul.f32 %v1602_v53, %v1341_v52 }
 0x997   :  { %v1885_v54 = vpop.eup %1884 }
 0x998   :  { %v1342_v56 = vmul.f32 %v1885_v54, %v1326_v29  ;;  %v1357_v59 = vadd.f32 %v1603_v57, %v1349_v55 }
 0x99a   :  { %v1350_v58 = vmul.f32 %v1602_v53, %v1342_v56 }
 0x99c   :  { %v1358_v60 = vadd.f32 %v1603_v57, %v1350_v58 }
 0x99e   :  { %v1359_v45 = vpack.c.bf16 %v1358_v60, %v1357_v59 }
 0x9a0   :  { %1784 = vmatmul.mubr.msk.bf16.vlgmr.msra.gmra.mrb[40].mxu0 %vm196_vm0, %v1359_v45 }
 0xa73   :  { %v1420_v2 = vpop.f32.mrb[40].mxu0 }
 0xa74   :  { %v1421_v3 = vadd.f32 %v1604_v35, %v1420_v2  ;;  %v1785_v4 = vpop.f32.mrb[41].mxu0 }
 0xa75   :  { %v1423_v5 = vpop.f32.mrb[42].mxu0 }
 0xa76   :  { %v1429_v6 = vmul.f32 0.70710677, %v1421_v3  ;;  %v1424_v7 = vadd.f32 %v1604_v35, %v1423_v5  ;;  %v1786_v8 = vpop.f32.mrb[43].mxu0  ;;  %v1427_v12 = vmul.f32 0.5, %v1421_v3 }
 0xa78   :  { %1886 = verf.f32 %v1429_v6  ;;  %v1430_v9 = vmul.f32 0.70710677, %v1424_v7  ;;  %v1428_v13 = vmul.f32 0.5, %v1424_v7 }
 0xa7a   :  { %1888 = verf.f32 %v1430_v9 }
 0xa82   :  { %v1887_v10 = vpop.eup %1886 }
 0xa83   :  { %v1433_v11 = vadd.f32 1.0, %v1887_v10 }
 0xa84   :  { %v1889_v44 = vpop.eup %1888 }
 0xa85   :  { %v1434_v14 = vadd.f32 1.0, %v1889_v44  ;;  %v1435_v15 = vmul.f32 %v1433_v11, %v1427_v12 }
 0xa87   :  { %v1436_v16 = vmul.f32 %v1434_v14, %v1428_v13 }
 0xa89   :  { %v1437_v17 = vpack.c.bf16 %v1436_v16, %v1435_v15 }
 0xa8b   :  { %1804 = vmatmul.mubr.bf16.vlgmr.msra.gmra.mrb[32].mxu1 %v1437_v17 }
 0xb5e   :  { %v1543_v19 = vpop.f32.mrb[32].mxu1 }
 0xb5f   :  { %v1544_v20 = vadd.f32 %v1608_v18, %v1543_v19  ;;  %v1805_v22 = vpop.f32.mrb[33].mxu1 }
 0xb60   :  { %v1546_v23 = vpop.f32.mrb[34].mxu1 }
 0xb61   :  { %v1550_v49 = vadd.f32 %v1544_v20, %v2721_v21  ;;  %v1547_v25 = vadd.f32 %v1608_v18, %v1546_v23  ;;  %v1806_v39 = vpop.f32.mrb[35].mxu1 }
 0xb63   :  { %1552 = vst.msk [vmem:[#allocation22] sm:$0xff] %vm196_vm0, %v1550_v49  ;;  %v1551_v27 = vadd.f32 %v1547_v25, %v2724_v24 }
 0xb65   :  { %1553 = vst.msk [vmem:[#allocation22 + $0x8] sm:$0xff] %vm196_vm0, %v1551_v27 }
 0xb66   :  { %2165 = shalt.err (!%p2162_p2)
}
 0xb67   :  { %s2166_s4 = scalar_lea.hbm %s2774_s12, 256 }
 0xb68   :  { %p2167_p3 = scmp.ne.s32.totalorder %s2774_s12, %s2166_s4  ;;  %p2170_p4 = scmp.lt.u32.totalorder %s2166_s4, %s2774_s12 }
 0xb6a   :  { %p2172_p5 = pnand %p2170_p4, %p2167_p3 }
 0xb6c   :  { %2175 = shalt.err (!%p2172_p5)
}
 0xb6d   :  { %1565 = dma.vmem_to_hbm [thread:$0]  %s1560_s3, 256, %s2774_s12, [#allocation4], %s2200_s9, %s2200_s9, %s2201_s21  }
 0xb6e   :  { %2190 = dma.done.wait [#allocation4], 256  }
 0xb6f   :  { %2191 = vsyncadd [#allocation4], 4294967040 }
 0xb70   :  { %1569 = vsyncpa [#allocation3], 1 }
 0xb71   :  { %1570 = vsyncpa [#allocation6], 1 }
 0xb72   :  { %1571 = vsyncpa [#allocation9], 1 }
 0xb73   :  { %1572 = vsyncpa [#allocation12], 1 }
 0xb74   :  { %1573 = vsyncpa [#allocation15], 1 }
 0xb75   :  { %1574 = vsyncpa [#allocation18], 1 }
 0xb76   :  { %1575 = vsyncpa [#allocation21], 1 }
 0xb77   :  { %1576 = vsyncpa [#allocation4], 1 }

</bundles_post_ra>
